<compile_context>
chip_gen: v6e
topology: v6e:2x2x1
jax: 0.10.0
libtpu: 0.0.40
codegen_flags: <defaults>
</compile_context>

<pallas_src>
import jax
import jax.numpy as jnp
from jax.experimental import pallas as pl
from jax.experimental.pallas import tpu as pltpu

IMAGENET_MEAN = (0.485, 0.456, 0.406)
IMAGENET_STD = (0.229, 0.224, 0.225)

INPUT_SIZE = 48                      # input_size (small; 48 % n_grid == 0)
N_GRID = 3                           # n_grid
CROP = INPUT_SIZE // N_GRID          # crop_size = 16
G2 = N_GRID * N_GRID                 # 9 crops
C = 3

HW = INPUT_SIZE * INPUT_SIZE         # 2304
CHW = C * HW                         # 6912 = 54 * 128   (lane-dense)
CROP2 = CROP * CROP                  # 256
JROW = C * CROP2                     # 768  =  6 * 128   (lane-dense)

# Fused ToTensor + Normalize constants:  out = u8 * SCALE[c] + BIAS[c]
SCALE = tuple(1.0 / (255.0 * s) for s in IMAGENET_STD)
BIAS = tuple(-m / s for m, s in zip(IMAGENET_MEAN, IMAGENET_STD))

# Double-buffered per-step working-set budget; keeps the kernel comfortably
# inside v7x's 64 MiB physical VMEM (and v5e/v6e scoped limits once raised).
_WORKING_SET_BUDGET = 24 << 20
_TILE_CANDIDATES = (128, 64, 32, 16, 8)


def _scale_bias_rows(n_lanes, bound1, bound2):
    """Per-lane channel scale/bias rows, built from compile-time constants.

    Channel of a lane:  0 if lane < bound1, 1 if lane < bound2, else 2.
    (Compare+select only; boundaries are 128-aligned, constant-foldable.)
    """
    lane = jax.lax.broadcasted_iota(jnp.int32, (1, n_lanes), 1)

    def sel(v):
        return jnp.where(lane < bound1, jnp.float32(v[0]),
                         jnp.where(lane < bound2, jnp.float32(v[1]),
                                   jnp.float32(v[2])))

    return sel(SCALE), sel(BIAS)


def _pirl_kernel(xf_ref, xj_ref, img_ref, jig_ref):
    # xf_ref : (TB,      CHW ) uint8     full image, (c, h, w) flat on lanes
    # xj_ref : (TB * G2, JROW) uint8     jigsaw crops, (c, r, w) flat on lanes
    # img_ref: (TB,      CHW ) bf16/f32
    # jig_ref: (TB * G2, JROW) bf16/f32

    # --- no_augment branch: fused ToTensor + Normalize, cast on store --------
    scale_f, bias_f = _scale_bias_rows(CHW, HW, 2 * HW)
    xf = xf_ref[...].astype(jnp.float32)
    img_ref[...] = (xf * scale_f + bias_f).astype(img_ref.dtype)

    # --- jigsaw branch: fused ToTensor + Normalize on pre-gathered crops -----
    scale_j, bias_j = _scale_bias_rows(JROW, CROP2, 2 * CROP2)
    xj = xj_ref[...].astype(jnp.float32)
    jig_ref[...] = (xj * scale_j + bias_j).astype(jig_ref.dtype)


def _pick_tile(padded_batch, per_image_bytes):
    """Images per grid step.

    Candidates are multiples of 8 (keeps uint8/f32 blocks sublane-aligned) that
    divide the (padded) batch and fit the double-buffered VMEM budget.  Prefer
    the largest tile that also gives an even step count >= 2 so v7x's two
    TensorCores split the 'parallel' grid evenly, but never drop below 32
    images/step for it (per-step overhead would dominate).
    """
    divs = [tb for tb in _TILE_CANDIDATES
            if padded_batch % tb == 0
            and 2 * tb * per_image_bytes <= _WORKING_SET_BUDGET]
    assert divs, "padded batch must be a multiple of 8"
    for tb in divs:
        if tb >= 32 and (padded_batch // tb) % 2 == 0:
            return tb
    return divs[0]


def pirl_collate_forward(images_u8, labels, fnames, *, out_dtype=jnp.bfloat16):
    """Mirrors PIRLCollateFunction.forward.

    images_u8: (B, C, H, W) uint8 ("decoded PIL" images).
    out_dtype: jnp.bfloat16 (default, halves output HBM traffic) or
               jnp.float32 (exact torch ToTensor+Normalize dtype).
    Returns ((img, img_transforms), labels, fnames).
    """
    B, c_, h_, w_ = images_u8.shape
    assert (c_, h_, w_) == (C, INPUT_SIZE, INPUT_SIZE)

    out_bytes = jnp.dtype(out_dtype).itemsize
    per_image_bytes = (CHW + G2 * JROW) * (1 + out_bytes)   # u8 in + out

    # Pad the batch to a multiple of 8 so the sublane dimension of every block
    # is tile-aligned and the VMEM footprint stays bounded for any B.
    PB = ((B + 7) // 8) * 8
    if PB != B:
        images_pad = jnp.pad(images_u8, ((0, PB - B), (0, 0), (0, 0), (0, 0)))
    else:
        images_pad = images_u8

    # Lane-dense 2-D views (free reshape; no HBM pass).
    x_full = images_pad.reshape(PB, CHW)

    # Jigsaw crop gather as uint8 layout plumbing (wrapper side): permuting
    # uint8 is 2-4x cheaper than permuting the normalized output.
    # (B, c, gr, r, gc, w) -> (B, gr, gc, c, r, w) -> (B*G2, JROW)
    # TODO(synk): fusing this gather into the kernel would save ~14 KB/img of
    # HBM traffic, but the 16-element-granule lane shuffle it requires risks
    # scalarizing / heavy relayouts in Mosaic, so it stays wrapper-side.
    x_jig = (
        images_pad.reshape(PB, C, N_GRID, CROP, N_GRID, CROP)
        .transpose(0, 2, 4, 1, 3, 5)
        .reshape(PB * G2, JROW)
    )

    TB = _pick_tile(PB, per_image_bytes)
    grid = (PB // TB,)
    vmem_limit = max(32 << 20, 4 * TB * per_image_bytes + (8 << 20))

    img_flat, jig_flat = pl.pallas_call(
        _pirl_kernel,
        grid=grid,
        in_specs=[
            pl.BlockSpec((TB, CHW), lambda b: (b, 0)),
            pl.BlockSpec((TB * G2, JROW), lambda b: (b, 0)),
        ],
        out_specs=[
            pl.BlockSpec((TB, CHW), lambda b: (b, 0)),
            pl.BlockSpec((TB * G2, JROW), lambda b: (b, 0)),
        ],
        out_shape=[
            jax.ShapeDtypeStruct((PB, CHW), out_dtype),
            jax.ShapeDtypeStruct((PB * G2, JROW), out_dtype),
        ],
        compiler_params=pltpu.CompilerParams(
            dimension_semantics=("parallel",),
            vmem_limit_bytes=int(vmem_limit)),
    )(x_full, x_jig)

    img = img_flat.reshape(PB, C, INPUT_SIZE, INPUT_SIZE)[:B]   # free + slice
    jig = jig_flat.reshape(PB, G2, C, CROP, CROP)[:B]           # free + slice

    labels = jnp.asarray(labels, jnp.int32)  # torch.LongTensor equivalent
    return (img, jig), labels, fnames


def _reference(images_u8):
    x = images_u8.astype(jnp.float32) / 255.0
    mean = jnp.asarray(IMAGENET_MEAN, jnp.float32).reshape(1, 3, 1, 1)
    std = jnp.asarray(IMAGENET_STD, jnp.float32).reshape(1, 3, 1, 1)
    xn = (x - mean) / std
    crops = []
    for g in range(G2):
        r0 = (g // N_GRID) * CROP
        c0 = (g % N_GRID) * CROP
        crops.append(xn[:, :, r0:r0 + CROP, c0:c0 + CROP])
    return xn, jnp.stack(crops, axis=1)


def _check(B, key, out_dtype=jnp.bfloat16):
    imgs = jax.random.randint(
        key, (B, C, INPUT_SIZE, INPUT_SIZE), 0, 256, dtype=jnp.int32
    ).astype(jnp.uint8)
    labels = jnp.arange(B)
    fnames = [f"img_{i}.png" for i in range(B)]

    (img, jig), out_labels, _ = pirl_collate_forward(
        imgs, labels, fnames, out_dtype=out_dtype)
    jax.block_until_ready((img, jig, out_labels))

    ref_img, ref_jig = _reference(imgs)
    assert img.shape == (B, C, INPUT_SIZE, INPUT_SIZE)
    assert jig.shape == (B, G2, C, CROP, CROP)
    assert img.dtype == out_dtype and jig.dtype == out_dtype
    assert out_labels.dtype == jnp.int32
    atol = 2e-2 if out_dtype == jnp.bfloat16 else 1e-5
    assert jnp.allclose(img.astype(jnp.float32), ref_img, atol=atol, rtol=0)
    assert jnp.allclose(jig.astype(jnp.float32), ref_jig, atol=atol, rtol=0)


if __name__ == "__main__":
    key = jax.random.PRNGKey(0)
    k1, k2, k3, k4 = jax.random.split(key, 4)

    # Even-grid path (v7x 2-TC friendly): B=64 -> TB=32, grid=(2,).
    _check(64, k1)
    # Odd-step tiled path: B=96 -> TB=32, grid=(3,).
    _check(96, k2)
    # Padding path for tiny / non-multiple-of-8 batches: B=2 -> padded to 8.
    _check(2, k3)
    # float32 output option (exact torch ToTensor+Normalize dtype).
    _check(8, k4, out_dtype=jnp.float32)

    print("KERNEL_OK")
</pallas_src>

<mosaic_0001>
module attributes {stable_mosaic.version = 11 : i64} {
  func.func @_pirl_kernel(%arg0: i32, %arg1: memref<32x6912xi8, #tpu.memory_space<vmem>>, %arg2: memref<288x768xi8, #tpu.memory_space<vmem>>, %arg3: memref<32x6912xbf16, #tpu.memory_space<vmem>>, %arg4: memref<288x768xbf16, #tpu.memory_space<vmem>>) attributes {dimension_semantics = [#tpu.dimension_semantics<parallel>], iteration_bounds = array<i64: 2>, scalar_prefetch = 0 : i64, scratch_operands = 0 : i64, tpu.core_type = #tpu.core_type<tc>, window_params = [{transform_indices = @transform_0, window_bounds = array<i64: 32, 6912>}, {transform_indices = @transform_1, window_bounds = array<i64: 288, 768>}, {transform_indices = @transform_2, window_bounds = array<i64: 32, 6912>}, {transform_indices = @transform_3, window_bounds = array<i64: 288, 768>}]} {
    %0 = tpu.iota {dimensions = array<i32: 1>} : vector<1x6912xi32>
    %c2304_i32 = arith.constant 2304 : i32
    %1 = vector.broadcast %c2304_i32 : i32 to vector<1x6912xi32>
    %2 = arith.cmpi slt, %0, %1 : vector<1x6912xi32>
    %c4608_i32 = arith.constant 4608 : i32
    %3 = vector.broadcast %c4608_i32 : i32 to vector<1x6912xi32>
    %4 = arith.cmpi slt, %0, %3 : vector<1x6912xi32>
    %cst = arith.constant 0.0175070036 : f32
    %cst_0 = arith.constant 0.0174291935 : f32
    %5 = vector.broadcast %cst : f32 to vector<1x6912xf32>
    %6 = vector.broadcast %cst_0 : f32 to vector<1x6912xf32>
    %7 = arith.select %4, %5, %6 : vector<1x6912xi1>, vector<1x6912xf32>
    %cst_1 = arith.constant 0.0171247534 : f32
    %8 = vector.broadcast %cst_1 : f32 to vector<1x6912xf32>
    %9 = arith.select %2, %8, %7 : vector<1x6912xi1>, vector<1x6912xf32>
    %c2304_i32_2 = arith.constant 2304 : i32
    %10 = vector.broadcast %c2304_i32_2 : i32 to vector<1x6912xi32>
    %11 = arith.cmpi slt, %0, %10 : vector<1x6912xi32>
    %c4608_i32_3 = arith.constant 4608 : i32
    %12 = vector.broadcast %c4608_i32_3 : i32 to vector<1x6912xi32>
    %13 = arith.cmpi slt, %0, %12 : vector<1x6912xi32>
    %cst_4 = arith.constant -2.03571439 : f32
    %cst_5 = arith.constant -1.80444443 : f32
    %14 = vector.broadcast %cst_4 : f32 to vector<1x6912xf32>
    %15 = vector.broadcast %cst_5 : f32 to vector<1x6912xf32>
    %16 = arith.select %13, %14, %15 : vector<1x6912xi1>, vector<1x6912xf32>
    %cst_6 = arith.constant -2.11790395 : f32
    %17 = vector.broadcast %cst_6 : f32 to vector<1x6912xf32>
    %18 = arith.select %11, %17, %16 : vector<1x6912xi1>, vector<1x6912xf32>
    %c0 = arith.constant 0 : index
    %c0_7 = arith.constant 0 : index
    %19 = vector.load %arg1[%c0, %c0_7] : memref<32x6912xi8, #tpu.memory_space<vmem>>, vector<32x6912xi8>
    %20 = arith.uitofp %19 : vector<32x6912xi8> to vector<32x6912xf32>
    %21 = vector.broadcast %9 : vector<1x6912xf32> to vector<32x6912xf32>
    %22 = arith.mulf %20, %21 : vector<32x6912xf32>
    %23 = vector.broadcast %18 : vector<1x6912xf32> to vector<32x6912xf32>
    %24 = arith.addf %22, %23 : vector<32x6912xf32>
    %25 = arith.truncf %24 : vector<32x6912xf32> to vector<32x6912xbf16>
    %c0_8 = arith.constant 0 : index
    %c0_9 = arith.constant 0 : index
    %26 = vector.load %arg3[%c0_8, %c0_9] : memref<32x6912xbf16, #tpu.memory_space<vmem>>, vector<32x6912xbf16>
    tpu.vector_store %arg3[%c0_8, %c0_9], %25 {strides = array<i32>} : memref<32x6912xbf16, #tpu.memory_space<vmem>>, vector<32x6912xbf16>,
    %27 = tpu.iota {dimensions = array<i32: 1>} : vector<1x768xi32>
    %c256_i32 = arith.constant 256 : i32
    %28 = vector.broadcast %c256_i32 : i32 to vector<1x768xi32>
    %29 = arith.cmpi slt, %27, %28 : vector<1x768xi32>
    %c512_i32 = arith.constant 512 : i32
    %30 = vector.broadcast %c512_i32 : i32 to vector<1x768xi32>
    %31 = arith.cmpi slt, %27, %30 : vector<1x768xi32>
    %cst_10 = arith.constant 0.0175070036 : f32
    %cst_11 = arith.constant 0.0174291935 : f32
    %32 = vector.broadcast %cst_10 : f32 to vector<1x768xf32>
    %33 = vector.broadcast %cst_11 : f32 to vector<1x768xf32>
    %34 = arith.select %31, %32, %33 : vector<1x768xi1>, vector<1x768xf32>
    %cst_12 = arith.constant 0.0171247534 : f32
    %35 = vector.broadcast %cst_12 : f32 to vector<1x768xf32>
    %36 = arith.select %29, %35, %34 : vector<1x768xi1>, vector<1x768xf32>
    %c256_i32_13 = arith.constant 256 : i32
    %37 = vector.broadcast %c256_i32_13 : i32 to vector<1x768xi32>
    %38 = arith.cmpi slt, %27, %37 : vector<1x768xi32>
    %c512_i32_14 = arith.constant 512 : i32
    %39 = vector.broadcast %c512_i32_14 : i32 to vector<1x768xi32>
    %40 = arith.cmpi slt, %27, %39 : vector<1x768xi32>
    %cst_15 = arith.constant -2.03571439 : f32
    %cst_16 = arith.constant -1.80444443 : f32
    %41 = vector.broadcast %cst_15 : f32 to vector<1x768xf32>
    %42 = vector.broadcast %cst_16 : f32 to vector<1x768xf32>
    %43 = arith.select %40, %41, %42 : vector<1x768xi1>, vector<1x768xf32>
    %cst_17 = arith.constant -2.11790395 : f32
    %44 = vector.broadcast %cst_17 : f32 to vector<1x768xf32>
    %45 = arith.select %38, %44, %43 : vector<1x768xi1>, vector<1x768xf32>
    %c0_18 = arith.constant 0 : index
    %c0_19 = arith.constant 0 : index
    %46 = vector.load %arg2[%c0_18, %c0_19] : memref<288x768xi8, #tpu.memory_space<vmem>>, vector<288x768xi8>
    %47 = arith.uitofp %46 : vector<288x768xi8> to vector<288x768xf32>
    %48 = vector.broadcast %36 : vector<1x768xf32> to vector<288x768xf32>
    %49 = arith.mulf %47, %48 : vector<288x768xf32>
    %50 = vector.broadcast %45 : vector<1x768xf32> to vector<288x768xf32>
    %51 = arith.addf %49, %50 : vector<288x768xf32>
    %52 = arith.truncf %51 : vector<288x768xf32> to vector<288x768xbf16>
    %c0_20 = arith.constant 0 : index
    %c0_21 = arith.constant 0 : index
    %53 = vector.load %arg4[%c0_20, %c0_21] : memref<288x768xbf16, #tpu.memory_space<vmem>>, vector<288x768xbf16>
    tpu.vector_store %arg4[%c0_20, %c0_21], %52 {strides = array<i32>} : memref<288x768xbf16, #tpu.memory_space<vmem>>, vector<288x768xbf16>,
    return
  }
  func.func @transform_0(%arg0: i32) -> (i32, i32) {
    %c0_i32 = arith.constant 0 : i32
    %c0_i32_0 = arith.constant 0 : i32
    return %arg0, %c0_i32 : i32, i32
  }
  func.func @transform_1(%arg0: i32) -> (i32, i32) {
    %c0_i32 = arith.constant 0 : i32
    %c0_i32_0 = arith.constant 0 : i32
    return %arg0, %c0_i32 : i32, i32
  }
  func.func @transform_2(%arg0: i32) -> (i32, i32) {
    %c0_i32 = arith.constant 0 : i32
    %c0_i32_0 = arith.constant 0 : i32
    return %arg0, %c0_i32 : i32, i32
  }
  func.func @transform_3(%arg0: i32) -> (i32, i32) {
    %c0_i32 = arith.constant 0 : i32
    %c0_i32_0 = arith.constant 0 : i32
    return %arg0, %c0_i32 : i32, i32
  }
}

</mosaic_0001>

<bundles_post_ra>
// kernel: tpu_custom_call.1
= control target key start
LH: loop header
LB: loop body
LE: loop exit
PB: predicated region body
PF: predicated region fallthrough
CT: control target
= control target key end

     0   :  { %9 = vsyncpa [#allocation3], 0  ;;  %s6745_s0 = inlined_call_operand.hbm [shape: u8[64,6912], index: 0, kind: input, shape index: {}]   ;;  %s6746_s1 = inlined_call_operand.hbm [shape: u8[576,768], index: 1, kind: input, shape index: {}]   ;;  %s6747_s2 = inlined_call_operand.hbm [shape: bf16[64,6912], index: 2, kind: output, shape index: {0}]   ;;  %s6748_s3 = inlined_call_operand.hbm [shape: bf16[576,768], index: 3, kind: output, shape index: {1}]  }
   0x1   :  { %11 = vsyncpa [#allocation3 + $0x1], 0 }
   0x2   :  { %12 = vsyncpa [#allocation6], 0 }
   0x3   :  { %14 = vsyncpa [#allocation6 + $0x1], 0 }
   0x4   :  { %15 = vsyncpa [#allocation4], 0 }
   0x5   :  { %17 = vsyncpa [#allocation4 + $0x1], 0 }
   0x6   :  { %18 = vsyncpa [#allocation9], 0 }
   0x7   :  { %20 = vsyncpa [#allocation9 + $0x1], 0  ;;  %s5358_s12 = smov 0   ;;  %s5360_s13 = smov 0  }
   0x8   :  { %s5362_s14 = smov 0   ;;  %s5364_s15 = smov 0  }
   0x9 LB: > { %s5379_s16 = sadd.s32 4294967295, %s5326_s15   ;;  %s4602_s17 = sadd.s32 4294967294, %s5326_s15   ;;  %s5326_s15 = sphi %s5364_s15, %s6852_s15   ;;  %s5322_s14 = sphi %s5362_s14, %s6851_s14   ;;  %s5318_s13 = sphi %s5360_s13, %s6850_s13   ;;  %s5314_s12 = sphi %s5358_s12, %s6849_s12  }
   0xa   : > { %s5383_s18 = sadd.s32 1, %s5326_s15   ;;  %s33_s19 = sadd.s32 1, %s5322_s14 }
   0xb   : > { %s30_s20 = ssub.s32 %s5326_s15, %s5383_s18  ;;  %p40_p0 = scmp.ne.s32.totalorder %s5322_s14, %s5318_s13 }
   0xc   : > { %p31_p1 = scmp.eq.s32.totalorder %s30_s20, 0  ;;  %p41_p2 = scmp.eq.s32.totalorder %s5326_s15, 0 }
   0xd   : > { %p46_p3 = scmp.ne.s32.totalorder %s5318_s13, %s5314_s12  ;;  %p47_p4 = scmp.eq.s32.totalorder %s5379_s16, 0 }
   0xe   : > { %s5395_s21 = scalar_select %p31_p1, %s5322_s14, %s33_s19  }
   0xf   : > { %p42_p5 = por %p41_p2, %p40_p0  ;;  %p5397_p6 = por %p47_p4, %p46_p3 }
  0x10   : > { %p96_p7 = scmp.eq.s32.totalorder %s5379_s16, 1  ;;  %p102_p8 = scmp.eq.s32.totalorder %s4602_s17, 1 }
  0x11   : > { %s6780_s22 = scalar_select %p5397_p6, 1, 0 }
  0x12   : > { %p5076_p10 = scmp.lt.s32.totalorder %s5326_s15, 2  ;;  %p5404_p11 = por %p96_p7, %p40_p0 }
  0x13   : > { %p5408_p12 = por %p102_p8, %p46_p3  ;;  %s5413_s25 = sand.u32 1, %s5322_s14  }
  0x14   : > { %s6781_s23 = scalar_select %p5404_p11, 1, 0 }
  0x15   : > { %s6782_s24 = scalar_select %p5408_p12, 1, 0 }
  0x16   : > { %s5047_s26 = smul.u32 6912, %s5326_s15  ;;  %p5424_p13 = pnand %p5076_p10, %p42_p5 }
  0x17   : > { %s5046_s27 = smul.u32 432, %s5413_s25  ;;  %s149_s7 = scalar_lea.sflag [#allocation3], %s5413_s25 }
  0x18   : > { %s5422_s30 = scalar_lea.hbm %s6745_s0, %s5047_s26  ;;  %p5174_p1 = pneg %p5424_p13 }
  0x19   : > { %s152_s5 = scalar_lea.vmem [#allocation2], %s5046_s27  ;;  %s5172_s8 = scalar_lea.hbm %s5422_s30, 6912 }
  0x1a   : > { %s160_s6 = sshll.u32 %s152_s5, 4  ;;  %p5173_p0 = scmp.ne.s32.totalorder %s5422_s30, %s5172_s8  ;;  %s161_s6 = int_to_ptr.vmem [resolvable:$true] %s160_s6 }
  0x1b   : > { %s5177_s11 = scalar_lea.hbm %s6745_s0, 13824  ;;  %p5178_p4 = scmp.lt.s32.totalorder %s5422_s30, %s6745_s0 }
  0x1c   : > { %p5175_p2 = pnand %p5174_p1, %p5173_p0  ;;  %p5179_p5 = scmp.lt.s32.totalorder %s5177_s11, %s5172_s8 }
  0x1e   : > { %p5176_p3 = pneg %p5175_p2  ;;  %p5180_p7 = por %p5179_p5, %p5178_p4 }
  0x20   : > { %p5181_p8 = pnand %p5180_p7, %p5176_p3 }
  0x22   : > { %5184 = shalt.err (!%p5181_p8)
}
  0x23   : > { %s5185_s20 = scalar_lea.vmem %s161_s6, 6912  ;;  %s5328_s28 = smov [#allocation2]  }
  0x24   : > { %p5186_p10 = scmp.ne.s32.totalorder %s161_s6, %s5185_s20  ;;  %s5190_s29 = sshll.u32 %s5328_s28, 4  ;;  %s5191_s29 = int_to_ptr.vmem [resolvable:$false] %s5190_s29 }
  0x25   : > { %s5192_s5 = scalar_lea.vmem %s5191_s29, 13824  ;;  %p5193_p2 = scmp.lt.s32.totalorder %s161_s6, %s5191_s29 }
  0x26   : > { %p5188_p9 = pnand %p5186_p10, %p5174_p1  ;;  %p5194_p12 = scmp.lt.s32.totalorder %s5192_s5, %s5185_s20 }
  0x28   : > { %p5189_p0 = pneg %p5188_p9  ;;  %p5195_p11 = por %p5194_p12, %p5193_p2 }
  0x2a   : > { %p5196_p6 = pnand %p5195_p11, %p5189_p0 }
  0x2c   : > { %5199 = shalt.err (!%p5196_p6)
}
  0x2d   : > { %5065 = dma.hbm_to_vmem [thread:$0]  (!%p5424_p13), %s5422_s30, 6912, %s161_s6, %s149_s7  }
  0x2e   : > { %s5456_s10 = scalar_lea.hbm %s6746_s1, %s5047_s26  ;;  %s171_s11 = scalar_lea.vmem [#allocation5], %s5046_s27 }
  0x2f   : > { %s179_s17 = sshll.u32 %s171_s11, 4  ;;  %p4607_p6 = scmp.ge.s32.totalorder %s5326_s15, 1  ;;  %s5462_s17 = int_to_ptr.vmem [resolvable:$true] %s179_s17 }
  0x30   : > { %p187_p9 = scmp.lt.s32.totalorder %s5326_s15, 3  ;;  %s168_s30 = scalar_lea.sflag [#allocation6], %s5413_s25 }
  0x31   : > { %s5200_s6 = scalar_lea.hbm %s5456_s10, 6912  ;;  %s5205_s27 = scalar_lea.hbm %s6746_s1, 13824 }
  0x32   : > { %p5464_p11 = pnand %p4607_p6, %p187_p9  ;;  %p5201_p12 = scmp.ne.s32.totalorder %s5456_s10, %s5200_s6 }
  0x33   : > { %p5206_p5 = scmp.lt.s32.totalorder %s5456_s10, %s6746_s1  ;;  %p5207_p7 = scmp.lt.s32.totalorder %s5205_s27, %s5200_s6 }
  0x34   : > { %p5203_p3 = pnand %p5201_p12, %p5174_p1 }
  0x35   : > { %p5208_p8 = por %p5207_p7, %p5206_p5 }
  0x36   : > { %p5204_p4 = pneg %p5203_p3 }
  0x38   : > { %p5209_p10 = pnand %p5208_p8, %p5204_p4 }
  0x3a   : > { %5212 = shalt.err (!%p5209_p10)
}
  0x3b   : > { %s5213_s29 = scalar_lea.vmem %s5462_s17, 6912  ;;  %s5329_s5 = smov [#allocation5]  }
  0x3c   : > { %p5214_p0 = scmp.ne.s32.totalorder %s5462_s17, %s5213_s29  ;;  %s5218_s8 = sshll.u32 %s5329_s5, 4  ;;  %s5219_s8 = int_to_ptr.vmem [resolvable:$false] %s5218_s8 }
  0x3d   : > { %s5220_s9 = scalar_lea.vmem %s5219_s8, 13824  ;;  %p5221_p9 = scmp.lt.s32.totalorder %s5462_s17, %s5219_s8 }
  0x3e   : > { %p5216_p2 = pnand %p5214_p0, %p5174_p1  ;;  %p5222_p12 = scmp.lt.s32.totalorder %s5220_s9, %s5213_s29 }
  0x40   : > { %p5217_p6 = pneg %p5216_p2  ;;  %p5223_p3 = por %p5222_p12, %p5221_p9 }
  0x42   : > { %p5224_p5 = pnand %p5223_p3, %p5217_p6 }
  0x44   : > { %5227 = shalt.err (!%p5224_p5)
}
  0x45   : > { %s5330_s11 = smov 768   ;;  %s5331_s6 = smov 48  }
  0x46   : > { %5068 = dma.hbm_to_vmem [thread:$0]  (!%p5424_p13), %s5456_s10, 6912, %s5462_s17, %s168_s30, %s5330_s11, %s5330_s11, %s5331_s6  }
  0x47   : > { %191 = sbr.rel (%p5464_p11) target bundleno = 710 (0x2c6), region = 28 }
  0x4c   : > { %s5496_s26 = sand.u32 1, %s5318_s13   ;;  %p6785_p1 = scmp.ne.s32.totalorder %s6780_s22, 0 }
  0x4d   : > { %s5050_s7 = smul.u32 432, %s5496_s26  ;;  %s194_s27 = scalar_lea.sflag [#allocation3], %s5496_s26 }
  0x4f   : > { %s5500_s20 = scalar_lea.vmem [#allocation2], %s5050_s7 }
  0x50   : > { %5297 = dma.done.wait (%p6785_p1), %s194_s27, 6912  }
  0x51   : > { %5299 = vsyncadd (%p6785_p1), %s194_s27, 4294960384  ;;  %s203_s25 = scalar_lea.sflag [#allocation6], %s5496_s26  ;;  %s5507_s4 = scalar_lea.vmem [#allocation5], %s5050_s7 }
  0x52   : > { %5301 = dma.done.wait (%p6785_p1), %s203_s25, 6912  }
  0x53   : > { %5303 = vsyncadd (%p6785_p1), %s203_s25, 4294960384  ;;  %v5514_v0 = vld [vmem:[%s5500_s20] sm:$0xff]  ;;  %v5517_v1 = vld [vmem:[%s5500_s20 + $0x8] sm:$0xff]  ;;  %s5051_s22 = smul.u32 864, %s5496_s26  ;;  %s4438_s8 = scalar_lea.sflag [#allocation4], %s5496_s26 }
  0x54   : > { %v5520_v2 = vld [vmem:[%s5500_s20 + $0x10] sm:$0xff]  ;;  %v675_v3 = vunpack.c.0.s8 %v5514_v0  ;;  %v676_v4 = vunpack.c.0.s8 %v5517_v1  ;;  %v5525_v5 = vld [vmem:[%s5500_s20 + $0x18] sm:$0xff]  ;;  %v5529_v7 = vld [vmem:[%s5500_s20 + $0x20] sm:$0xff]  ;;  %s5052_s19 = smul.u32 13824, %s5379_s16  ;;  %p6846_p11 = scmp.ne.s32.totalorder %s6781_s23, 0 }
  0x55   : > { %v677_v6 = vunpack.c.0.s8 %v5520_v2  ;;  %v5532_v8 = vld [vmem:[%s5500_s20 + $0x28] sm:$0xff]  ;;  %v678_v10 = vunpack.c.0.s8 %v5525_v5  ;;  %v679_v11 = vunpack.c.0.s8 %v5529_v7  ;;  %v5540_v13 = vld [vmem:[%s5500_s20 + $0x30] sm:$0xff]  ;;  %v5543_v14 = vld [vmem:[%s5500_s20 + $0x38] sm:$0xff]  ;;  %s5574_s10 = scalar_lea.vmem [#allocation7], %s5051_s22  ;;  %s6200_s17 = scalar_lea.vmem [#allocation8], %s5051_s22 }
  0x56   : > { %v680_v12 = vunpack.c.0.s8 %v5532_v8  ;;  %v891_v16 = vand.u32 255, %v675_v3  ;;  %v892_v17 = vand.u32 255, %v676_v4  ;;  %v681_v19 = vunpack.c.0.s8 %v5540_v13  ;;  %v5549_v32 = vld [vmem:[%s5500_s20 + $0x40] sm:$0xff]  ;;  %v5552_v33 = vld [vmem:[%s5500_s20 + $0x48] sm:$0xff]  ;;  %v5555_v38 = vld [vmem:[%s5500_s20 + $0x50] sm:$0xff]  ;;  %s4457_s30 = sshll.u32 %s5574_s10, 4  ;;  %s6481_s5 = scalar_lea.hbm %s6747_s2, %s5052_s19  ;;  %s6484_s30 = int_to_ptr.vmem [resolvable:$true] %s4457_s30 }
  0x57   : > { %v893_v18 = vand.u32 255, %v677_v6  ;;  %v894_v20 = vand.u32 255, %v678_v10  ;;  %v895_v21 = vand.u32 255, %v679_v11  ;;  %v682_v23 = vunpack.c.0.s8 %v5543_v14  ;;  %v5558_v43 = vld [vmem:[%s5500_s20 + $0x58] sm:$0xff]  ;;  %v5562_v48 = vld [vmem:[%s5500_s20 + $0x60] sm:$0xff]  ;;  %v5566_v57 = vld [vmem:[%s5500_s20 + $0x68] sm:$0xff] }
  0x58   : > { %v896_v22 = vand.u32 255, %v680_v12  ;;  %v1107_v24 = vcvt.s32.f32 %v891_v16  ;;  %v1108_v25 = vcvt.s32.f32 %v892_v17  ;;  %v897_v27 = vand.u32 255, %v681_v19  ;;  %v5570_v62 = vld [vmem:[%s5500_s20 + $0x70] sm:$0xff]  ;;  %v5583_v17 = vld [vmem:[%s5500_s20 + $0x78] sm:$0xff]  ;;  %s5228_s9 = scalar_lea.vmem %s6484_s30, 13824  ;;  %s5332_s11 = smov [#allocation7]  }
  0x59   : > { %v1109_v26 = vcvt.s32.f32 %v893_v18  ;;  %v1110_v28 = vcvt.s32.f32 %v894_v20  ;;  %v1111_v29 = vcvt.s32.f32 %v895_v21  ;;  %v898_v31 = vand.u32 255, %v682_v23  ;;  %p5229_p13 = scmp.ne.s32.totalorder %s6484_s30, %s5228_s9  ;;  %s5232_s6 = sshll.u32 %s5332_s11, 4  ;;  %s5233_s6 = int_to_ptr.vmem [resolvable:$false] %s5232_s6 }
  0x5a   : > { %v1112_v30 = vcvt.s32.f32 %v896_v22  ;;  %v1323_v34 = vmul.f32 0.017124753, %v1107_v24  ;;  %v1324_v35 = vmul.f32 0.017124753, %v1108_v25  ;;  %v1113_v37 = vcvt.s32.f32 %v897_v27  ;;  %s5234_s7 = scalar_lea.vmem %s5233_s6, 27648  ;;  %p5235_p8 = scmp.lt.s32.totalorder %s6484_s30, %s5233_s6 }
  0x5b   : > { %v1325_v36 = vmul.f32 0.017124753, %v1109_v26  ;;  %v1326_v39 = vmul.f32 0.017124753, %v1110_v28  ;;  %v1327_v40 = vmul.f32 0.017124753, %v1111_v29  ;;  %v1114_v42 = vcvt.s32.f32 %v898_v31  ;;  %p5230_p4 = pnand %p5229_p13, %p6846_p11  ;;  %p5236_p10 = scmp.lt.s32.totalorder %s5234_s7, %s5228_s9 }
  0x5c   : > { %v1328_v41 = vmul.f32 0.017124753, %v1112_v30  ;;  %v1539_v44 = vadd.f32 -2.117904, %v1323_v34  ;;  %v1540_v45 = vadd.f32 -2.117904, %v1324_v35  ;;  %v683_v47 = vunpack.c.0.s8 %v5549_v32 }
  0x5d   : > { %v1541_v46 = vadd.f32 -2.117904, %v1325_v36  ;;  %v1542_v49 = vadd.f32 -2.117904, %v1326_v39  ;;  %v1543_v50 = vadd.f32 -2.117904, %v1327_v40  ;;  %v684_v52 = vunpack.c.0.s8 %v5552_v33  ;;  %p5231_p7 = pneg %p5230_p4  ;;  %p5237_p0 = por %p5236_p10, %p5235_p8 }
  0x5e   : > { %v1544_v51 = vadd.f32 -2.117904, %v1328_v41  ;;  %v4830_v53 = vpack.c.bf16 %v1540_v45, %v1539_v44  ;;  %v1329_v54 = vmul.f32 0.017124753, %v1113_v37  ;;  %v1330_v55 = vmul.f32 0.017124753, %v1114_v42 }
  0x5f   : > { %v899_v56 = vand.u32 255, %v683_v47  ;;  %v4831_v58 = vpack.c.bf16 %v1542_v49, %v1541_v46  ;;  %v900_v60 = vand.u32 255, %v684_v52  ;;  %v685_v61 = vunpack.c.0.s8 %v5555_v38  ;;  %v5587_v26 = vld [vmem:[%s5500_s20 + $0x80] sm:$0xff]  ;;  %v5592_v37 = vld [vmem:[%s5500_s20 + $0x88] sm:$0xff]  ;;  %v5596_v44 = vld [vmem:[%s5500_s20 + $0x90] sm:$0xff]  ;;  %p5238_p2 = pnand %p5237_p0, %p5231_p7 }
  0x60   : > { %v4832_v59 = vpack.c.bf16 %v1544_v51, %v1543_v50  ;;  %2403 = vst [vmem:[%s5574_s10] sm:$0xff] %v4830_v53  ;;  %v1545_v63 = vadd.f32 -2.117904, %v1329_v54  ;;  %v1546_v3 = vadd.f32 -2.117904, %v1330_v55  ;;  %v686_v6 = vunpack.c.0.s8 %v5558_v43  ;;  %v5600_v54 = vld [vmem:[%s5500_s20 + $0x98] sm:$0xff]  ;;  %v5603_v55 = vld [vmem:[%s5500_s20 + $0xa0] sm:$0xff] }
  0x61   : > { %v1115_v4 = vcvt.s32.f32 %v899_v56  ;;  %2404 = vst [vmem:[%s5574_s10 + $0x8] sm:$0xff] %v4831_v58  ;;  %v1116_v10 = vcvt.s32.f32 %v900_v60  ;;  %v901_v11 = vand.u32 255, %v685_v61  ;;  %v687_v12 = vunpack.c.0.s8 %v5562_v48  ;;  %v5608_v61 = vld [vmem:[%s5500_s20 + $0xa8] sm:$0xff] }
  0x62   : > { %2405 = vst [vmem:[%s5574_s10 + $0x10] sm:$0xff] %v4832_v59  ;;  %v688_v16 = vunpack.c.0.s8 %v5566_v57  ;;  %v4833_v18 = vpack.c.bf16 %v1546_v3, %v1545_v63  ;;  %v902_v20 = vand.u32 255, %v686_v6  ;;  %v689_v21 = vunpack.c.0.s8 %v5570_v62 }
  0x63   : > { %v1331_v19 = vmul.f32 0.017124753, %v1115_v4  ;;  %v1332_v22 = vmul.f32 0.017124753, %v1116_v10  ;;  %v1117_v23 = vcvt.s32.f32 %v901_v11  ;;  %v903_v24 = vand.u32 255, %v687_v12  ;;  %v5611_v10 = vld [vmem:[%s5500_s20 + $0xb0] sm:$0xff] }
  0x64   : > { %v904_v25 = vand.u32 255, %v688_v16  ;;  %2406 = vst [vmem:[%s5574_s10 + $0x18] sm:$0xff] %v4833_v18  ;;  %v1118_v28 = vcvt.s32.f32 %v902_v20  ;;  %v690_v29 = vunpack.c.0.s8 %v5583_v17  ;;  %v905_v30 = vand.u32 255, %v689_v21 }
  0x65   : > { %v1547_v27 = vadd.f32 -2.117904, %v1331_v19  ;;  %v1548_v31 = vadd.f32 -2.117904, %v1332_v22  ;;  %v1333_v34 = vmul.f32 0.017124753, %v1117_v23  ;;  %v1119_v35 = vcvt.s32.f32 %v903_v24 }
  0x66   : > { %v1120_v36 = vcvt.s32.f32 %v904_v25  ;;  %v1334_v39 = vmul.f32 0.017124753, %v1118_v28  ;;  %v906_v40 = vand.u32 255, %v690_v29  ;;  %v1121_v41 = vcvt.s32.f32 %v905_v30  ;;  %v5618_v23 = vld [vmem:[%s5500_s20 + $0xb8] sm:$0xff] }
  0x67   : > { %v691_v42 = vunpack.c.0.s8 %v5587_v26  ;;  %v4834_v45 = vpack.c.bf16 %v1548_v31, %v1547_v27  ;;  %v1549_v46 = vadd.f32 -2.117904, %v1333_v34  ;;  %v1335_v47 = vmul.f32 0.017124753, %v1119_v35  ;;  %v5623_v35 = vld [vmem:[%s5500_s20 + $0xc0] sm:$0xff] }
  0x68   : > { %v1336_v49 = vmul.f32 0.017124753, %v1120_v36  ;;  %v1550_v50 = vadd.f32 -2.117904, %v1334_v39  ;;  %v1122_v51 = vcvt.s32.f32 %v906_v40  ;;  %v1337_v52 = vmul.f32 0.017124753, %v1121_v41 }
  0x69   : > { %v692_v53 = vunpack.c.0.s8 %v5592_v37  ;;  %2407 = vst [vmem:[%s5574_s10 + $0x20] sm:$0xff] %v4834_v45  ;;  %v1551_v56 = vadd.f32 -2.117904, %v1335_v47  ;;  %v907_v59 = vand.u32 255, %v691_v42  ;;  %v693_v60 = vunpack.c.0.s8 %v5596_v44 }
  0x6a   : > { %v1552_v58 = vadd.f32 -2.117904, %v1336_v49  ;;  %v4835_v63 = vpack.c.bf16 %v1550_v50, %v1549_v46  ;;  %v1338_v3 = vmul.f32 0.017124753, %v1122_v51  ;;  %v1553_v4 = vadd.f32 -2.117904, %v1337_v52 }
  0x6b   : > { %v908_v6 = vand.u32 255, %v692_v53  ;;  %v1123_v12 = vcvt.s32.f32 %v907_v59  ;;  %v694_v16 = vunpack.c.0.s8 %v5600_v54  ;;  %v909_v18 = vand.u32 255, %v693_v60  ;;  %v5628_v49 = vld [vmem:[%s5500_s20 + $0xc8] sm:$0xff] }
  0x6c   : > { %v4836_v11 = vpack.c.bf16 %v1552_v58, %v1551_v56  ;;  %2408 = vst [vmem:[%s5574_s10 + $0x28] sm:$0xff] %v4835_v63  ;;  %v1554_v19 = vadd.f32 -2.117904, %v1338_v3  ;;  %v695_v21 = vunpack.c.0.s8 %v5603_v55  ;;  %v696_v22 = vunpack.c.0.s8 %v5608_v61  ;;  %v5632_v56 = vld [vmem:[%s5500_s20 + $0xd0] sm:$0xff] }
  0x6d   : > { %v1124_v20 = vcvt.s32.f32 %v908_v6  ;;  %v1339_v24 = vmul.f32 0.017124753, %v1123_v12  ;;  %v910_v25 = vand.u32 255, %v694_v16  ;;  %v1125_v27 = vcvt.s32.f32 %v909_v18  ;;  %v5636_v12 = vld [vmem:[%s5500_s20 + $0xd8] sm:$0xff]  ;;  %v5639_v16 = vld [vmem:[%s5500_s20 + $0xe0] sm:$0xff] }
  0x6e   : > { %2409 = vst [vmem:[%s5574_s10 + $0x30] sm:$0xff] %v4836_v11  ;;  %v697_v28 = vunpack.c.0.s8 %v5611_v10  ;;  %v4837_v29 = vpack.c.bf16 %v1554_v19, %v1553_v4  ;;  %v911_v31 = vand.u32 255, %v695_v21  ;;  %v912_v34 = vand.u32 255, %v696_v22 }
  0x6f   : > { %v1340_v30 = vmul.f32 0.017124753, %v1124_v20  ;;  %v1555_v36 = vadd.f32 -2.117904, %v1339_v24  ;;  %v1126_v39 = vcvt.s32.f32 %v910_v25  ;;  %v1341_v40 = vmul.f32 0.017507004, %v1125_v27 }
  0x70   : > { %v698_v41 = vunpack.c.0.s8 %v5618_v23  ;;  %2410 = vst [vmem:[%s5574_s10 + $0x38] sm:$0xff] %v4837_v29  ;;  %v1127_v45 = vcvt.s32.f32 %v911_v31  ;;  %v1128_v46 = vcvt.s32.f32 %v912_v34  ;;  %v913_v47 = vand.u32 255, %v697_v28  ;;  %v5644_v28 = vld [vmem:[%s5500_s20 + $0xe8] sm:$0xff]  ;;  %v5647_v29 = vld [vmem:[%s5500_s20 + $0xf0] sm:$0xff] }
  0x71   : > { %v1556_v42 = vadd.f32 -2.117904, %v1340_v30  ;;  %v1342_v50 = vmul.f32 0.017507004, %v1126_v39  ;;  %v1557_v51 = vadd.f32 -2.0357144, %v1341_v40  ;;  %v699_v53 = vunpack.c.0.s8 %v5623_v35 }
  0x72   : > { %v914_v52 = vand.u32 255, %v698_v41  ;;  %v1343_v59 = vmul.f32 0.017507004, %v1127_v45  ;;  %v1344_v60 = vmul.f32 0.017507004, %v1128_v46  ;;  %v1129_v63 = vcvt.s32.f32 %v913_v47  ;;  %v5653_v45 = vld [vmem:[%s5500_s20 + $0xf8] sm:$0xff] }
  0x73   : > { %v4838_v58 = vpack.c.bf16 %v1556_v42, %v1555_v36  ;;  %v1558_v3 = vadd.f32 -2.0357144, %v1342_v50  ;;  %v700_v6 = vunpack.c.0.s8 %v5628_v49  ;;  %v915_v11 = vand.u32 255, %v699_v53 }
  0x74   : > { %v1130_v4 = vcvt.s32.f32 %v914_v52  ;;  %v1559_v18 = vadd.f32 -2.0357144, %v1343_v59  ;;  %v1560_v19 = vadd.f32 -2.0357144, %v1344_v60  ;;  %v1345_v20 = vmul.f32 0.017507004, %v1129_v63 }
  0x75   : > { %2411 = vst [vmem:[%s5574_s10 + $0x40] sm:$0xff] %v4838_v58  ;;  %v701_v21 = vunpack.c.0.s8 %v5632_v56  ;;  %v4839_v22 = vpack.c.bf16 %v1558_v3, %v1557_v51  ;;  %v916_v25 = vand.u32 255, %v700_v6  ;;  %v1131_v27 = vcvt.s32.f32 %v915_v11  ;;  %v5659_v52 = vld [vmem:[%s5500_s20 + $0x100] sm:$0xff]  ;;  %v5663_v11 = vld [vmem:[%s5500_s20 + $0x108] sm:$0xff] }
  0x76   : > { %v1346_v24 = vmul.f32 0.017507004, %v1130_v4  ;;  %v4840_v30 = vpack.c.bf16 %v1560_v19, %v1559_v18  ;;  %v1561_v31 = vadd.f32 -2.0357144, %v1345_v20  ;;  %v702_v34 = vunpack.c.0.s8 %v5636_v12 }
  0x77   : > { %v917_v36 = vand.u32 255, %v701_v21  ;;  %2412 = vst [vmem:[%s5574_s10 + $0x48] sm:$0xff] %v4839_v22  ;;  %v1132_v40 = vcvt.s32.f32 %v916_v25  ;;  %v1347_v41 = vmul.f32 0.017507004, %v1131_v27  ;;  %v703_v42 = vunpack.c.0.s8 %v5639_v16 }
  0x78   : > { %v1562_v39 = vadd.f32 -2.0357144, %v1346_v24  ;;  %2413 = vst [vmem:[%s5574_s10 + $0x50] sm:$0xff] %v4840_v30  ;;  %v918_v46 = vand.u32 255, %v702_v34  ;;  %v704_v50 = vunpack.c.0.s8 %v5644_v28  ;;  %v705_v51 = vunpack.c.0.s8 %v5647_v29  ;;  %v5668_v30 = vld [vmem:[%s5500_s20 + $0x110] sm:$0xff] }
  0x79   : > { %v1133_v47 = vcvt.s32.f32 %v917_v36  ;;  %v1348_v58 = vmul.f32 0.017507004, %v1132_v40  ;;  %v1563_v59 = vadd.f32 -2.0357144, %v1347_v41  ;;  %v919_v60 = vand.u32 255, %v703_v42 }
  0x7a   : > { %v4841_v53 = vpack.c.bf16 %v1562_v39, %v1561_v31  ;;  %v1134_v63 = vcvt.s32.f32 %v918_v46  ;;  %v920_v4 = vand.u32 255, %v704_v50  ;;  %v706_v6 = vunpack.c.0.s8 %v5653_v45 }
  0x7b   : > { %v1349_v3 = vmul.f32 0.017507004, %v1133_v47  ;;  %v1564_v18 = vadd.f32 -2.0357144, %v1348_v58  ;;  %v1135_v19 = vcvt.s32.f32 %v919_v60  ;;  %v921_v20 = vand.u32 255, %v705_v51  ;;  %v5672_v47 = vld [vmem:[%s5500_s20 + $0x118] sm:$0xff] }
  0x7c   : > { %2414 = vst [vmem:[%s5574_s10 + $0x58] sm:$0xff] %v4841_v53  ;;  %v707_v21 = vunpack.c.0.s8 %v5659_v52  ;;  %v1350_v22 = vmul.f32 0.017507004, %v1134_v63  ;;  %v1136_v25 = vcvt.s32.f32 %v920_v4  ;;  %v922_v27 = vand.u32 255, %v706_v6  ;;  %v5680_v6 = vld [vmem:[%s5500_s20 + $0x128] sm:$0xff] }
  0x7d   : > { %v1565_v24 = vadd.f32 -2.0357144, %v1349_v3  ;;  %v4842_v31 = vpack.c.bf16 %v1564_v18, %v1563_v59  ;;  %v1351_v34 = vmul.f32 0.017507004, %v1135_v19  ;;  %v1137_v36 = vcvt.s32.f32 %v921_v20  ;;  %v5677_v59 = vld [vmem:[%s5500_s20 + $0x120] sm:$0xff] }
  0x7e   : > { %v708_v39 = vunpack.c.0.s8 %v5663_v11  ;;  %v1566_v40 = vadd.f32 -2.0357144, %v1350_v22  ;;  %v1352_v41 = vmul.f32 0.017507004, %v1136_v25  ;;  %v1138_v42 = vcvt.s32.f32 %v922_v27  ;;  %v5684_v22 = vld [vmem:[%s5500_s20 + $0x130] sm:$0xff] }
  0x7f   : > { %v923_v46 = vand.u32 255, %v707_v21  ;;  %2415 = vst [vmem:[%s5574_s10 + $0x60] sm:$0xff] %v4842_v31  ;;  %v1567_v50 = vadd.f32 -2.0357144, %v1351_v34  ;;  %v1353_v51 = vmul.f32 0.017507004, %v1137_v36  ;;  %v709_v58 = vunpack.c.0.s8 %v5668_v30 }
  0x80   : > { %v924_v53 = vand.u32 255, %v708_v39  ;;  %v4843_v60 = vpack.c.bf16 %v1566_v40, %v1565_v24  ;;  %v1568_v63 = vadd.f32 -2.0357144, %v1352_v41  ;;  %v1354_v3 = vmul.f32 0.017507004, %v1138_v42  ;;  %6786 = vst [vmem:[#allocation14_spill] sm:$0xff] %v5684_v22 }
  0x81   : > { %v1139_v4 = vcvt.s32.f32 %v923_v46  ;;  %v1569_v18 = vadd.f32 -2.0357144, %v1353_v51  ;;  %v710_v20 = vunpack.c.0.s8 %v5672_v47  ;;  %v925_v21 = vand.u32 255, %v709_v58  ;;  %v5690_v41 = vld [vmem:[%s5500_s20 + $0x138] sm:$0xff]  ;;  %v5693_v42 = vld [vmem:[%s5500_s20 + $0x140] sm:$0xff] }
  0x82   : > { %v1140_v19 = vcvt.s32.f32 %v924_v53  ;;  %2416 = vst [vmem:[%s5574_s10 + $0x68] sm:$0xff] %v4843_v60  ;;  %v4844_v25 = vpack.c.bf16 %v1568_v63, %v1567_v50  ;;  %v1570_v27 = vadd.f32 -2.0357144, %v1354_v3  ;;  %v711_v24 = vunpack.c.0.s8 %v5677_v59  ;;  %6787 = vst [vmem:[#allocation15_spill] sm:$0xff] %v5690_v41 }
  0x83   : > { %v1355_v31 = vmul.f32 0.017507004, %v1139_v4  ;;  %v926_v36 = vand.u32 255, %v710_v20  ;;  %v1141_v39 = vcvt.s32.f32 %v925_v21  ;;  %v712_v40 = vunpack.c.0.s8 %v5680_v6  ;;  %6788 = vst [vmem:[#allocation16_spill] sm:$0xff] %v5693_v42  ;;  %v5698_v4 = vld [vmem:[%s5500_s20 + $0x148] sm:$0xff] }
  0x84   : > { %v1356_v34 = vmul.f32 0.017507004, %v1140_v19  ;;  %2417 = vst [vmem:[%s5574_s10 + $0x70] sm:$0xff] %v4844_v25  ;;  %v4845_v46 = vpack.c.bf16 %v1570_v27, %v1569_v18  ;;  %v927_v50 = vand.u32 255, %v711_v24  ;;  %v713_v53 = vunpack.c.0.s8 %v5684_v22  ;;  %6789 = vst [vmem:[#allocation17_spill] sm:$0xff] %v5698_v4  ;;  %v5704_v18 = vld [vmem:[%s5500_s20 + $0x150] sm:$0xff] }
  0x85   : > { %v1571_v51 = vadd.f32 -2.0357144, %v1355_v31  ;;  %v1142_v60 = vcvt.s32.f32 %v926_v36  ;;  %v1357_v63 = vmul.f32 0.017507004, %v1141_v39  ;;  %v928_v3 = vand.u32 255, %v712_v40  ;;  %6790 = vst [vmem:[#allocation18_spill] sm:$0xff] %v5704_v18 }
  0x86   : > { %v1572_v58 = vadd.f32 -2.0357144, %v1356_v34  ;;  %2418 = vst [vmem:[%s5574_s10 + $0x78] sm:$0xff] %v4845_v46  ;;  %v1143_v19 = vcvt.s32.f32 %v927_v50  ;;  %v714_v20 = vunpack.c.0.s8 %v5690_v41  ;;  %v929_v21 = vand.u32 255, %v713_v53  ;;  %v5708_v46 = vld [vmem:[%s5500_s20 + $0x158] sm:$0xff]  ;;  %v5720_v41 = vld [vmem:[%s5500_s20 + $0x170] sm:$0xff] }
  0x87   : > { %v715_v25 = vunpack.c.0.s8 %v5693_v42  ;;  %v1358_v31 = vmul.f32 0.017507004, %v1142_v60  ;;  %v1573_v24 = vadd.f32 -2.0357144, %v1357_v63  ;;  %v1144_v34 = vcvt.s32.f32 %v928_v3  ;;  %6791 = vst [vmem:[#allocation19_spill] sm:$0xff] %v5708_v46  ;;  %v5713_v3 = vld [vmem:[%s5500_s20 + $0x160] sm:$0xff] }
  0x88   : > { %v4846_v27 = vpack.c.bf16 %v1572_v58, %v1571_v51  ;;  %v1359_v36 = vmul.f32 0.017429193, %v1143_v19  ;;  %v930_v39 = vand.u32 255, %v714_v20  ;;  %v1145_v40 = vcvt.s32.f32 %v929_v21  ;;  %6792 = vst [vmem:[#allocation20_spill] sm:$0xff] %v5713_v3  ;;  %6794 = vst [vmem:[#allocation22_spill] sm:$0xff] %v5720_v41 }
  0x89   : > { %v716_v15 = vunpack.c.0.s8 %v5698_v4  ;;  %v1574_v50 = vadd.f32 -2.0357144, %v1358_v31  ;;  %v1360_v53 = vmul.f32 0.017429193, %v1144_v34  ;;  %v931_v9 = vand.u32 255, %v715_v25 }
  0x8a   : > { %2419 = vst [vmem:[%s5574_s10 + $0x80] sm:$0xff] %v4846_v27  ;;  %v717_v42 = vunpack.c.0.s8 %v5704_v18  ;;  %v1575_v51 = vadd.f32 -1.8044444, %v1359_v36  ;;  %v1146_v58 = vcvt.s32.f32 %v930_v39  ;;  %v1361_v60 = vmul.f32 0.017429193, %v1145_v40  ;;  %v5717_v27 = vld [vmem:[%s5500_s20 + $0x168] sm:$0xff] }
  0x8b   : > { %v932_v63 = vand.u32 255, %v716_v15  ;;  %v4847_v19 = vpack.c.bf16 %v1574_v50, %v1573_v24  ;;  %v1576_v20 = vadd.f32 -1.8044444, %v1360_v53  ;;  %v1147_v21 = vcvt.s32.f32 %v931_v9  ;;  %6793 = vst [vmem:[#allocation21_spill] sm:$0xff] %v5717_v27 }
  0x8c   : > { %v718_v4 = vunpack.c.0.s8 %v5708_v46  ;;  %v1362_v25 = vmul.f32 0.017429193, %v1146_v58  ;;  %v1577_v31 = vadd.f32 -1.8044444, %v1361_v60  ;;  %v933_v18 = vand.u32 255, %v717_v42  ;;  %v5726_v46 = vld [vmem:[%s5500_s20 + $0x178] sm:$0xff] }
  0x8d   : > { %v1148_v34 = vcvt.s32.f32 %v932_v63  ;;  %2420 = vst [vmem:[%s5574_s10 + $0x88] sm:$0xff] %v4847_v19  ;;  %v4848_v15 = vpack.c.bf16 %v1576_v20, %v1575_v51  ;;  %v1363_v36 = vmul.f32 0.017429193, %v1147_v21  ;;  %v719_v24 = vunpack.c.0.s8 %v5713_v3  ;;  %6795 = vst [vmem:[#allocation23_spill] sm:$0xff] %v5726_v46  ;;  %v5731_v63 = vld [vmem:[%s5500_s20 + $0x180] sm:$0xff]  ;;  %v5753_v3 = vld [vmem:[%s5500_s20 + $0x1a8] sm:$0xff] }
  0x8e   : > { %v934_v39 = vand.u32 255, %v718_v4  ;;  %v1578_v9 = vadd.f32 -1.8044444, %v1362_v25  ;;  %v1149_v50 = vcvt.s32.f32 %v933_v18  ;;  %v720_v53 = vunpack.c.0.s8 %v5717_v27  ;;  %6796 = vst [vmem:[#allocation24_spill] sm:$0xff] %v5731_v63 }
  0x8f   : > { %v1364_v40 = vmul.f32 0.017429193, %v1148_v34  ;;  %2421 = vst [vmem:[%s5574_s10 + $0x90] sm:$0xff] %v4848_v15  ;;  %v1579_v42 = vadd.f32 -1.8044444, %v1363_v36  ;;  %v935_v60 = vand.u32 255, %v719_v24  ;;  %v721_v51 = vunpack.c.0.s8 %v5720_v41 }
  0x90   : > { %v1150_v58 = vcvt.s32.f32 %v934_v39  ;;  %v4849_v4 = vpack.c.bf16 %v1578_v9, %v1577_v31  ;;  %v1365_v20 = vmul.f32 0.017429193, %v1149_v50  ;;  %v936_v21 = vand.u32 255, %v720_v53  ;;  %v5735_v15 = vld [vmem:[%s5500_s20 + $0x188] sm:$0xff]  ;;  %v5738_v36 = vld [vmem:[%s5500_s20 + $0x190] sm:$0xff] }
  0x91   : > { %v1580_v19 = vadd.f32 -1.8044444, %v1364_v40  ;;  %v1151_v25 = vcvt.s32.f32 %v935_v60  ;;  %v722_v34 = vunpack.c.0.s8 %v5726_v46  ;;  %v937_v27 = vand.u32 255, %v721_v51  ;;  %6797 = vst [vmem:[#allocation25_spill] sm:$0xff] %v5735_v15  ;;  %6798 = vst [vmem:[#allocation26_spill] sm:$0xff] %v5738_v36 }
  0x92   : > { %v1366_v18 = vmul.f32 0.017429193, %v1150_v58  ;;  %2422 = vst [vmem:[%s5574_s10 + $0x98] sm:$0xff] %v4849_v4  ;;  %v1581_v24 = vadd.f32 -1.8044444, %v1365_v20  ;;  %v1152_v41 = vcvt.s32.f32 %v936_v21  ;;  %v723_v31 = vunpack.c.0.s8 %v5731_v63  ;;  %v5743_v58 = vld [vmem:[%s5500_s20 + $0x198] sm:$0xff] }
  0x93   : > { %v4850_v39 = vpack.c.bf16 %v1580_v19, %v1579_v42  ;;  %v1367_v40 = vmul.f32 0.017429193, %v1151_v25  ;;  %v938_v50 = vand.u32 255, %v722_v34  ;;  %v1153_v53 = vcvt.s32.f32 %v937_v27  ;;  %6799 = vst [vmem:[#allocation27_spill] sm:$0xff] %v5743_v58  ;;  %v5749_v42 = vld [vmem:[%s5500_s20 + $0x1a0] sm:$0xff] }
  0x94   : > { %v1582_v9 = vadd.f32 -1.8044444, %v1366_v18  ;;  %v1368_v60 = vmul.f32 0.017429193, %v1152_v41  ;;  %v724_v51 = vunpack.c.0.s8 %v5735_v15  ;;  %v939_v46 = vand.u32 255, %v723_v31  ;;  %6800 = vst [vmem:[#allocation28_spill] sm:$0xff] %v5749_v42 }
  0x95   : > { %2423 = vst [vmem:[%s5574_s10 + $0xa0] sm:$0xff] %v4850_v39  ;;  %v725_v4 = vunpack.c.0.s8 %v5738_v36  ;;  %v1583_v20 = vadd.f32 -1.8044444, %v1367_v40  ;;  %v1154_v21 = vcvt.s32.f32 %v938_v50  ;;  %v1369_v18 = vmul.f32 0.017429193, %v1153_v53 }
  0x96   : > { %v4851_v19 = vpack.c.bf16 %v1582_v9, %v1581_v24  ;;  %v1584_v25 = vadd.f32 -1.8044444, %v1368_v60  ;;  %v940_v34 = vand.u32 255, %v724_v51  ;;  %v1155_v27 = vcvt.s32.f32 %v939_v46 }
  0x97   : > { %v726_v63 = vunpack.c.0.s8 %v5743_v58  ;;  %v1370_v41 = vmul.f32 0.017429193, %v1154_v21  ;;  %v1585_v39 = vadd.f32 -1.8044444, %v1369_v18  ;;  %v941_v31 = vand.u32 255, %v725_v4 }
  0x98   : > { %2424 = vst [vmem:[%s5574_s10 + $0xa8] sm:$0xff] %v4851_v19  ;;  %v727_v36 = vunpack.c.0.s8 %v5749_v42  ;;  %v4852_v15 = vpack.c.bf16 %v1584_v25, %v1583_v20  ;;  %v1156_v22 = vcvt.s32.f32 %v940_v34  ;;  %v1371_v24 = vmul.f32 0.017429193, %v1155_v27 }
  0x99   : > { %v942_v9 = vand.u32 255, %v726_v63  ;;  %v1586_v40 = vadd.f32 -1.8044444, %v1370_v41  ;;  %v1157_v50 = vcvt.s32.f32 %v941_v31  ;;  %v728_v46 = vunpack.c.0.s8 %v5753_v3 }
  0x9a   : > { %v943_v53 = vand.u32 255, %v727_v36  ;;  %2425 = vst [vmem:[%s5574_s10 + $0xb0] sm:$0xff] %v4852_v15  ;;  %v1372_v60 = vmul.f32 0.017429193, %v1156_v22  ;;  %v1587_v51 = vadd.f32 -1.8044444, %v1371_v24  ;;  %v6801_v19 = vunpack.c.1.s8 %v5514_v0 }
  0x9b   : > { %v1158_v58 = vcvt.s32.f32 %v942_v9  ;;  %v4853_v4 = vpack.c.bf16 %v1586_v40, %v1585_v39  ;;  %v1373_v18 = vmul.f32 0.017429193, %v1157_v50  ;;  %v944_v42 = vand.u32 255, %v728_v46 }
  0x9c   : > { %v945_v21 = vand.u32 255, %v6801_v19  ;;  %v1159_v20 = vcvt.s32.f32 %v943_v53  ;;  %v1588_v25 = vadd.f32 -1.8044444, %v1372_v60  ;;  %v6802_v63 = vunpack.c.1.s8 %v5517_v1 }
  0x9d   : > { %v1374_v34 = vmul.f32 0.017429193, %v1158_v58  ;;  %2426 = vst [vmem:[%s5574_s10 + $0xb8] sm:$0xff] %v4853_v4  ;;  %v1589_v36 = vadd.f32 -1.8044444, %v1373_v18  ;;  %v1160_v15 = vcvt.s32.f32 %v944_v42  ;;  %v731_v31 = vunpack.c.1.s8 %v5520_v2 }
  0x9e   : > { %v946_v27 = vand.u32 255, %v6802_v63  ;;  %v1161_v41 = vcvt.s32.f32 %v945_v21  ;;  %v1375_v22 = vmul.f32 0.017429193, %v1159_v20  ;;  %v4854_v24 = vpack.c.bf16 %v1588_v25, %v1587_v51 }
  0x9f   : > { %v1590_v0 = vadd.f32 -1.8044444, %v1374_v34  ;;  %v1376_v40 = vmul.f32 0.017429193, %v1160_v15  ;;  %v732_v58 = vunpack.c.1.s8 %v5525_v5  ;;  %v947_v46 = vand.u32 255, %v731_v31 }
  0xa0   : > { %v1162_v39 = vcvt.s32.f32 %v946_v27  ;;  %v1377_v9 = vmul.f32 0.017124753, %v1161_v41  ;;  %v1591_v50 = vadd.f32 -1.8044444, %v1375_v22  ;;  %2427 = vst [vmem:[%s5574_s10 + $0xc0] sm:$0xff] %v4854_v24  ;;  %v733_v19 = vunpack.c.1.s8 %v5529_v7 }
  0xa1   : > { %v4855_v1 = vpack.c.bf16 %v1590_v0, %v1589_v36  ;;  %v1592_v42 = vadd.f32 -1.8044444, %v1376_v40  ;;  %v948_v21 = vand.u32 255, %v732_v58  ;;  %v1163_v2 = vcvt.s32.f32 %v947_v46 }
  0xa2   : > { %v1378_v53 = vmul.f32 0.017124753, %v1162_v39  ;;  %v1593_v60 = vadd.f32 -2.117904, %v1377_v9  ;;  %v734_v51 = vunpack.c.1.s8 %v5532_v8  ;;  %v949_v18 = vand.u32 255, %v733_v19 }
  0xa3   : > { %2428 = vst [vmem:[%s5574_s10 + $0xc8] sm:$0xff] %v4855_v1  ;;  %v735_v20 = vunpack.c.1.s8 %v5540_v13  ;;  %v736_v5 = vunpack.c.1.s8 %v5543_v14  ;;  %v4856_v25 = vpack.c.bf16 %v1592_v42, %v1591_v50  ;;  %v1164_v34 = vcvt.s32.f32 %v948_v21 }
  0xa4   : > { %v1594_v4 = vadd.f32 -2.117904, %v1378_v53  ;;  %v1379_v63 = vmul.f32 0.017124753, %v1163_v2  ;;  %v950_v27 = vand.u32 255, %v734_v51  ;;  %v1165_v7 = vcvt.s32.f32 %v949_v18 }
  0xa5   : > { %v951_v36 = vand.u32 255, %v735_v20  ;;  %v952_v15 = vand.u32 255, %v736_v5  ;;  %2429 = vst [vmem:[%s5574_s10 + $0xd0] sm:$0xff] %v4856_v25  ;;  %v1380_v22 = vmul.f32 0.017124753, %v1164_v34  ;;  %v737_v24 = vunpack.c.1.s8 %v5549_v32 }
  0xa6   : > { %v4857_v41 = vpack.c.bf16 %v1594_v4, %v1593_v60  ;;  %v1595_v31 = vadd.f32 -2.117904, %v1379_v63  ;;  %v1166_v8 = vcvt.s32.f32 %v950_v27  ;;  %v1381_v0 = vmul.f32 0.017124753, %v1165_v7 }
  0xa7   : > { %v1167_v39 = vcvt.s32.f32 %v951_v36  ;;  %v1168_v13 = vcvt.s32.f32 %v952_v15  ;;  %v738_v14 = vunpack.c.1.s8 %v5552_v33  ;;  %v1596_v9 = vadd.f32 -2.117904, %v1380_v22 }
  0xa8   : > { %2430 = vst [vmem:[%s5574_s10 + $0xd8] sm:$0xff] %v4857_v41  ;;  %v1382_v40 = vmul.f32 0.017124753, %v1166_v8  ;;  %v953_v50 = vand.u32 255, %v737_v24  ;;  %v739_v58 = vunpack.c.1.s8 %v5555_v38  ;;  %v1597_v46 = vadd.f32 -2.117904, %v1381_v0 }
  0xa9   : > { %v1383_v1 = vmul.f32 0.017124753, %v1167_v39  ;;  %v1384_v53 = vmul.f32 0.017124753, %v1168_v13  ;;  %v740_v60 = vunpack.c.1.s8 %v5558_v43  ;;  %v4858_v19 = vpack.c.bf16 %v1596_v9, %v1595_v31 }
  0xaa   : > { %v1598_v42 = vadd.f32 -2.117904, %v1382_v40  ;;  %v954_v32 = vand.u32 255, %v738_v14  ;;  %v1169_v21 = vcvt.s32.f32 %v953_v50  ;;  %v955_v4 = vand.u32 255, %v739_v58 }
  0xab   : > { %v1599_v2 = vadd.f32 -2.117904, %v1383_v1  ;;  %v1600_v51 = vadd.f32 -2.117904, %v1384_v53  ;;  %v956_v33 = vand.u32 255, %v740_v60  ;;  %2431 = vst [vmem:[%s5574_s10 + $0xe0] sm:$0xff] %v4858_v19  ;;  %v741_v38 = vunpack.c.1.s8 %v5562_v48 }
  0xac   : > { %v4859_v18 = vpack.c.bf16 %v1598_v42, %v1597_v46  ;;  %v1170_v20 = vcvt.s32.f32 %v954_v32  ;;  %v1385_v5 = vmul.f32 0.017124753, %v1169_v21  ;;  %v1171_v34 = vcvt.s32.f32 %v955_v4 }
  0xad   : > { %v4860_v25 = vpack.c.bf16 %v1600_v51, %v1599_v2  ;;  %v1172_v63 = vcvt.s32.f32 %v956_v33  ;;  %v742_v43 = vunpack.c.1.s8 %v5566_v57  ;;  %v957_v7 = vand.u32 255, %v741_v38 }
  0xae   : > { %2432 = vst [vmem:[%s5574_s10 + $0xe8] sm:$0xff] %v4859_v18  ;;  %v1386_v27 = vmul.f32 0.017124753, %v1170_v20  ;;  %v1601_v41 = vadd.f32 -2.117904, %v1385_v5  ;;  %v743_v36 = vunpack.c.1.s8 %v5570_v62  ;;  %v744_v8 = vunpack.c.1.s8 %v5583_v17 }
  0xaf   : > { %2433 = vst [vmem:[%s5574_s10 + $0xf0] sm:$0xff] %v4860_v25  ;;  %v1387_v15 = vmul.f32 0.017124753, %v1171_v34  ;;  %v1388_v22 = vmul.f32 0.017124753, %v1172_v63  ;;  %v958_v31 = vand.u32 255, %v742_v43  ;;  %v1173_v48 = vcvt.s32.f32 %v957_v7 }
  0xb0   : > { %v1602_v24 = vadd.f32 -2.117904, %v1386_v27  ;;  %v959_v0 = vand.u32 255, %v743_v36  ;;  %v745_v39 = vunpack.c.1.s8 %v5587_v26  ;;  %v960_v9 = vand.u32 255, %v744_v8 }
  0xb1   : > { %v1603_v13 = vadd.f32 -2.117904, %v1387_v15  ;;  %v1604_v57 = vadd.f32 -2.117904, %v1388_v22  ;;  %v1174_v14 = vcvt.s32.f32 %v958_v31  ;;  %v1389_v50 = vmul.f32 0.017124753, %v1173_v48 }
  0xb2   : > { %v4861_v40 = vpack.c.bf16 %v1602_v24, %v1601_v41  ;;  %v1175_v62 = vcvt.s32.f32 %v959_v0  ;;  %v746_v58 = vunpack.c.1.s8 %v5592_v37  ;;  %v1176_v53 = vcvt.s32.f32 %v960_v9 }
  0xb3   : > { %v4862_v46 = vpack.c.bf16 %v1604_v57, %v1603_v13  ;;  %v1390_v1 = vmul.f32 0.017124753, %v1174_v14  ;;  %v961_v17 = vand.u32 255, %v745_v39  ;;  %v1605_v60 = vadd.f32 -2.117904, %v1389_v50 }
  0xb4   : > { %2434 = vst [vmem:[%s5574_s10 + $0xf8] sm:$0xff] %v4861_v40  ;;  %v1391_v19 = vmul.f32 0.017124753, %v1175_v62  ;;  %v962_v42 = vand.u32 255, %v746_v58  ;;  %v747_v26 = vunpack.c.1.s8 %v5596_v44  ;;  %v1392_v21 = vmul.f32 0.017124753, %v1176_v53 }
  0xb5   : > { %2435 = vst [vmem:[%s5574_s10 + $0x100] sm:$0xff] %v4862_v46  ;;  %v1606_v32 = vadd.f32 -2.117904, %v1390_v1  ;;  %v1177_v2 = vcvt.s32.f32 %v961_v17  ;;  %v748_v51 = vunpack.c.1.s8 %v5600_v54  ;;  %v749_v18 = vunpack.c.1.s8 %v5603_v55 }
  0xb6   : > { %v1607_v4 = vadd.f32 -2.117904, %v1391_v19  ;;  %v1178_v33 = vcvt.s32.f32 %v962_v42  ;;  %v963_v37 = vand.u32 255, %v747_v26  ;;  %v1608_v5 = vadd.f32 -2.117904, %v1392_v21 }
  0xb7   : > { %v4863_v20 = vpack.c.bf16 %v1606_v32, %v1605_v60  ;;  %v1393_v38 = vmul.f32 0.017124753, %v1177_v2  ;;  %v964_v25 = vand.u32 255, %v748_v51  ;;  %v750_v44 = vunpack.c.1.s8 %v5608_v61 }
  0xb8   : > { %v1394_v34 = vmul.f32 0.017124753, %v1178_v33  ;;  %v1179_v63 = vcvt.s32.f32 %v963_v37  ;;  %v965_v43 = vand.u32 255, %v749_v18  ;;  %v4864_v27 = vpack.c.bf16 %v1608_v5, %v1607_v4 }
  0xb9   : > { %2436 = vst [vmem:[%s5574_s10 + $0x108] sm:$0xff] %v4863_v20  ;;  %v1609_v41 = vadd.f32 -2.117904, %v1393_v38  ;;  %v1180_v7 = vcvt.s32.f32 %v964_v25  ;;  %v751_v54 = vunpack.c.1.s8 %v5611_v10  ;;  %v966_v55 = vand.u32 255, %v750_v44 }
  0xba   : > { %v1610_v36 = vadd.f32 -2.117904, %v1394_v34  ;;  %v1395_v15 = vmul.f32 0.017507004, %v1179_v63  ;;  %v1181_v22 = vcvt.s32.f32 %v965_v43  ;;  %2437 = vst [vmem:[%s5574_s10 + $0x110] sm:$0xff] %v4864_v27  ;;  %v752_v8 = vunpack.c.1.s8 %v5618_v23 }
  0xbb   : > { %v1396_v31 = vmul.f32 0.017507004, %v1180_v7  ;;  %v967_v24 = vand.u32 255, %v751_v54  ;;  %v753_v48 = vunpack.c.1.s8 %v5623_v35  ;;  %v1182_v39 = vcvt.s32.f32 %v966_v55 }
  0xbc   : > { %v4865_v61 = vpack.c.bf16 %v1610_v36, %v1609_v41  ;;  %v1611_v0 = vadd.f32 -2.0357144, %v1395_v15  ;;  %v1397_v13 = vmul.f32 0.017507004, %v1181_v22  ;;  %v968_v14 = vand.u32 255, %v752_v8 }
  0xbd   : > { %v1612_v57 = vadd.f32 -2.0357144, %v1396_v31  ;;  %v1183_v10 = vcvt.s32.f32 %v967_v24  ;;  %v754_v9 = vunpack.c.1.s8 %v5628_v49  ;;  %v1398_v40 = vmul.f32 0.017507004, %v1182_v39 }
  0xbe   : > { %2438 = vst [vmem:[%s5574_s10 + $0x118] sm:$0xff] %v4865_v61  ;;  %v1613_v50 = vadd.f32 -2.0357144, %v1397_v13  ;;  %v969_v62 = vand.u32 255, %v753_v48  ;;  %v755_v58 = vunpack.c.1.s8 %v5632_v56  ;;  %v1184_v46 = vcvt.s32.f32 %v968_v14 }
  0xbf   : > { %v4866_v23 = vpack.c.bf16 %v1612_v57, %v1611_v0  ;;  %v1399_v1 = vmul.f32 0.017507004, %v1183_v10  ;;  %v970_v35 = vand.u32 255, %v754_v9  ;;  %v1614_v53 = vadd.f32 -2.0357144, %v1398_v40 }
  0xc0   : > { %v1185_v17 = vcvt.s32.f32 %v969_v62  ;;  %v756_v60 = vunpack.c.1.s8 %v5636_v12  ;;  %v971_v19 = vand.u32 255, %v755_v58  ;;  %v1400_v42 = vmul.f32 0.017507004, %v1184_v46 }
  0xc1   : > { %2439 = vst [vmem:[%s5574_s10 + $0x120] sm:$0xff] %v4866_v23  ;;  %v1615_v26 = vadd.f32 -2.0357144, %v1399_v1  ;;  %v1186_v49 = vcvt.s32.f32 %v970_v35  ;;  %v757_v32 = vunpack.c.1.s8 %v5639_v16  ;;  %v4867_v21 = vpack.c.bf16 %v1614_v53, %v1613_v50 }
  0xc2   : > { %v1401_v2 = vmul.f32 0.017507004, %v1185_v17  ;;  %v972_v51 = vand.u32 255, %v756_v60  ;;  %v1187_v56 = vcvt.s32.f32 %v971_v19  ;;  %v1616_v4 = vadd.f32 -2.0357144, %v1400_v42  ;;  %v6803_v60 = vld [vmem:[#allocation14_spill] sm:$0xff] }
  0xc3   : > { %v1402_v33 = vmul.f32 0.017507004, %v1186_v49  ;;  %v758_v37 = vunpack.c.1.s8 %v5644_v28  ;;  %v973_v18 = vand.u32 255, %v757_v32  ;;  %2440 = vst [vmem:[%s5574_s10 + $0x128] sm:$0xff] %v4867_v21  ;;  %v759_v38 = vunpack.c.1.s8 %v5647_v29 }
  0xc4   : > { %v1617_v20 = vadd.f32 -2.0357144, %v1401_v2  ;;  %v1188_v12 = vcvt.s32.f32 %v972_v51  ;;  %v1403_v5 = vmul.f32 0.017507004, %v1187_v56  ;;  %v4868_v25 = vpack.c.bf16 %v1616_v4, %v1615_v26  ;;  %v6804_v2 = vld [vmem:[#allocation15_spill] sm:$0xff] }
  0xc5   : > { %v1618_v34 = vadd.f32 -2.0357144, %v1402_v33  ;;  %v974_v16 = vand.u32 255, %v758_v37  ;;  %v1189_v63 = vcvt.s32.f32 %v973_v18  ;;  %v760_v27 = vunpack.c.1.s8 %v5653_v45  ;;  %v6805_v37 = vld [vmem:[#allocation16_spill] sm:$0xff] }
  0xc6   : > { %v1404_v44 = vmul.f32 0.017507004, %v1188_v12  ;;  %v1619_v43 = vadd.f32 -2.0357144, %v1403_v5  ;;  %v975_v41 = vand.u32 255, %v759_v38  ;;  %2441 = vst [vmem:[%s5574_s10 + $0x130] sm:$0xff] %v4868_v25  ;;  %v761_v36 = vunpack.c.1.s8 %v5659_v52 }
  0xc7   : > { %v4869_v7 = vpack.c.bf16 %v1618_v34, %v1617_v20  ;;  %v1190_v28 = vcvt.s32.f32 %v974_v16  ;;  %v1405_v54 = vmul.f32 0.017507004, %v1189_v63  ;;  %v976_v55 = vand.u32 255, %v760_v27  ;;  %v6806_v38 = vld [vmem:[#allocation17_spill] sm:$0xff] }
  0xc8   : > { %v1620_v15 = vadd.f32 -2.0357144, %v1404_v44  ;;  %v1191_v29 = vcvt.s32.f32 %v975_v41  ;;  %v762_v22 = vunpack.c.1.s8 %v5663_v11  ;;  %v977_v24 = vand.u32 255, %v761_v36  ;;  %v6807_v44 = vld [vmem:[#allocation18_spill] sm:$0xff] }
  0xc9   : > { %2442 = vst [vmem:[%s5574_s10 + $0x138] sm:$0xff] %v4869_v7  ;;  %v1406_v31 = vmul.f32 0.017507004, %v1190_v28  ;;  %v1621_v8 = vadd.f32 -2.0357144, %v1405_v54  ;;  %v763_v48 = vunpack.c.1.s8 %v5668_v30  ;;  %v1192_v61 = vcvt.s32.f32 %v976_v55 }
  0xca   : > { %v4870_v45 = vpack.c.bf16 %v1620_v15, %v1619_v43  ;;  %v1407_v0 = vmul.f32 0.017507004, %v1191_v29  ;;  %v978_v39 = vand.u32 255, %v762_v22  ;;  %v1193_v57 = vcvt.s32.f32 %v977_v24  ;;  %v6808_v15 = vld [vmem:[#allocation19_spill] sm:$0xff]  ;;  %v6809_v24 = vld [vmem:[#allocation20_spill] sm:$0xff] }
  0xcb   : > { %v1622_v13 = vadd.f32 -2.0357144, %v1406_v31  ;;  %v764_v52 = vunpack.c.1.s8 %v5672_v47  ;;  %v979_v14 = vand.u32 255, %v763_v48  ;;  %v1408_v10 = vmul.f32 0.017507004, %v1192_v61 }
  0xcc   : > { %2443 = vst [vmem:[%s5574_s10 + $0x140] sm:$0xff] %v4870_v45  ;;  %v1623_v9 = vadd.f32 -2.0357144, %v1407_v0  ;;  %v1194_v11 = vcvt.s32.f32 %v978_v39  ;;  %v765_v40 = vunpack.c.1.s8 %v5677_v59  ;;  %v1409_v62 = vmul.f32 0.017507004, %v1193_v57 }
  0xcd   : > { %v4871_v50 = vpack.c.bf16 %v1622_v13, %v1621_v8  ;;  %v980_v58 = vand.u32 255, %v764_v52  ;;  %v1195_v30 = vcvt.s32.f32 %v979_v14  ;;  %v1624_v23 = vadd.f32 -2.0357144, %v1408_v10  ;;  %v6810_v52 = vld [vmem:[#allocation21_spill] sm:$0xff] }
  0xce   : > { %v1410_v46 = vmul.f32 0.017507004, %v1194_v11  ;;  %v766_v1 = vunpack.c.1.s8 %v5680_v6  ;;  %v981_v35 = vand.u32 255, %v765_v40  ;;  %v1625_v53 = vadd.f32 -2.0357144, %v1409_v62 }
  0xcf   : > { %2444 = vst [vmem:[%s5574_s10 + $0x148] sm:$0xff] %v4871_v50  ;;  %v1196_v47 = vcvt.s32.f32 %v980_v58  ;;  %v1411_v17 = vmul.f32 0.017507004, %v1195_v30  ;;  %v767_v19 = vunpack.c.1.s8 %v6803_v60  ;;  %v4872_v42 = vpack.c.bf16 %v1624_v23, %v1623_v9  ;;  %v6811_v50 = vld [vmem:[#allocation22_spill] sm:$0xff] }
  0xd0   : > { %v1626_v26 = vadd.f32 -2.0357144, %v1410_v46  ;;  %v982_v59 = vand.u32 255, %v766_v1  ;;  %v1197_v49 = vcvt.s32.f32 %v981_v35  ;;  %v768_v51 = vunpack.c.1.s8 %v6804_v2  ;;  %v6814_v2 = vld [vmem:[#allocation25_spill] sm:$0xff] }
  0xd1   : > { %v1412_v32 = vmul.f32 0.017507004, %v1196_v47  ;;  %v1627_v21 = vadd.f32 -2.0357144, %v1411_v17  ;;  %v983_v56 = vand.u32 255, %v767_v19  ;;  %2445 = vst [vmem:[%s5574_s10 + $0x150] sm:$0xff] %v4872_v42  ;;  %v769_v18 = vunpack.c.1.s8 %v6805_v37 }
  0xd2   : > { %v4873_v4 = vpack.c.bf16 %v1626_v26, %v1625_v53  ;;  %v1198_v6 = vcvt.s32.f32 %v982_v59  ;;  %v1413_v33 = vmul.f32 0.017429193, %v1197_v49  ;;  %v984_v12 = vand.u32 255, %v768_v51  ;;  %v6812_v53 = vld [vmem:[#allocation23_spill] sm:$0xff]  ;;  %v6813_v26 = vld [vmem:[#allocation24_spill] sm:$0xff] }
  0xd3   : > { %v1628_v20 = vadd.f32 -2.0357144, %v1412_v32  ;;  %v1199_v5 = vcvt.s32.f32 %v983_v56  ;;  %v770_v25 = vunpack.c.1.s8 %v6806_v38  ;;  %v985_v63 = vand.u32 255, %v769_v18 }
  0xd4   : > { %2446 = vst [vmem:[%s5574_s10 + $0x158] sm:$0xff] %v4873_v4  ;;  %v1414_v34 = vmul.f32 0.017429193, %v1198_v6  ;;  %v1629_v16 = vadd.f32 -1.8044444, %v1413_v33  ;;  %v771_v43 = vunpack.c.1.s8 %v6807_v44  ;;  %v1200_v41 = vcvt.s32.f32 %v984_v12  ;;  %v6815_v33 = vld [vmem:[#allocation26_spill] sm:$0xff] }
  0xd5   : > { %v4874_v27 = vpack.c.bf16 %v1628_v20, %v1627_v21  ;;  %v1415_v7 = vmul.f32 0.017429193, %v1199_v5  ;;  %v986_v28 = vand.u32 255, %v770_v25  ;;  %v1201_v36 = vcvt.s32.f32 %v985_v63 }
  0xd6   : > { %v1630_v54 = vadd.f32 -1.8044444, %v1414_v34  ;;  %v772_v55 = vunpack.c.1.s8 %v6808_v15  ;;  %v987_v29 = vand.u32 255, %v771_v43  ;;  %v1416_v22 = vmul.f32 0.017429193, %v1200_v41  ;;  %v6816_v34 = vld [vmem:[#allocation27_spill] sm:$0xff] }
  0xd7   : > { %2447 = vst [vmem:[%s5574_s10 + $0x160] sm:$0xff] %v4874_v27  ;;  %v1631_v31 = vadd.f32 -1.8044444, %v1415_v7  ;;  %v1202_v8 = vcvt.s32.f32 %v986_v28  ;;  %v773_v48 = vunpack.c.1.s8 %v6809_v24  ;;  %v1417_v61 = vmul.f32 0.017429193, %v1201_v36  ;;  %v6817_v41 = vld [vmem:[#allocation28_spill] sm:$0xff] }
  0xd8   : > { %v4875_v45 = vpack.c.bf16 %v1630_v54, %v1629_v16  ;;  %v988_v0 = vand.u32 255, %v772_v55  ;;  %v1203_v39 = vcvt.s32.f32 %v987_v29  ;;  %v1632_v13 = vadd.f32 -1.8044444, %v1416_v22 }
  0xd9   : > { %v1418_v57 = vmul.f32 0.017429193, %v1202_v8  ;;  %v774_v14 = vunpack.c.1.s8 %v6810_v52  ;;  %v989_v10 = vand.u32 255, %v773_v48  ;;  %v1633_v9 = vadd.f32 -1.8044444, %v1417_v61 }
  0xda   : > { %2448 = vst [vmem:[%s5574_s10 + $0x168] sm:$0xff] %v4875_v45  ;;  %v1204_v11 = vcvt.s32.f32 %v988_v0  ;;  %v1419_v40 = vmul.f32 0.017429193, %v1203_v39  ;;  %v775_v62 = vunpack.c.1.s8 %v6811_v50  ;;  %v4876_v58 = vpack.c.bf16 %v1632_v13, %v1631_v31  ;;  %v5843_v45 = vld [vmem:[%s5500_s20] sm:$0xff] }
  0xdb   : > { %v1634_v30 = vadd.f32 -1.8044444, %v1418_v57  ;;  %v990_v23 = vand.u32 255, %v774_v14  ;;  %v1205_v46 = vcvt.s32.f32 %v989_v10  ;;  %v776_v47 = vunpack.c.1.s8 %v6812_v53 }
  0xdc   : > { %v1420_v1 = vmul.f32 0.017429193, %v1204_v11  ;;  %v1635_v35 = vadd.f32 -1.8044444, %v1419_v40  ;;  %v991_v17 = vand.u32 255, %v775_v62  ;;  %2449 = vst [vmem:[%s5574_s10 + $0x170] sm:$0xff] %v4876_v58  ;;  %v777_v59 = vunpack.c.1.s8 %v6813_v26 }
  0xdd   : > { %v4877_v60 = vpack.c.bf16 %v1634_v30, %v1633_v9  ;;  %v1206_v19 = vcvt.s32.f32 %v990_v23  ;;  %v1421_v42 = vmul.f32 0.017429193, %v1205_v46  ;;  %v992_v32 = vand.u32 255, %v776_v47  ;;  %v5852_v62 = vld [vmem:[%s5500_s20 + $0x10] sm:$0xff] }
  0xde   : > { %v1636_v49 = vadd.f32 -1.8044444, %v1420_v1  ;;  %v1207_v21 = vcvt.s32.f32 %v991_v17  ;;  %v778_v51 = vunpack.c.1.s8 %v6814_v2  ;;  %v993_v6 = vand.u32 255, %v777_v59  ;;  %v5856_v1 = vld [vmem:[%s5500_s20 + $0x18] sm:$0xff]  ;;  %v5865_v2 = vld [vmem:[%s5500_s20 + $0x28] sm:$0xff] }
  0xdf   : > { %2450 = vst [vmem:[%s5574_s10 + $0x178] sm:$0xff] %v4877_v60  ;;  %v1422_v56 = vmul.f32 0.017429193, %v1206_v19  ;;  %v1637_v4 = vadd.f32 -1.8044444, %v1421_v42  ;;  %v779_v37 = vunpack.c.1.s8 %v6815_v33  ;;  %v1208_v20 = vcvt.s32.f32 %v992_v32  ;;  %v5861_v60 = vld [vmem:[%s5500_s20 + $0x20] sm:$0xff] }
  0xe0   : > { %v4878_v18 = vpack.c.bf16 %v1636_v49, %v1635_v35  ;;  %v1423_v12 = vmul.f32 0.017429193, %v1207_v21  ;;  %v994_v5 = vand.u32 255, %v778_v51  ;;  %v1209_v25 = vcvt.s32.f32 %v993_v6 }
  0xe1   : > { %v1638_v38 = vadd.f32 -1.8044444, %v1422_v56  ;;  %v780_v16 = vunpack.c.1.s8 %v6816_v34  ;;  %v995_v63 = vand.u32 255, %v779_v37  ;;  %v1424_v44 = vmul.f32 0.017429193, %v1208_v20  ;;  %v5870_v37 = vld [vmem:[%s5500_s20 + $0x30] sm:$0xff] }
  0xe2   : > { %2451 = vst [vmem:[%s5574_s10 + $0x180] sm:$0xff] %v4878_v18  ;;  %v1639_v43 = vadd.f32 -1.8044444, %v1423_v12  ;;  %v1210_v27 = vcvt.s32.f32 %v994_v5  ;;  %v781_v7 = vunpack.c.1.s8 %v6817_v41  ;;  %v1425_v54 = vmul.f32 0.017429193, %v1209_v25 }
  0xe3   : > { %v4879_v28 = vpack.c.bf16 %v1638_v38, %v1637_v4  ;;  %v996_v36 = vand.u32 255, %v780_v16  ;;  %v1211_v15 = vcvt.s32.f32 %v995_v63  ;;  %v1640_v55 = vadd.f32 -1.8044444, %v1424_v44  ;;  %v5874_v16 = vld [vmem:[%s5500_s20 + $0x38] sm:$0xff] }
  0xe4   : > { %v1426_v29 = vmul.f32 0.017429193, %v1210_v27  ;;  %v782_v22 = vunpack.c.1.s8 %v5753_v3  ;;  %v997_v31 = vand.u32 255, %v781_v7  ;;  %v1641_v8 = vadd.f32 -1.8044444, %v1425_v54  ;;  %v5847_v3 = vld [vmem:[%s5500_s20 + $0x8] sm:$0xff] }
  0xe5   : > { %2452 = vst [vmem:[%s5574_s10 + $0x188] sm:$0xff] %v4879_v28  ;;  %v1212_v24 = vcvt.s32.f32 %v996_v36  ;;  %v1427_v48 = vmul.f32 0.017429193, %v1211_v15  ;;  %v783_v61 = vunpack.c.2.s8 %v5843_v45  ;;  %v4880_v0 = vpack.c.bf16 %v1640_v55, %v1639_v43  ;;  %v5879_v7 = vld [vmem:[%s5500_s20 + $0x40] sm:$0xff] }
  0xe6   : > { %v1642_v39 = vadd.f32 -1.8044444, %v1426_v29  ;;  %v998_v13 = vand.u32 255, %v782_v22  ;;  %v1213_v57 = vcvt.s32.f32 %v997_v31  ;;  %v784_v10 = vunpack.c.2.s8 %v5847_v3  ;;  %v5883_v31 = vld [vmem:[%s5500_s20 + $0x48] sm:$0xff] }
  0xe7   : > { %v1428_v52 = vmul.f32 0.017429193, %v1212_v24  ;;  %v1643_v14 = vadd.f32 -1.8044444, %v1427_v48  ;;  %v999_v9 = vand.u32 255, %v783_v61  ;;  %2453 = vst [vmem:[%s5574_s10 + $0x190] sm:$0xff] %v4880_v0  ;;  %v785_v58 = vunpack.c.2.s8 %v5852_v62 }
  0xe8   : > { %v4881_v11 = vpack.c.bf16 %v1642_v39, %v1641_v8  ;;  %v1214_v40 = vcvt.s32.f32 %v998_v13  ;;  %v1429_v50 = vmul.f32 0.017429193, %v1213_v57  ;;  %v1000_v23 = vand.u32 255, %v784_v10  ;;  %v5888_v39 = vld [vmem:[%s5500_s20 + $0x50] sm:$0xff]  ;;  %v5892_v10 = vld [vmem:[%s5500_s20 + $0x58] sm:$0xff] }
  0xe9   : > { %v1644_v30 = vadd.f32 -1.8044444, %v1428_v52  ;;  %v1215_v46 = vcvt.s32.f32 %v999_v9  ;;  %v786_v35 = vunpack.c.2.s8 %v5856_v1  ;;  %v1001_v17 = vand.u32 255, %v785_v58  ;;  %v5897_v58 = vld [vmem:[%s5500_s20 + $0x60] sm:$0xff] }
  0xea   : > { %2454 = vst [vmem:[%s5574_s10 + $0x198] sm:$0xff] %v4881_v11  ;;  %v1430_v53 = vmul.f32 0.017429193, %v1214_v40  ;;  %v1645_v47 = vadd.f32 -1.8044444, %v1429_v50  ;;  %v787_v19 = vunpack.c.2.s8 %v5861_v60  ;;  %v1216_v26 = vcvt.s32.f32 %v1000_v23 }
  0xeb   : > { %v4882_v42 = vpack.c.bf16 %v1644_v30, %v1643_v14  ;;  %v1431_v59 = vmul.f32 0.017124753, %v1215_v46  ;;  %v1002_v49 = vand.u32 255, %v786_v35  ;;  %v1217_v21 = vcvt.s32.f32 %v1001_v17 }
  0xec   : > { %v1646_v32 = vadd.f32 -1.8044444, %v1430_v53  ;;  %v788_v51 = vunpack.c.2.s8 %v5865_v2  ;;  %v1003_v56 = vand.u32 255, %v787_v19  ;;  %v1432_v4 = vmul.f32 0.017124753, %v1216_v26  ;;  %v5901_v19 = vld [vmem:[%s5500_s20 + $0x68] sm:$0xff] }
  0xed   : > { %2455 = vst [vmem:[%s5574_s10 + $0x1a0] sm:$0xff] %v4882_v42  ;;  %v1647_v6 = vadd.f32 -2.117904, %v1431_v59  ;;  %v1218_v33 = vcvt.s32.f32 %v1002_v49  ;;  %v789_v18 = vunpack.c.2.s8 %v5870_v37  ;;  %v1433_v12 = vmul.f32 0.017124753, %v1217_v21  ;;  %v5906_v21 = vld [vmem:[%s5500_s20 + $0x70] sm:$0xff] }
  0xee   : > { %v4883_v20 = vpack.c.bf16 %v1646_v32, %v1645_v47  ;;  %v1004_v5 = vand.u32 255, %v788_v51  ;;  %v1219_v38 = vcvt.s32.f32 %v1003_v56  ;;  %v1648_v25 = vadd.f32 -2.117904, %v1432_v4 }
  0xef   : > { %v1434_v34 = vmul.f32 0.017124753, %v1218_v33  ;;  %v790_v63 = vunpack.c.2.s8 %v5874_v16  ;;  %v1005_v44 = vand.u32 255, %v789_v18  ;;  %v1649_v43 = vadd.f32 -2.117904, %v1433_v12  ;;  %v5910_v12 = vld [vmem:[%s5500_s20 + $0x78] sm:$0xff] }
  0xf0   : > { %2456 = vst [vmem:[%s5574_s10 + $0x1a8] sm:$0xff] %v4883_v20  ;;  %v1220_v27 = vcvt.s32.f32 %v1004_v5  ;;  %v1435_v41 = vmul.f32 0.017124753, %v1219_v38  ;;  %v791_v28 = vunpack.c.2.s8 %v5879_v7  ;;  %v4884_v54 = vpack.c.bf16 %v1648_v25, %v1647_v6 }
  0xf1   : > { %v1650_v36 = vadd.f32 -2.117904, %v1434_v34  ;;  %v1006_v15 = vand.u32 255, %v790_v63  ;;  %v1221_v55 = vcvt.s32.f32 %v1005_v44  ;;  %v792_v8 = vunpack.c.2.s8 %v5883_v31  ;;  %v5915_v44 = vld [vmem:[%s5500_s20 + $0x80] sm:$0xff] }
  0xf2   : > { %v1436_v29 = vmul.f32 0.017124753, %v1220_v27  ;;  %v1651_v22 = vadd.f32 -2.117904, %v1435_v41  ;;  %v1007_v24 = vand.u32 255, %v791_v28  ;;  %2457 = vst [vmem:[%s5574_s10 + $0x1b0] sm:$0xff] %v4884_v54  ;;  %v793_v13 = vunpack.c.2.s8 %v5888_v39 }
  0xf3   : > { %v4885_v48 = vpack.c.bf16 %v1650_v36, %v1649_v43  ;;  %v1222_v61 = vcvt.s32.f32 %v1006_v15  ;;  %v1437_v0 = vmul.f32 0.017124753, %v1221_v55  ;;  %v1008_v52 = vand.u32 255, %v792_v8  ;;  %v5919_v55 = vld [vmem:[%s5500_s20 + $0x88] sm:$0xff] }
  0xf4   : > { %v1652_v57 = vadd.f32 -2.117904, %v1436_v29  ;;  %v1223_v14 = vcvt.s32.f32 %v1007_v24  ;;  %v794_v9 = vunpack.c.2.s8 %v5892_v10  ;;  %v1009_v50 = vand.u32 255, %v793_v13 }
  0xf5   : > { %2458 = vst [vmem:[%s5574_s10 + $0x1b8] sm:$0xff] %v4885_v48  ;;  %v1438_v11 = vmul.f32 0.017124753, %v1222_v61  ;;  %v1653_v40 = vadd.f32 -2.117904, %v1437_v0  ;;  %v795_v30 = vunpack.c.2.s8 %v5897_v58  ;;  %v1224_v46 = vcvt.s32.f32 %v1008_v52  ;;  %v5924_v61 = vld [vmem:[%s5500_s20 + $0x90] sm:$0xff] }
  0xf6   : > { %v4886_v23 = vpack.c.bf16 %v1652_v57, %v1651_v22  ;;  %v1439_v35 = vmul.f32 0.017124753, %v1223_v14  ;;  %v1010_v53 = vand.u32 255, %v794_v9  ;;  %v1225_v17 = vcvt.s32.f32 %v1009_v50  ;;  %v5928_v14 = vld [vmem:[%s5500_s20 + $0x98] sm:$0xff] }
  0xf7   : > { %v1654_v47 = vadd.f32 -2.117904, %v1438_v11  ;;  %v796_v42 = vunpack.c.2.s8 %v5901_v19  ;;  %v1011_v26 = vand.u32 255, %v795_v30  ;;  %v1440_v59 = vmul.f32 0.017124753, %v1224_v46  ;;  %v5933_v30 = vld [vmem:[%s5500_s20 + $0xa0] sm:$0xff] }
  0xf8   : > { %2459 = vst [vmem:[%s5574_s10 + $0x1c0] sm:$0xff] %v4886_v23  ;;  %v1655_v49 = vadd.f32 -2.117904, %v1439_v35  ;;  %v1226_v32 = vcvt.s32.f32 %v1010_v53  ;;  %v797_v51 = vunpack.c.2.s8 %v5906_v21  ;;  %v1441_v4 = vmul.f32 0.017124753, %v1225_v17 }
  0xf9   : > { %v4887_v56 = vpack.c.bf16 %v1654_v47, %v1653_v40  ;;  %v1012_v6 = vand.u32 255, %v796_v42  ;;  %v1227_v33 = vcvt.s32.f32 %v1011_v26  ;;  %v1656_v18 = vadd.f32 -2.117904, %v1440_v59  ;;  %v5937_v26 = vld [vmem:[%s5500_s20 + $0xa8] sm:$0xff] }
  0xfa   : > { %v1442_v20 = vmul.f32 0.017124753, %v1226_v32  ;;  %v798_v5 = vunpack.c.2.s8 %v5910_v12  ;;  %v1013_v38 = vand.u32 255, %v797_v51  ;;  %v1657_v25 = vadd.f32 -2.117904, %v1441_v4  ;;  %v5942_v4 = vld [vmem:[%s5500_s20 + $0xb0] sm:$0xff] }
  0xfb   : > { %2460 = vst [vmem:[%s5574_s10 + $0x1c8] sm:$0xff] %v4887_v56  ;;  %v1228_v34 = vcvt.s32.f32 %v1012_v6  ;;  %v1443_v63 = vmul.f32 0.017124753, %v1227_v33  ;;  %v799_v43 = vunpack.c.2.s8 %v5915_v44  ;;  %v4888_v27 = vpack.c.bf16 %v1656_v18, %v1655_v49 }
  0xfc   : > { %v1658_v41 = vadd.f32 -2.117904, %v1442_v20  ;;  %v1014_v28 = vand.u32 255, %v798_v5  ;;  %v1229_v54 = vcvt.s32.f32 %v1013_v38  ;;  %v800_v29 = vunpack.c.2.s8 %v5919_v55 }
  0xfd   : > { %v1444_v36 = vmul.f32 0.017124753, %v1228_v34  ;;  %v1659_v15 = vadd.f32 -2.117904, %v1443_v63  ;;  %v1015_v22 = vand.u32 255, %v799_v43  ;;  %2461 = vst [vmem:[%s5574_s10 + $0x1d0] sm:$0xff] %v4888_v27  ;;  %v801_v0 = vunpack.c.2.s8 %v5924_v61 }
  0xfe   : > { %v4889_v8 = vpack.c.bf16 %v1658_v41, %v1657_v25  ;;  %v1230_v24 = vcvt.s32.f32 %v1014_v28  ;;  %v1445_v48 = vmul.f32 0.017124753, %v1229_v54  ;;  %v1016_v57 = vand.u32 255, %v800_v29  ;;  %v5946_v34 = vld [vmem:[%s5500_s20 + $0xb8] sm:$0xff]  ;;  %v5951_v54 = vld [vmem:[%s5500_s20 + $0xc0] sm:$0xff] }
  0xff   : > { %v1660_v13 = vadd.f32 -2.117904, %v1444_v36  ;;  %v1231_v52 = vcvt.s32.f32 %v1015_v22  ;;  %v802_v9 = vunpack.c.2.s8 %v5928_v14  ;;  %v1017_v50 = vand.u32 255, %v801_v0  ;;  %v5955_v0 = vld [vmem:[%s5500_s20 + $0xc8] sm:$0xff] }
 0x100   : > { %2462 = vst [vmem:[%s5574_s10 + $0x1d8] sm:$0xff] %v4889_v8  ;;  %v1446_v11 = vmul.f32 0.017124753, %v1230_v24  ;;  %v1661_v40 = vadd.f32 -2.117904, %v1445_v48  ;;  %v803_v23 = vunpack.c.2.s8 %v5933_v30  ;;  %v1232_v35 = vcvt.s32.f32 %v1016_v57 }
 0x101   : > { %v4890_v46 = vpack.c.bf16 %v1660_v13, %v1659_v15  ;;  %v1447_v53 = vmul.f32 0.017124753, %v1231_v52  ;;  %v1018_v47 = vand.u32 255, %v802_v9  ;;  %v1233_v42 = vcvt.s32.f32 %v1017_v50 }
 0x102   : > { %v1662_v17 = vadd.f32 -2.117904, %v1446_v11  ;;  %v804_v59 = vunpack.c.2.s8 %v5937_v26  ;;  %v1019_v49 = vand.u32 255, %v803_v23  ;;  %v1448_v32 = vmul.f32 0.017124753, %v1232_v35 }
 0x103   : > { %2463 = vst [vmem:[%s5574_s10 + $0x1e0] sm:$0xff] %v4890_v46  ;;  %v1663_v51 = vadd.f32 -2.117904, %v1447_v53  ;;  %v1234_v56 = vcvt.s32.f32 %v1018_v47  ;;  %v805_v6 = vunpack.c.2.s8 %v5942_v4  ;;  %v1449_v18 = vmul.f32 0.017507004, %v1233_v42  ;;  %v5964_v53 = vld [vmem:[%s5500_s20 + $0xd8] sm:$0xff] }
 0x104   : > { %v4891_v33 = vpack.c.bf16 %v1662_v17, %v1661_v40  ;;  %v1020_v20 = vand.u32 255, %v804_v59  ;;  %v1235_v5 = vcvt.s32.f32 %v1019_v49  ;;  %v1664_v38 = vadd.f32 -2.117904, %v1448_v32  ;;  %v5960_v40 = vld [vmem:[%s5500_s20 + $0xd0] sm:$0xff]  ;;  %v5969_v49 = vld [vmem:[%s5500_s20 + $0xe0] sm:$0xff] }
 0x105   : > { %v1450_v25 = vmul.f32 0.017507004, %v1234_v56  ;;  %v806_v63 = vunpack.c.2.s8 %v5946_v34  ;;  %v1021_v43 = vand.u32 255, %v805_v6  ;;  %v1665_v27 = vadd.f32 -2.0357144, %v1449_v18 }
 0x106   : > { %2464 = vst [vmem:[%s5574_s10 + $0x1e8] sm:$0xff] %v4891_v33  ;;  %v1236_v41 = vcvt.s32.f32 %v1020_v20  ;;  %v1451_v28 = vmul.f32 0.017507004, %v1235_v5  ;;  %v807_v36 = vunpack.c.2.s8 %v5951_v54  ;;  %v4892_v15 = vpack.c.bf16 %v1664_v38, %v1663_v51  ;;  %v5973_v5 = vld [vmem:[%s5500_s20 + $0xe8] sm:$0xff] }
 0x107   : > { %v1666_v29 = vadd.f32 -2.0357144, %v1450_v25  ;;  %v1022_v22 = vand.u32 255, %v806_v63  ;;  %v1237_v8 = vcvt.s32.f32 %v1021_v43  ;;  %v808_v13 = vunpack.c.2.s8 %v5955_v0 }
 0x108   : > { %v1452_v24 = vmul.f32 0.017507004, %v1236_v41  ;;  %v1667_v48 = vadd.f32 -2.0357144, %v1451_v28  ;;  %v1023_v57 = vand.u32 255, %v807_v36  ;;  %2465 = vst [vmem:[%s5574_s10 + $0x1f0] sm:$0xff] %v4892_v15  ;;  %v809_v50 = vunpack.c.2.s8 %v5960_v40 }
 0x109   : > { %v4893_v52 = vpack.c.bf16 %v1666_v29, %v1665_v27  ;;  %v1238_v9 = vcvt.s32.f32 %v1022_v22  ;;  %v1453_v11 = vmul.f32 0.017507004, %v1237_v8  ;;  %v1024_v46 = vand.u32 255, %v808_v13  ;;  %v5978_v41 = vld [vmem:[%s5500_s20 + $0xf0] sm:$0xff] }
 0x10a   : > { %v1668_v23 = vadd.f32 -2.0357144, %v1452_v24  ;;  %v1239_v35 = vcvt.s32.f32 %v1023_v57  ;;  %v810_v47 = vunpack.c.2.s8 %v5964_v53  ;;  %v1025_v59 = vand.u32 255, %v809_v50  ;;  %v5987_v50 = vld [vmem:[%s5500_s20 + $0x100] sm:$0xff] }
 0x10b   : > { %2466 = vst [vmem:[%s5574_s10 + $0x1f8] sm:$0xff] %v4893_v52  ;;  %v1454_v17 = vmul.f32 0.017507004, %v1238_v9  ;;  %v1669_v42 = vadd.f32 -2.0357144, %v1453_v11  ;;  %v811_v32 = vunpack.c.2.s8 %v5969_v49  ;;  %v1240_v56 = vcvt.s32.f32 %v1024_v46 }
 0x10c   : > { %v4894_v51 = vpack.c.bf16 %v1668_v23, %v1667_v48  ;;  %v1455_v6 = vmul.f32 0.017507004, %v1239_v35  ;;  %v1026_v33 = vand.u32 255, %v810_v47  ;;  %v1241_v20 = vcvt.s32.f32 %v1025_v59  ;;  %v5982_v48 = vld [vmem:[%s5500_s20 + $0xf8] sm:$0xff] }
 0x10d   : > { %v1670_v18 = vadd.f32 -2.0357144, %v1454_v17  ;;  %v812_v38 = vunpack.c.2.s8 %v5973_v5  ;;  %v1027_v25 = vand.u32 255, %v811_v32  ;;  %v1456_v63 = vmul.f32 0.017507004, %v1240_v56  ;;  %v5991_v32 = vld [vmem:[%s5500_s20 + $0x108] sm:$0xff] }
 0x10e   : > { %2467 = vst [vmem:[%s5574_s10 + $0x200] sm:$0xff] %v4894_v51  ;;  %v1671_v43 = vadd.f32 -2.0357144, %v1455_v6  ;;  %v1242_v27 = vcvt.s32.f32 %v1026_v33  ;;  %v813_v28 = vunpack.c.2.s8 %v5978_v41  ;;  %v1457_v15 = vmul.f32 0.017507004, %v1241_v20  ;;  %v5996_v20 = vld [vmem:[%s5500_s20 + $0x110] sm:$0xff] }
 0x10f   : > { %v4895_v36 = vpack.c.bf16 %v1670_v18, %v1669_v42  ;;  %v1028_v29 = vand.u32 255, %v812_v38  ;;  %v1243_v22 = vcvt.s32.f32 %v1027_v25  ;;  %v1672_v8 = vadd.f32 -2.0357144, %v1456_v63 }
 0x110   : > { %v1458_v24 = vmul.f32 0.017507004, %v1242_v27  ;;  %v814_v13 = vunpack.c.2.s8 %v5982_v48  ;;  %v1029_v57 = vand.u32 255, %v813_v28  ;;  %v1673_v52 = vadd.f32 -2.0357144, %v1457_v15  ;;  %v6000_v27 = vld [vmem:[%s5500_s20 + $0x118] sm:$0xff] }
 0x111   : > { %2468 = vst [vmem:[%s5574_s10 + $0x208] sm:$0xff] %v4895_v36  ;;  %v1244_v9 = vcvt.s32.f32 %v1028_v29  ;;  %v1459_v11 = vmul.f32 0.017507004, %v1243_v22  ;;  %v815_v23 = vunpack.c.2.s8 %v5987_v50  ;;  %v4896_v46 = vpack.c.bf16 %v1672_v8, %v1671_v43  ;;  %v6005_v22 = vld [vmem:[%s5500_s20 + $0x120] sm:$0xff] }
 0x112   : > { %v1674_v35 = vadd.f32 -2.0357144, %v1458_v24  ;;  %v1030_v47 = vand.u32 255, %v814_v13  ;;  %v1245_v17 = vcvt.s32.f32 %v1029_v57  ;;  %v816_v51 = vunpack.c.2.s8 %v5991_v32 }
 0x113   : > { %v1460_v42 = vmul.f32 0.017507004, %v1244_v9  ;;  %v1675_v59 = vadd.f32 -2.0357144, %v1459_v11  ;;  %v1031_v56 = vand.u32 255, %v815_v23  ;;  %2469 = vst [vmem:[%s5574_s10 + $0x210] sm:$0xff] %v4896_v46  ;;  %v817_v38 = vunpack.c.2.s8 %v5996_v20 }
 0x114   : > { %v4897_v6 = vpack.c.bf16 %v1674_v35, %v1673_v52  ;;  %v1246_v33 = vcvt.s32.f32 %v1030_v47  ;;  %v1461_v18 = vmul.f32 0.017507004, %v1245_v17  ;;  %v1032_v63 = vand.u32 255, %v816_v51  ;;  %v6009_v23 = vld [vmem:[%s5500_s20 + $0x128] sm:$0xff]  ;;  %v6014_v51 = vld [vmem:[%s5500_s20 + $0x130] sm:$0xff] }
 0x115   : > { %v1676_v25 = vadd.f32 -2.0357144, %v1460_v42  ;;  %v1247_v43 = vcvt.s32.f32 %v1031_v56  ;;  %v818_v28 = vunpack.c.2.s8 %v6000_v27  ;;  %v1033_v29 = vand.u32 255, %v817_v38 }
 0x116   : > { %2470 = vst [vmem:[%s5574_s10 + $0x218] sm:$0xff] %v4897_v6  ;;  %v1462_v36 = vmul.f32 0.017507004, %v1246_v33  ;;  %v1677_v15 = vadd.f32 -2.0357144, %v1461_v18  ;;  %v819_v8 = vunpack.c.2.s8 %v6005_v22  ;;  %v1248_v13 = vcvt.s32.f32 %v1032_v63  ;;  %v6018_v63 = vld [vmem:[%s5500_s20 + $0x138] sm:$0xff] }
 0x117   : > { %v4898_v24 = vpack.c.bf16 %v1676_v25, %v1675_v59  ;;  %v1463_v57 = vmul.f32 0.017507004, %v1247_v43  ;;  %v1034_v52 = vand.u32 255, %v818_v28  ;;  %v1249_v11 = vcvt.s32.f32 %v1033_v29 }
 0x118   : > { %v1678_v9 = vadd.f32 -2.0357144, %v1462_v36  ;;  %v820_v46 = vunpack.c.2.s8 %v6009_v23  ;;  %v1035_v35 = vand.u32 255, %v819_v8  ;;  %v1464_v47 = vmul.f32 0.017507004, %v1248_v13 }
 0x119   : > { %2471 = vst [vmem:[%s5574_s10 + $0x220] sm:$0xff] %v4898_v24  ;;  %v1679_v17 = vadd.f32 -2.0357144, %v1463_v57  ;;  %v1250_v42 = vcvt.s32.f32 %v1034_v52  ;;  %v821_v59 = vunpack.c.2.s8 %v6014_v51  ;;  %v1465_v6 = vmul.f32 0.017507004, %v1249_v11  ;;  %v6023_v24 = vld [vmem:[%s5500_s20 + $0x140] sm:$0xff] }
 0x11a   : > { %v4899_v56 = vpack.c.bf16 %v1678_v9, %v1677_v15  ;;  %v1036_v33 = vand.u32 255, %v820_v46  ;;  %v1251_v18 = vcvt.s32.f32 %v1035_v35  ;;  %v1680_v38 = vadd.f32 -2.0357144, %v1464_v47  ;;  %6818 = vst [vmem:[#allocation14_spill] sm:$0xff] %v6023_v24  ;;  %v6027_v35 = vld [vmem:[%s5500_s20 + $0x148] sm:$0xff] }
 0x11b   : > { %v1466_v25 = vmul.f32 0.017507004, %v1250_v42  ;;  %v822_v43 = vunpack.c.2.s8 %v6018_v63  ;;  %v1037_v28 = vand.u32 255, %v821_v59  ;;  %v1681_v36 = vadd.f32 -2.0357144, %v1465_v6  ;;  %6819 = vst [vmem:[#allocation15_spill] sm:$0xff] %v6027_v35 }
 0x11c   : > { %2472 = vst [vmem:[%s5574_s10 + $0x228] sm:$0xff] %v4899_v56  ;;  %v1252_v29 = vcvt.s32.f32 %v1036_v33  ;;  %v1467_v8 = vmul.f32 0.017429193, %v1251_v18  ;;  %v823_v15 = vunpack.c.2.s8 %v6023_v24  ;;  %v4900_v13 = vpack.c.bf16 %v1680_v38, %v1679_v17  ;;  %v6032_v33 = vld [vmem:[%s5500_s20 + $0x150] sm:$0xff] }
 0x11d   : > { %v1682_v57 = vadd.f32 -2.0357144, %v1466_v25  ;;  %v1038_v52 = vand.u32 255, %v822_v43  ;;  %v1253_v9 = vcvt.s32.f32 %v1037_v28  ;;  %v824_v47 = vunpack.c.2.s8 %v6027_v35  ;;  %6820 = vst [vmem:[#allocation16_spill] sm:$0xff] %v6032_v33  ;;  %v6036_v43 = vld [vmem:[%s5500_s20 + $0x158] sm:$0xff]  ;;  %v6050_v35 = vld [vmem:[%s5500_s20 + $0x170] sm:$0xff] }
 0x11e   : > { %v1468_v11 = vmul.f32 0.017429193, %v1252_v29  ;;  %v1683_v46 = vadd.f32 -1.8044444, %v1467_v8  ;;  %v1039_v42 = vand.u32 255, %v823_v15  ;;  %2473 = vst [vmem:[%s5574_s10 + $0x230] sm:$0xff] %v4900_v13  ;;  %v825_v17 = vunpack.c.2.s8 %v6032_v33 }
 0x11f   : > { %v4901_v59 = vpack.c.bf16 %v1682_v57, %v1681_v36  ;;  %v1254_v56 = vcvt.s32.f32 %v1038_v52  ;;  %v1469_v6 = vmul.f32 0.017429193, %v1253_v9  ;;  %v1040_v38 = vand.u32 255, %v824_v47  ;;  %6821 = vst [vmem:[#allocation17_spill] sm:$0xff] %v6036_v43  ;;  %v6041_v36 = vld [vmem:[%s5500_s20 + $0x160] sm:$0xff]  ;;  %v6045_v33 = vld [vmem:[%s5500_s20 + $0x168] sm:$0xff] }
 0x120   : > { %v1684_v18 = vadd.f32 -1.8044444, %v1468_v11  ;;  %v1255_v25 = vcvt.s32.f32 %v1039_v42  ;;  %v826_v28 = vunpack.c.2.s8 %v6036_v43  ;;  %v1041_v15 = vand.u32 255, %v825_v17  ;;  %6822 = vst [vmem:[#allocation18_spill] sm:$0xff] %v6041_v36  ;;  %6823 = vst [vmem:[#allocation19_spill] sm:$0xff] %v6045_v33 }
 0x121   : > { %2474 = vst [vmem:[%s5574_s10 + $0x238] sm:$0xff] %v4901_v59  ;;  %v1470_v29 = vmul.f32 0.017429193, %v1254_v56  ;;  %v1685_v8 = vadd.f32 -1.8044444, %v1469_v6  ;;  %v827_v13 = vunpack.c.2.s8 %v6041_v36  ;;  %v1256_v52 = vcvt.s32.f32 %v1040_v38  ;;  %6824 = vst [vmem:[#allocation20_spill] sm:$0xff] %v6050_v35 }
 0x122   : > { %v4902_v57 = vpack.c.bf16 %v1684_v18, %v1683_v46  ;;  %v1471_v9 = vmul.f32 0.017429193, %v1255_v25  ;;  %v1042_v11 = vand.u32 255, %v826_v28  ;;  %v1257_v42 = vcvt.s32.f32 %v1041_v15  ;;  %v6054_v36 = vld [vmem:[%s5500_s20 + $0x178] sm:$0xff] }
 0x123   : > { %v1686_v47 = vadd.f32 -1.8044444, %v1470_v29  ;;  %v828_v43 = vunpack.c.2.s8 %v6045_v33  ;;  %v1043_v59 = vand.u32 255, %v827_v13  ;;  %v1472_v56 = vmul.f32 0.017429193, %v1256_v52  ;;  %6825 = vst [vmem:[#allocation21_spill] sm:$0xff] %v6054_v36 }
 0x124   : > { %2475 = vst [vmem:[%s5574_s10 + $0x240] sm:$0xff] %v4902_v57  ;;  %v1687_v6 = vadd.f32 -1.8044444, %v1471_v9  ;;  %v1258_v17 = vcvt.s32.f32 %v1042_v11  ;;  %v829_v46 = vunpack.c.2.s8 %v6050_v35  ;;  %v1473_v38 = vmul.f32 0.017429193, %v1257_v42  ;;  %v6059_v33 = vld [vmem:[%s5500_s20 + $0x180] sm:$0xff] }
 0x125   : > { %v4903_v18 = vpack.c.bf16 %v1686_v47, %v1685_v8  ;;  %v1044_v25 = vand.u32 255, %v828_v43  ;;  %v1259_v28 = vcvt.s32.f32 %v1043_v59  ;;  %v1688_v29 = vadd.f32 -1.8044444, %v1472_v56  ;;  %6826 = vst [vmem:[#allocation22_spill] sm:$0xff] %v6059_v33  ;;  %v6068_v35 = vld [vmem:[%s5500_s20 + $0x190] sm:$0xff] }
 0x126   : > { %v1474_v15 = vmul.f32 0.017429193, %v1258_v17  ;;  %v830_v13 = vunpack.c.2.s8 %v6054_v36  ;;  %v1045_v57 = vand.u32 255, %v829_v46  ;;  %v1689_v52 = vadd.f32 -1.8044444, %v1473_v38  ;;  %v6063_v36 = vld [vmem:[%s5500_s20 + $0x188] sm:$0xff] }
 0x127   : > { %2476 = vst [vmem:[%s5574_s10 + $0x248] sm:$0xff] %v4903_v18  ;;  %v1260_v9 = vcvt.s32.f32 %v1044_v25  ;;  %v1475_v11 = vmul.f32 0.017429193, %v1259_v28  ;;  %v831_v8 = vunpack.c.2.s8 %v6059_v33  ;;  %v4904_v43 = vpack.c.bf16 %v1688_v29, %v1687_v6  ;;  %6827 = vst [vmem:[#allocation23_spill] sm:$0xff] %v6063_v36 }
 0x128   : > { %v1690_v47 = vadd.f32 -1.8044444, %v1474_v15  ;;  %v1046_v42 = vand.u32 255, %v830_v13  ;;  %v1261_v59 = vcvt.s32.f32 %v1045_v57  ;;  %v832_v46 = vunpack.c.2.s8 %v6063_v36  ;;  %6828 = vst [vmem:[#allocation24_spill] sm:$0xff] %v6068_v35  ;;  %v6072_v57 = vld [vmem:[%s5500_s20 + $0x198] sm:$0xff] }
 0x129   : > { %v1476_v56 = vmul.f32 0.017429193, %v1260_v9  ;;  %v1691_v17 = vadd.f32 -1.8044444, %v1475_v11  ;;  %v1047_v18 = vand.u32 255, %v831_v8  ;;  %2477 = vst [vmem:[%s5574_s10 + $0x250] sm:$0xff] %v4904_v43  ;;  %v833_v6 = vunpack.c.2.s8 %v6068_v35 }
 0x12a   : > { %v4905_v38 = vpack.c.bf16 %v1690_v47, %v1689_v52  ;;  %v1262_v25 = vcvt.s32.f32 %v1046_v42  ;;  %v1477_v28 = vmul.f32 0.017429193, %v1261_v59  ;;  %v1048_v15 = vand.u32 255, %v832_v46  ;;  %6829 = vst [vmem:[#allocation25_spill] sm:$0xff] %v6072_v57  ;;  %v6077_v52 = vld [vmem:[%s5500_s20 + $0x1a0] sm:$0xff] }
 0x12b   : > { %v1692_v29 = vadd.f32 -1.8044444, %v1476_v56  ;;  %v1263_v13 = vcvt.s32.f32 %v1047_v18  ;;  %v834_v9 = vunpack.c.2.s8 %v6072_v57  ;;  %v1049_v43 = vand.u32 255, %v833_v6  ;;  %6830 = vst [vmem:[#allocation26_spill] sm:$0xff] %v6077_v52  ;;  %v6081_v18 = vld [vmem:[%s5500_s20 + $0x1a8] sm:$0xff] }
 0x12c   : > { %2478 = vst [vmem:[%s5574_s10 + $0x258] sm:$0xff] %v4905_v38  ;;  %v1478_v11 = vmul.f32 0.017429193, %v1262_v25  ;;  %v1693_v8 = vadd.f32 -1.8044444, %v1477_v28  ;;  %v835_v47 = vunpack.c.2.s8 %v6077_v52  ;;  %v1264_v59 = vcvt.s32.f32 %v1048_v15  ;;  %6831 = vst [vmem:[#allocation27_spill] sm:$0xff] %v6081_v18 }
 0x12d   : > { %v4906_v42 = vpack.c.bf16 %v1692_v29, %v1691_v17  ;;  %v1479_v35 = vmul.f32 0.017429193, %v1263_v13  ;;  %v1050_v56 = vand.u32 255, %v834_v9  ;;  %v1265_v36 = vcvt.s32.f32 %v1049_v43 }
 0x12e   : > { %v1694_v46 = vadd.f32 -1.8044444, %v1478_v11  ;;  %v836_v57 = vunpack.c.2.s8 %v6081_v18  ;;  %v1051_v33 = vand.u32 255, %v835_v47  ;;  %v1480_v38 = vmul.f32 0.017429193, %v1264_v59 }
 0x12f   : > { %2479 = vst [vmem:[%s5574_s10 + $0x260] sm:$0xff] %v4906_v42  ;;  %v1695_v25 = vadd.f32 -1.8044444, %v1479_v35  ;;  %v1266_v28 = vcvt.s32.f32 %v1050_v56  ;;  %v837_v6 = vunpack.c.3.s8 %v5843_v45  ;;  %v1481_v52 = vmul.f32 0.017429193, %v1265_v36 }
 0x130   : > { %v4907_v24 = vpack.c.bf16 %v1694_v46, %v1693_v8  ;;  %v1052_v17 = vand.u32 255, %v836_v57  ;;  %v1267_v29 = vcvt.s32.f32 %v1051_v33  ;;  %v1696_v15 = vadd.f32 -1.8044444, %v1480_v38 }
 0x131   : > { %v1482_v13 = vmul.f32 0.017429193, %v1266_v28  ;;  %v838_v9 = vunpack.c.3.s8 %v5847_v3  ;;  %v1053_v11 = vand.u32 255, %v837_v6  ;;  %v1697_v43 = vadd.f32 -1.8044444, %v1481_v52 }
 0x132   : > { %2480 = vst [vmem:[%s5574_s10 + $0x268] sm:$0xff] %v4907_v24  ;;  %v1268_v18 = vcvt.s32.f32 %v1052_v17  ;;  %v1483_v47 = vmul.f32 0.017429193, %v1267_v29  ;;  %v839_v42 = vunpack.c.3.s8 %v5852_v62  ;;  %v4908_v35 = vpack.c.bf16 %v1696_v15, %v1695_v25 }
 0x133   : > { %v1698_v59 = vadd.f32 -1.8044444, %v1482_v13  ;;  %v1054_v45 = vand.u32 255, %v838_v9  ;;  %v1269_v8 = vcvt.s32.f32 %v1053_v11  ;;  %v840_v33 = vunpack.c.3.s8 %v5856_v1 }
 0x134   : > { %v1484_v36 = vmul.f32 0.017429193, %v1268_v18  ;;  %v1699_v57 = vadd.f32 -1.8044444, %v1483_v47  ;;  %v1055_v56 = vand.u32 255, %v839_v42  ;;  %2481 = vst [vmem:[%s5574_s10 + $0x270] sm:$0xff] %v4908_v35  ;;  %v841_v24 = vunpack.c.3.s8 %v5861_v60 }
 0x135   : > { %v4909_v46 = vpack.c.bf16 %v1698_v59, %v1697_v43  ;;  %v1270_v3 = vcvt.s32.f32 %v1054_v45  ;;  %v1485_v38 = vmul.f32 0.017124753, %v1269_v8  ;;  %v1056_v28 = vand.u32 255, %v840_v33 }
 0x136   : > { %v1700_v52 = vadd.f32 -1.8044444, %v1484_v36  ;;  %v1271_v62 = vcvt.s32.f32 %v1055_v56  ;;  %v842_v25 = vunpack.c.3.s8 %v5865_v2  ;;  %v1057_v18 = vand.u32 255, %v841_v24 }
 0x137   : > { %2482 = vst [vmem:[%s5574_s10 + $0x278] sm:$0xff] %v4909_v46  ;;  %v1486_v6 = vmul.f32 0.017124753, %v1270_v3  ;;  %v1701_v17 = vadd.f32 -2.117904, %v1485_v38  ;;  %v843_v29 = vunpack.c.3.s8 %v5870_v37  ;;  %v1272_v15 = vcvt.s32.f32 %v1056_v28 }
 0x138   : > { %v4910_v1 = vpack.c.bf16 %v1700_v52, %v1699_v57  ;;  %v1487_v13 = vmul.f32 0.017124753, %v1271_v62  ;;  %v1058_v9 = vand.u32 255, %v842_v25  ;;  %v1273_v43 = vcvt.s32.f32 %v1057_v18 }
 0x139   : > { %v1702_v11 = vadd.f32 -2.117904, %v1486_v6  ;;  %v844_v60 = vunpack.c.3.s8 %v5874_v16  ;;  %v1059_v47 = vand.u32 255, %v843_v29  ;;  %v1488_v42 = vmul.f32 0.017124753, %v1272_v15 }
 0x13a   : > { %2483 = vst [vmem:[%s5574_s10 + $0x280] sm:$0xff] %v4910_v1  ;;  %v1703_v35 = vadd.f32 -2.117904, %v1487_v13  ;;  %v1274_v2 = vcvt.s32.f32 %v1058_v9  ;;  %v845_v59 = vunpack.c.3.s8 %v5879_v7  ;;  %v1489_v8 = vmul.f32 0.017124753, %v1273_v43 }
 0x13b   : > { %v4911_v45 = vpack.c.bf16 %v1702_v11, %v1701_v17  ;;  %v1060_v36 = vand.u32 255, %v844_v60  ;;  %v1275_v37 = vcvt.s32.f32 %v1059_v47  ;;  %v1704_v57 = vadd.f32 -2.117904, %v1488_v42 }
 0x13c   : > { %v1490_v33 = vmul.f32 0.017124753, %v1274_v2  ;;  %v846_v56 = vunpack.c.3.s8 %v5883_v31  ;;  %v1061_v46 = vand.u32 255, %v845_v59  ;;  %v1705_v3 = vadd.f32 -2.117904, %v1489_v8 }
 0x13d   : > { %2484 = vst [vmem:[%s5574_s10 + $0x288] sm:$0xff] %v4911_v45  ;;  %v1276_v16 = vcvt.s32.f32 %v1060_v36  ;;  %v1491_v38 = vmul.f32 0.017124753, %v1275_v37  ;;  %v847_v24 = vunpack.c.3.s8 %v5888_v39  ;;  %v4912_v52 = vpack.c.bf16 %v1704_v57, %v1703_v35 }
 0x13e   : > { %v1706_v28 = vadd.f32 -2.117904, %v1490_v33  ;;  %v1062_v7 = vand.u32 255, %v846_v56  ;;  %v1277_v62 = vcvt.s32.f32 %v1061_v46  ;;  %v848_v17 = vunpack.c.3.s8 %v5892_v10 }
 0x13f   : > { %v1492_v25 = vmul.f32 0.017124753, %v1276_v16  ;;  %v1707_v6 = vadd.f32 -2.117904, %v1491_v38  ;;  %v1063_v18 = vand.u32 255, %v847_v24  ;;  %2485 = vst [vmem:[%s5574_s10 + $0x290] sm:$0xff] %v4912_v52  ;;  %v849_v15 = vunpack.c.3.s8 %v5897_v58 }
 0x140   : > { %v4913_v29 = vpack.c.bf16 %v1706_v28, %v1705_v3  ;;  %v1278_v31 = vcvt.s32.f32 %v1062_v7  ;;  %v1493_v1 = vmul.f32 0.017124753, %v1277_v62  ;;  %v1064_v9 = vand.u32 255, %v848_v17 }
 0x141   : > { %v1708_v13 = vadd.f32 -2.117904, %v1492_v25  ;;  %v1279_v39 = vcvt.s32.f32 %v1063_v18  ;;  %v850_v11 = vunpack.c.3.s8 %v5901_v19  ;;  %v1065_v47 = vand.u32 255, %v849_v15 }
 0x142   : > { %2486 = vst [vmem:[%s5574_s10 + $0x298] sm:$0xff] %v4913_v29  ;;  %v1494_v43 = vmul.f32 0.017124753, %v1278_v31  ;;  %v1709_v60 = vadd.f32 -2.117904, %v1493_v1  ;;  %v851_v42 = vunpack.c.3.s8 %v5906_v21  ;;  %v1280_v35 = vcvt.s32.f32 %v1064_v9 }
 0x143   : > { %v4914_v10 = vpack.c.bf16 %v1708_v13, %v1707_v6  ;;  %v1495_v2 = vmul.f32 0.017124753, %v1279_v39  ;;  %v1066_v59 = vand.u32 255, %v850_v11  ;;  %v1281_v8 = vcvt.s32.f32 %v1065_v47 }
 0x144   : > { %v1710_v45 = vadd.f32 -2.117904, %v1494_v43  ;;  %v852_v58 = vunpack.c.3.s8 %v5910_v12  ;;  %v1067_v36 = vand.u32 255, %v851_v42  ;;  %v1496_v37 = vmul.f32 0.017124753, %v1280_v35 }
 0x145   : > { %2487 = vst [vmem:[%s5574_s10 + $0x2a0] sm:$0xff] %v4914_v10  ;;  %v1711_v57 = vadd.f32 -2.117904, %v1495_v2  ;;  %v1282_v19 = vcvt.s32.f32 %v1066_v59  ;;  %v853_v33 = vunpack.c.3.s8 %v5915_v44  ;;  %v1497_v46 = vmul.f32 0.017124753, %v1281_v8 }
 0x146   : > { %v4915_v56 = vpack.c.bf16 %v1710_v45, %v1709_v60  ;;  %v1068_v3 = vand.u32 255, %v852_v58  ;;  %v1283_v21 = vcvt.s32.f32 %v1067_v36  ;;  %v1712_v16 = vadd.f32 -2.117904, %v1496_v37 }
 0x147   : > { %v1498_v38 = vmul.f32 0.017124753, %v1282_v19  ;;  %v854_v24 = vunpack.c.3.s8 %v5919_v55  ;;  %v1069_v52 = vand.u32 255, %v853_v33  ;;  %v1713_v28 = vadd.f32 -2.117904, %v1497_v46 }
 0x148   : > { %2488 = vst [vmem:[%s5574_s10 + $0x2a8] sm:$0xff] %v4915_v56  ;;  %v1284_v12 = vcvt.s32.f32 %v1068_v3  ;;  %v1499_v7 = vmul.f32 0.017124753, %v1283_v21  ;;  %v855_v62 = vunpack.c.3.s8 %v5924_v61  ;;  %v4916_v25 = vpack.c.bf16 %v1712_v16, %v1711_v57 }
 0x149   : > { %v1714_v6 = vadd.f32 -2.117904, %v1498_v38  ;;  %v1070_v44 = vand.u32 255, %v854_v24  ;;  %v1285_v17 = vcvt.s32.f32 %v1069_v52  ;;  %v856_v31 = vunpack.c.3.s8 %v5928_v14 }
 0x14a   : > { %v1500_v18 = vmul.f32 0.017124753, %v1284_v12  ;;  %v1715_v29 = vadd.f32 -2.117904, %v1499_v7  ;;  %v1071_v1 = vand.u32 255, %v855_v62  ;;  %2489 = vst [vmem:[%s5574_s10 + $0x2b0] sm:$0xff] %v4916_v25  ;;  %v857_v9 = vunpack.c.3.s8 %v5933_v30 }
 0x14b   : > { %v4917_v15 = vpack.c.bf16 %v1714_v6, %v1713_v28  ;;  %v1286_v55 = vcvt.s32.f32 %v1070_v44  ;;  %v1501_v13 = vmul.f32 0.017124753, %v1285_v17  ;;  %v1072_v11 = vand.u32 255, %v856_v31 }
 0x14c   : > { %v1716_v39 = vadd.f32 -2.117904, %v1500_v18  ;;  %v1287_v61 = vcvt.s32.f32 %v1071_v1  ;;  %v858_v43 = vunpack.c.3.s8 %v5937_v26  ;;  %v1073_v42 = vand.u32 255, %v857_v9 }
 0x14d   : > { %2490 = vst [vmem:[%s5574_s10 + $0x2b8] sm:$0xff] %v4917_v15  ;;  %v1502_v60 = vmul.f32 0.017124753, %v1286_v55  ;;  %v1717_v47 = vadd.f32 -2.117904, %v1501_v13  ;;  %v859_v10 = vunpack.c.3.s8 %v5942_v4  ;;  %v1288_v35 = vcvt.s32.f32 %v1072_v11 }
 0x14e   : > { %v4918_v14 = vpack.c.bf16 %v1716_v39, %v1715_v29  ;;  %v1503_v2 = vmul.f32 0.017507004, %v1287_v61  ;;  %v1074_v59 = vand.u32 255, %v858_v43  ;;  %v1289_v8 = vcvt.s32.f32 %v1073_v42 }
 0x14f   : > { %v1718_v45 = vadd.f32 -2.117904, %v1502_v60  ;;  %v860_v30 = vunpack.c.3.s8 %v5946_v34  ;;  %v1075_v58 = vand.u32 255, %v859_v10  ;;  %v1504_v36 = vmul.f32 0.017507004, %v1288_v35 }
 0x150   : > { %2491 = vst [vmem:[%s5574_s10 + $0x2c0] sm:$0xff] %v4918_v14  ;;  %v1719_v37 = vadd.f32 -2.0357144, %v1503_v2  ;;  %v1290_v26 = vcvt.s32.f32 %v1074_v59  ;;  %v861_v57 = vunpack.c.3.s8 %v5951_v54  ;;  %v1505_v33 = vmul.f32 0.017507004, %v1289_v8 }
 0x151   : > { %v4919_v19 = vpack.c.bf16 %v1718_v45, %v1717_v47  ;;  %v1076_v56 = vand.u32 255, %v860_v30  ;;  %v1291_v4 = vcvt.s32.f32 %v1075_v58  ;;  %v1720_v46 = vadd.f32 -2.0357144, %v1504_v36 }
 0x152   : > { %v1506_v3 = vmul.f32 0.017507004, %v1290_v26  ;;  %v862_v21 = vunpack.c.3.s8 %v5955_v0  ;;  %v1077_v16 = vand.u32 255, %v861_v57  ;;  %v1721_v38 = vadd.f32 -2.0357144, %v1505_v33 }
 0x153   : > { %2492 = vst [vmem:[%s5574_s10 + $0x2c8] sm:$0xff] %v4919_v19  ;;  %v1292_v34 = vcvt.s32.f32 %v1076_v56  ;;  %v1507_v24 = vmul.f32 0.017507004, %v1291_v4  ;;  %v863_v52 = vunpack.c.3.s8 %v5960_v40  ;;  %v4920_v28 = vpack.c.bf16 %v1720_v46, %v1719_v37 }
 0x154   : > { %v1722_v12 = vadd.f32 -2.0357144, %v1506_v3  ;;  %v1078_v54 = vand.u32 255, %v862_v21  ;;  %v1293_v7 = vcvt.s32.f32 %v1077_v16  ;;  %v864_v6 = vunpack.c.3.s8 %v5964_v53 }
 0x155   : > { %v1508_v62 = vmul.f32 0.017507004, %v1292_v34  ;;  %v1723_v25 = vadd.f32 -2.0357144, %v1507_v24  ;;  %v1079_v44 = vand.u32 255, %v863_v52  ;;  %2493 = vst [vmem:[%s5574_s10 + $0x2d0] sm:$0xff] %v4920_v28  ;;  %v865_v29 = vunpack.c.3.s8 %v5969_v49 }
 0x156   : > { %v4921_v17 = vpack.c.bf16 %v1722_v12, %v1721_v38  ;;  %v1294_v0 = vcvt.s32.f32 %v1078_v54  ;;  %v1509_v18 = vmul.f32 0.017507004, %v1293_v7  ;;  %v1080_v1 = vand.u32 255, %v864_v6 }
 0x157   : > { %v1724_v31 = vadd.f32 -2.0357144, %v1508_v62  ;;  %v1295_v40 = vcvt.s32.f32 %v1079_v44  ;;  %v866_v15 = vunpack.c.3.s8 %v5973_v5  ;;  %v1081_v9 = vand.u32 255, %v865_v29 }
 0x158   : > { %2494 = vst [vmem:[%s5574_s10 + $0x2d8] sm:$0xff] %v4921_v17  ;;  %v1510_v55 = vmul.f32 0.017507004, %v1294_v0  ;;  %v1725_v13 = vadd.f32 -2.0357144, %v1509_v18  ;;  %v867_v39 = vunpack.c.3.s8 %v5978_v41  ;;  %v1296_v11 = vcvt.s32.f32 %v1080_v1  ;;  %v6832_v1 = vld [vmem:[#allocation14_spill] sm:$0xff] }
 0x159   : > { %v4922_v53 = vpack.c.bf16 %v1724_v31, %v1723_v25  ;;  %v1511_v61 = vmul.f32 0.017507004, %v1295_v40  ;;  %v1082_v43 = vand.u32 255, %v866_v15  ;;  %v1297_v47 = vcvt.s32.f32 %v1081_v9 }
 0x15a   : > { %v1726_v60 = vadd.f32 -2.0357144, %v1510_v55  ;;  %v868_v49 = vunpack.c.3.s8 %v5982_v48  ;;  %v1083_v42 = vand.u32 255, %v867_v39  ;;  %v1512_v10 = vmul.f32 0.017507004, %v1296_v11 }
 0x15b   : > { %2495 = vst [vmem:[%s5574_s10 + $0x2e0] sm:$0xff] %v4922_v53  ;;  %v1727_v14 = vadd.f32 -2.0357144, %v1511_v61  ;;  %v1298_v5 = vcvt.s32.f32 %v1082_v43  ;;  %v869_v35 = vunpack.c.3.s8 %v5987_v50  ;;  %v1513_v59 = vmul.f32 0.017507004, %v1297_v47  ;;  %v6833_v53 = vld [vmem:[#allocation15_spill] sm:$0xff] }
 0x15c   : > { %v4923_v2 = vpack.c.bf16 %v1726_v60, %v1725_v13  ;;  %v1084_v45 = vand.u32 255, %v868_v49  ;;  %v1299_v41 = vcvt.s32.f32 %v1083_v42  ;;  %v1728_v8 = vadd.f32 -2.0357144, %v1512_v10  ;;  %v6834_v47 = vld [vmem:[#allocation16_spill] sm:$0xff] }
 0x15d   : > { %v1514_v30 = vmul.f32 0.017507004, %v1298_v5  ;;  %v870_v58 = vunpack.c.3.s8 %v5991_v32  ;;  %v1085_v36 = vand.u32 255, %v869_v35  ;;  %v1729_v37 = vadd.f32 -2.0357144, %v1513_v59  ;;  %v6835_v59 = vld [vmem:[#allocation17_spill] sm:$0xff] }
 0x15e   : > { %2496 = vst [vmem:[%s5574_s10 + $0x2e8] sm:$0xff] %v4923_v2  ;;  %v1300_v48 = vcvt.s32.f32 %v1084_v45  ;;  %v1515_v26 = vmul.f32 0.017507004, %v1299_v41  ;;  %v871_v57 = vunpack.c.3.s8 %v5996_v20  ;;  %v4924_v19 = vpack.c.bf16 %v1728_v8, %v1727_v14 }
 0x15f   : > { %v1730_v33 = vadd.f32 -2.0357144, %v1514_v30  ;;  %v1086_v50 = vand.u32 255, %v870_v58  ;;  %v1301_v56 = vcvt.s32.f32 %v1085_v36  ;;  %v872_v3 = vunpack.c.3.s8 %v6000_v27  ;;  %v6836_v36 = vld [vmem:[#allocation18_spill] sm:$0xff] }
 0x160   : > { %v1516_v4 = vmul.f32 0.017507004, %v1300_v48  ;;  %v1731_v46 = vadd.f32 -2.0357144, %v1515_v26  ;;  %v1087_v21 = vand.u32 255, %v871_v57  ;;  %2497 = vst [vmem:[%s5574_s10 + $0x2f0] sm:$0xff] %v4924_v19  ;;  %v873_v34 = vunpack.c.3.s8 %v6005_v22 }
 0x161   : > { %v4925_v16 = vpack.c.bf16 %v1730_v33, %v1729_v37  ;;  %v1302_v32 = vcvt.s32.f32 %v1086_v50  ;;  %v1517_v38 = vmul.f32 0.017507004, %v1301_v56  ;;  %v1088_v52 = vand.u32 255, %v872_v3  ;;  %v6837_v19 = vld [vmem:[#allocation19_spill] sm:$0xff] }
 0x162   : > { %v1732_v24 = vadd.f32 -2.0357144, %v1516_v4  ;;  %v1303_v20 = vcvt.s32.f32 %v1087_v21  ;;  %v874_v28 = vunpack.c.3.s8 %v6009_v23  ;;  %v1089_v7 = vand.u32 255, %v873_v34 }
 0x163   : > { %2498 = vst [vmem:[%s5574_s10 + $0x2f8] sm:$0xff] %v4925_v16  ;;  %v1518_v12 = vmul.f32 0.017507004, %v1302_v32  ;;  %v1733_v54 = vadd.f32 -2.0357144, %v1517_v38  ;;  %v875_v62 = vunpack.c.3.s8 %v6014_v51  ;;  %v1304_v25 = vcvt.s32.f32 %v1088_v52  ;;  %v6839_v52 = vld [vmem:[#allocation21_spill] sm:$0xff] }
 0x164   : > { %v4926_v27 = vpack.c.bf16 %v1732_v24, %v1731_v46  ;;  %v1519_v6 = vmul.f32 0.017507004, %v1303_v20  ;;  %v1090_v44 = vand.u32 255, %v874_v28  ;;  %v1305_v0 = vcvt.s32.f32 %v1089_v7  ;;  %v6838_v46 = vld [vmem:[#allocation20_spill] sm:$0xff] }
 0x165   : > { %v1734_v17 = vadd.f32 -2.0357144, %v1518_v12  ;;  %v876_v22 = vunpack.c.3.s8 %v6018_v63  ;;  %v1091_v18 = vand.u32 255, %v875_v62  ;;  %v1520_v29 = vmul.f32 0.017507004, %v1304_v25  ;;  %v6840_v62 = vld [vmem:[#allocation22_spill] sm:$0xff] }
 0x166   : > { %2499 = vst [vmem:[%s5574_s10 + $0x300] sm:$0xff] %v4926_v27  ;;  %v1735_v31 = vadd.f32 -2.0357144, %v1519_v6  ;;  %v1306_v23 = vcvt.s32.f32 %v1090_v44  ;;  %v877_v40 = vunpack.c.3.s8 %v6832_v1  ;;  %v1521_v55 = vmul.f32 0.017429193, %v1305_v0 }
 0x167   : > { %v4927_v15 = vpack.c.bf16 %v1734_v17, %v1733_v54  ;;  %v1092_v13 = vand.u32 255, %v876_v22  ;;  %v1307_v51 = vcvt.s32.f32 %v1091_v18  ;;  %v1736_v9 = vadd.f32 -2.0357144, %v1520_v29  ;;  %v6841_v18 = vld [vmem:[#allocation23_spill] sm:$0xff] }
 0x168   : > { %v1522_v39 = vmul.f32 0.017429193, %v1306_v23  ;;  %v878_v11 = vunpack.c.3.s8 %v6833_v53  ;;  %v1093_v61 = vand.u32 255, %v877_v40  ;;  %v1737_v43 = vadd.f32 -1.8044444, %v1521_v55 }
 0x169   : > { %2500 = vst [vmem:[%s5574_s10 + $0x308] sm:$0xff] %v4927_v15  ;;  %v1308_v63 = vcvt.s32.f32 %v1092_v13  ;;  %v1523_v60 = vmul.f32 0.017429193, %v1307_v51  ;;  %v879_v49 = vunpack.c.3.s8 %v6834_v47  ;;  %v4928_v42 = vpack.c.bf16 %v1736_v9, %v1735_v31  ;;  %v6842_v15 = vld [vmem:[#allocation24_spill] sm:$0xff] }
 0x16a   : > { %v1738_v10 = vadd.f32 -1.8044444, %v1522_v39  ;;  %v1094_v14 = vand.u32 255, %v878_v11  ;;  %v1309_v5 = vcvt.s32.f32 %v1093_v61  ;;  %v880_v45 = vunpack.c.3.s8 %v6835_v59  ;;  %v6843_v61 = vld [vmem:[#allocation25_spill] sm:$0xff]  ;;  %v6845_v59 = vld [vmem:[#allocation27_spill] sm:$0xff] }
 0x16b   : > { %v1524_v35 = vmul.f32 0.017429193, %v1308_v63  ;;  %v1739_v2 = vadd.f32 -1.8044444, %v1523_v60  ;;  %v1095_v41 = vand.u32 255, %v879_v49  ;;  %2501 = vst [vmem:[%s5574_s10 + $0x310] sm:$0xff] %v4928_v42  ;;  %v881_v37 = vunpack.c.3.s8 %v6836_v36 }
 0x16c   : > { %v4929_v8 = vpack.c.bf16 %v1738_v10, %v1737_v43  ;;  %v1310_v30 = vcvt.s32.f32 %v1094_v14  ;;  %v1525_v58 = vmul.f32 0.017429193, %v1309_v5  ;;  %v1096_v26 = vand.u32 255, %v880_v45  ;;  %v6163_v60 = vld [vmem:[%s5507_s4] sm:$0xff] }
 0x16d   : > { %v1740_v48 = vadd.f32 -1.8044444, %v1524_v35  ;;  %v1311_v57 = vcvt.s32.f32 %v1095_v41  ;;  %v882_v33 = vunpack.c.3.s8 %v6837_v19  ;;  %v1097_v4 = vand.u32 255, %v881_v37  ;;  %v6844_v10 = vld [vmem:[#allocation26_spill] sm:$0xff]  ;;  %v6169_v41 = vld [vmem:[%s5507_s4 + $0x8] sm:$0xff] }
 0x16e   : > { %2502 = vst [vmem:[%s5574_s10 + $0x318] sm:$0xff] %v4929_v8  ;;  %v1526_v50 = vmul.f32 0.017429193, %v1310_v30  ;;  %v1741_v56 = vadd.f32 -1.8044444, %v1525_v58  ;;  %v883_v3 = vunpack.c.3.s8 %v6838_v46  ;;  %v1312_v16 = vcvt.s32.f32 %v1096_v26  ;;  %v6174_v37 = vld [vmem:[%s5507_s4 + $0x10] sm:$0xff] }
 0x16f   : > { %v4930_v21 = vpack.c.bf16 %v1740_v48, %v1739_v2  ;;  %v1527_v32 = vmul.f32 0.017429193, %v1311_v57  ;;  %v1098_v38 = vand.u32 255, %v882_v33  ;;  %v1313_v24 = vcvt.s32.f32 %v1097_v4  ;;  %v6178_v46 = vld [vmem:[%s5507_s4 + $0x18] sm:$0xff] }
 0x170   : > { %v1742_v34 = vadd.f32 -1.8044444, %v1526_v50  ;;  %v884_v20 = vunpack.c.3.s8 %v6839_v52  ;;  %v1099_v28 = vand.u32 255, %v883_v3  ;;  %v1528_v12 = vmul.f32 0.017429193, %v1312_v16 }
 0x171   : > { %2503 = vst [vmem:[%s5574_s10 + $0x320] sm:$0xff] %v4930_v21  ;;  %v1743_v54 = vadd.f32 -1.8044444, %v1527_v32  ;;  %v1314_v7 = vcvt.s32.f32 %v1098_v38  ;;  %v885_v27 = vunpack.c.3.s8 %v6840_v62  ;;  %v1529_v6 = vmul.f32 0.017429193, %v1313_v24  ;;  %v6183_v38 = vld [vmem:[%s5507_s4 + $0x20] sm:$0xff] }
 0x172   : > { %v4931_v25 = vpack.c.bf16 %v1742_v34, %v1741_v56  ;;  %v1100_v44 = vand.u32 255, %v884_v20  ;;  %v1315_v17 = vcvt.s32.f32 %v1099_v28  ;;  %v1744_v0 = vadd.f32 -1.8044444, %v1528_v12  ;;  %v6187_v62 = vld [vmem:[%s5507_s4 + $0x28] sm:$0xff] }
 0x173   : > { %v1530_v22 = vmul.f32 0.017429193, %v1314_v7  ;;  %v886_v29 = vunpack.c.3.s8 %v6841_v18  ;;  %v1101_v31 = vand.u32 255, %v885_v27  ;;  %v1745_v23 = vadd.f32 -1.8044444, %v1529_v6 }
 0x174   : > { %2504 = vst [vmem:[%s5574_s10 + $0x328] sm:$0xff] %v4931_v25  ;;  %v1316_v1 = vcvt.s32.f32 %v1100_v44  ;;  %v1531_v40 = vmul.f32 0.017429193, %v1315_v17  ;;  %v887_v55 = vunpack.c.3.s8 %v6842_v15  ;;  %v4932_v13 = vpack.c.bf16 %v1744_v0, %v1743_v54 }
 0x175   : > { %v1746_v51 = vadd.f32 -1.8044444, %v1530_v22  ;;  %v1102_v9 = vand.u32 255, %v886_v29  ;;  %v1317_v39 = vcvt.s32.f32 %v1101_v31  ;;  %v888_v43 = vunpack.c.3.s8 %v6843_v61 }
 0x176   : > { %v1532_v53 = vmul.f32 0.017429193, %v1316_v1  ;;  %v1747_v11 = vadd.f32 -1.8044444, %v1531_v40  ;;  %v1103_v63 = vand.u32 255, %v887_v55  ;;  %2505 = vst [vmem:[%s5574_s10 + $0x330] sm:$0xff] %v4932_v13  ;;  %v889_v14 = vunpack.c.3.s8 %v6844_v10 }
 0x177   : > { %v4933_v47 = vpack.c.bf16 %v1746_v51, %v1745_v23  ;;  %v1318_v49 = vcvt.s32.f32 %v1102_v9  ;;  %v1533_v42 = vmul.f32 0.017429193, %v1317_v39  ;;  %v1104_v35 = vand.u32 255, %v888_v43 }
 0x178   : > { %v1748_v5 = vadd.f32 -1.8044444, %v1532_v53  ;;  %v1319_v2 = vcvt.s32.f32 %v1103_v63  ;;  %v890_v45 = vunpack.c.3.s8 %v6845_v59  ;;  %v1105_v58 = vand.u32 255, %v889_v14 }
 0x179   : > { %2506 = vst [vmem:[%s5574_s10 + $0x338] sm:$0xff] %v4933_v47  ;;  %v1534_v8 = vmul.f32 0.017429193, %v1318_v49  ;;  %v1749_v30 = vadd.f32 -1.8044444, %v1533_v42  ;;  %v2601_v36 = vunpack.c.0.s8 %v6163_v60  ;;  %v1320_v26 = vcvt.s32.f32 %v1104_v35 }
 0x17a   : > { %v4934_v48 = vpack.c.bf16 %v1748_v5, %v1747_v11  ;;  %v1535_v57 = vmul.f32 0.017429193, %v1319_v2  ;;  %v1106_v19 = vand.u32 255, %v890_v45  ;;  %v1321_v50 = vcvt.s32.f32 %v1105_v58 }
 0x17b   : > { %v1750_v33 = vadd.f32 -1.8044444, %v1534_v8  ;;  %v2602_v56 = vunpack.c.0.s8 %v6169_v41  ;;  %v2817_v4 = vand.u32 255, %v2601_v36  ;;  %v1536_v3 = vmul.f32 0.017429193, %v1320_v26 }
 0x17c   : > { %2507 = vst [vmem:[%s5574_s10 + $0x340] sm:$0xff] %v4934_v48  ;;  %v1751_v21 = vadd.f32 -1.8044444, %v1535_v57  ;;  %v1322_v16 = vcvt.s32.f32 %v1106_v19  ;;  %v2603_v32 = vunpack.c.0.s8 %v6174_v37  ;;  %v1537_v24 = vmul.f32 0.017429193, %v1321_v50 }
 0x17d   : > { %v4935_v34 = vpack.c.bf16 %v1750_v33, %v1749_v30  ;;  %v2818_v52 = vand.u32 255, %v2602_v56  ;;  %v3033_v20 = vcvt.s32.f32 %v2817_v4  ;;  %v1752_v28 = vadd.f32 -1.8044444, %v1536_v3 }
 0x17e   : > { %v1538_v12 = vmul.f32 0.017429193, %v1322_v16  ;;  %v2604_v54 = vunpack.c.0.s8 %v6178_v46  ;;  %v2819_v7 = vand.u32 255, %v2603_v32  ;;  %v1753_v27 = vadd.f32 -1.8044444, %v1537_v24 }
 0x17f   : > { %2508 = vst [vmem:[%s5574_s10 + $0x348] sm:$0xff] %v4935_v34  ;;  %v3034_v25 = vcvt.s32.f32 %v2818_v52  ;;  %v3249_v6 = vmul.f32 0.017124753, %v3033_v20  ;;  %v2605_v44 = vunpack.c.0.s8 %v6183_v38  ;;  %v4936_v17 = vpack.c.bf16 %v1752_v28, %v1751_v21 }
 0x180   : > { %v1754_v0 = vadd.f32 -1.8044444, %v1538_v12  ;;  %v2820_v22 = vand.u32 255, %v2604_v54  ;;  %v3035_v18 = vcvt.s32.f32 %v2819_v7  ;;  %v2606_v23 = vunpack.c.0.s8 %v6187_v62 }
 0x181   : > { %v3250_v29 = vmul.f32 0.017124753, %v3034_v25  ;;  %v3465_v31 = vadd.f32 -2.117904, %v3249_v6  ;;  %v2821_v1 = vand.u32 255, %v2605_v44  ;;  %2509 = vst [vmem:[%s5574_s10 + $0x350] sm:$0xff] %v4936_v17  ;;  %v2607_v13 = vunpack.c.1.s8 %v6163_v60 }
 0x182   : > { %v4937_v40 = vpack.c.bf16 %v1754_v0, %v1753_v27  ;;  %v3036_v15 = vcvt.s32.f32 %v2820_v22  ;;  %v3251_v55 = vmul.f32 0.017507004, %v3035_v18  ;;  %v2822_v9 = vand.u32 255, %v2606_v23 }
 0x183   : > { %v3466_v51 = vadd.f32 -2.117904, %v3250_v29  ;;  %v3037_v39 = vcvt.s32.f32 %v2821_v1  ;;  %v2608_v53 = vunpack.c.1.s8 %v6169_v41  ;;  %v2823_v43 = vand.u32 255, %v2607_v13 }
 0x184   : > { %2510 = vst [vmem:[%s5574_s10 + $0x358] sm:$0xff] %v4937_v40  ;;  %v3252_v11 = vmul.f32 0.017507004, %v3036_v15  ;;  %v3467_v61 = vadd.f32 -2.0357144, %v3251_v55  ;;  %v2609_v63 = vunpack.c.1.s8 %v6174_v37  ;;  %v3038_v49 = vcvt.s32.f32 %v2822_v9 }
 0x185   : > { %v4938_v47 = vpack.c.bf16 %v3466_v51, %v3465_v31  ;;  %v3253_v42 = vmul.f32 0.017429193, %v3037_v39  ;;  %v2824_v10 = vand.u32 255, %v2608_v53  ;;  %v3039_v5 = vcvt.s32.f32 %v2823_v43 }
 0x186   : > { %v3468_v14 = vadd.f32 -2.0357144, %v3252_v11  ;;  %v2610_v35 = vunpack.c.1.s8 %v6178_v46  ;;  %v2825_v2 = vand.u32 255, %v2609_v63  ;;  %v3254_v59 = vmul.f32 0.017429193, %v3038_v49 }
 0x187   : > { %4329 = vst [vmem:[%s6200_s17] sm:$0xff] %v4938_v47  ;;  %v3469_v45 = vadd.f32 -1.8044444, %v3253_v42  ;;  %v3040_v8 = vcvt.s32.f32 %v2824_v10  ;;  %v2611_v30 = vunpack.c.1.s8 %v6183_v38  ;;  %v3255_v36 = vmul.f32 0.017124753, %v3039_v5 }
 0x188   : > { %v4939_v58 = vpack.c.bf16 %v3468_v14, %v3467_v61  ;;  %v2826_v48 = vand.u32 255, %v2610_v35  ;;  %v3041_v26 = vcvt.s32.f32 %v2825_v2  ;;  %v3470_v57 = vadd.f32 -1.8044444, %v3254_v59 }
 0x189   : > { %v3256_v19 = vmul.f32 0.017124753, %v3040_v8  ;;  %v2612_v33 = vunpack.c.1.s8 %v6187_v62  ;;  %v2827_v50 = vand.u32 255, %v2611_v30  ;;  %v3471_v56 = vadd.f32 -2.117904, %v3255_v36 }
 0x18a   : > { %4330 = vst [vmem:[%s6200_s17 + $0x8] sm:$0xff] %v4939_v58  ;;  %v3042_v4 = vcvt.s32.f32 %v2826_v48  ;;  %v3257_v3 = vmul.f32 0.017507004, %v3041_v26  ;;  %v2613_v21 = vunpack.c.2.s8 %v6163_v60  ;;  %v4940_v16 = vpack.c.bf16 %v3470_v57, %v3469_v45 }
 0x18b   : > { %v3472_v32 = vadd.f32 -2.117904, %v3256_v19  ;;  %v2828_v34 = vand.u32 255, %v2612_v33  ;;  %v3043_v24 = vcvt.s32.f32 %v2827_v50  ;;  %v2614_v28 = vunpack.c.2.s8 %v6169_v41 }
 0x18c   : > { %v3258_v52 = vmul.f32 0.017507004, %v3042_v4  ;;  %v3473_v20 = vadd.f32 -2.0357144, %v3257_v3  ;;  %v2829_v12 = vand.u32 255, %v2613_v21  ;;  %4331 = vst [vmem:[%s6200_s17 + $0x10] sm:$0xff] %v4940_v16  ;;  %v2615_v25 = vunpack.c.2.s8 %v6174_v37 }
 0x18d   : > { %v4941_v54 = vpack.c.bf16 %v3472_v32, %v3471_v56  ;;  %v3044_v7 = vcvt.s32.f32 %v2828_v34  ;;  %v3259_v27 = vmul.f32 0.017429193, %v3043_v24  ;;  %v2830_v44 = vand.u32 255, %v2614_v28  ;;  %v6227_v16 = vld [vmem:[%s5507_s4 + $0x38] sm:$0xff] }
 0x18e   : > { %v3474_v6 = vadd.f32 -2.0357144, %v3258_v52  ;;  %v3045_v17 = vcvt.s32.f32 %v2829_v12  ;;  %v2616_v0 = vunpack.c.2.s8 %v6178_v46  ;;  %v2831_v29 = vand.u32 255, %v2615_v25  ;;  %v6232_v52 = vld [vmem:[%s5507_s4 + $0x40] sm:$0xff]  ;;  %v6236_v25 = vld [vmem:[%s5507_s4 + $0x48] sm:$0xff] }
 0x18f   : > { %4332 = vst [vmem:[%s6200_s17 + $0x18] sm:$0xff] %v4941_v54  ;;  %v3260_v22 = vmul.f32 0.017429193, %v3044_v7  ;;  %v3475_v18 = vadd.f32 -1.8044444, %v3259_v27  ;;  %v2617_v31 = vunpack.c.2.s8 %v6183_v38  ;;  %v3046_v1 = vcvt.s32.f32 %v2830_v44 }
 0x190   : > { %v4942_v23 = vpack.c.bf16 %v3474_v6, %v3473_v20  ;;  %v3261_v40 = vmul.f32 0.017124753, %v3045_v17  ;;  %v2832_v15 = vand.u32 255, %v2616_v0  ;;  %v3047_v13 = vcvt.s32.f32 %v2831_v29 }
 0x191   : > { %v3476_v55 = vadd.f32 -1.8044444, %v3260_v22  ;;  %v2618_v51 = vunpack.c.2.s8 %v6187_v62  ;;  %v2833_v9 = vand.u32 255, %v2617_v31  ;;  %v3262_v39 = vmul.f32 0.017124753, %v3046_v1  ;;  %v6241_v22 = vld [vmem:[%s5507_s4 + $0x50] sm:$0xff] }
 0x192   : > { %4333 = vst [vmem:[%s6200_s17 + $0x20] sm:$0xff] %v4942_v23  ;;  %v3477_v53 = vadd.f32 -2.117904, %v3261_v40  ;;  %v3048_v11 = vcvt.s32.f32 %v2832_v15  ;;  %v2619_v61 = vunpack.c.3.s8 %v6163_v60  ;;  %v3263_v63 = vmul.f32 0.017507004, %v3047_v13  ;;  %v6245_v13 = vld [vmem:[%s5507_s4 + $0x58] sm:$0xff] }
 0x193   : > { %v4943_v43 = vpack.c.bf16 %v3476_v55, %v3475_v18  ;;  %v2834_v47 = vand.u32 255, %v2618_v51  ;;  %v3049_v49 = vcvt.s32.f32 %v2833_v9  ;;  %v3478_v42 = vadd.f32 -2.117904, %v3262_v39 }
 0x194   : > { %v3264_v10 = vmul.f32 0.017507004, %v3048_v11  ;;  %v2620_v14 = vunpack.c.3.s8 %v6169_v41  ;;  %v2835_v5 = vand.u32 255, %v2619_v61  ;;  %v3479_v35 = vadd.f32 -2.0357144, %v3263_v63  ;;  %v6221_v41 = vld [vmem:[%s5507_s4 + $0x30] sm:$0xff] }
 0x195   : > { %4334 = vst [vmem:[%s6200_s17 + $0x28] sm:$0xff] %v4943_v43  ;;  %v3050_v2 = vcvt.s32.f32 %v2834_v47  ;;  %v3265_v59 = vmul.f32 0.017429193, %v3049_v49  ;;  %v2621_v45 = vunpack.c.3.s8 %v6174_v37  ;;  %v4944_v8 = vpack.c.bf16 %v3478_v42, %v3477_v53 }
 0x196   : > { %v3480_v30 = vadd.f32 -2.0357144, %v3264_v10  ;;  %v2836_v60 = vand.u32 255, %v2620_v14  ;;  %v3051_v58 = vcvt.s32.f32 %v2835_v5  ;;  %v2622_v26 = vunpack.c.3.s8 %v6178_v46 }
 0x197   : > { %v3266_v36 = vmul.f32 0.017429193, %v3050_v2  ;;  %v3481_v48 = vadd.f32 -1.8044444, %v3265_v59  ;;  %v2837_v57 = vand.u32 255, %v2621_v45  ;;  %4335 = vst [vmem:[%s6200_s17 + $0x30] sm:$0xff] %v4944_v8  ;;  %v2623_v37 = vunpack.c.3.s8 %v6183_v38 }
 0x198   : > { %v4945_v19 = vpack.c.bf16 %v3480_v30, %v3479_v35  ;;  %v3052_v33 = vcvt.s32.f32 %v2836_v60  ;;  %v3267_v50 = vmul.f32 0.017124753, %v3051_v58  ;;  %v2838_v4 = vand.u32 255, %v2622_v26 }
 0x199   : > { %v3482_v56 = vadd.f32 -1.8044444, %v3266_v36  ;;  %v3053_v3 = vcvt.s32.f32 %v2837_v57  ;;  %v2624_v21 = vunpack.c.3.s8 %v6187_v62  ;;  %v2839_v34 = vand.u32 255, %v2623_v37 }
 0x19a   : > { %4336 = vst [vmem:[%s6200_s17 + $0x38] sm:$0xff] %v4945_v19  ;;  %v3268_v46 = vmul.f32 0.017124753, %v3052_v33  ;;  %v3483_v32 = vadd.f32 -2.117904, %v3267_v50  ;;  %v2625_v24 = vunpack.c.0.s8 %v6221_v41  ;;  %v3054_v38 = vcvt.s32.f32 %v2838_v4 }
 0x19b   : > { %v4946_v20 = vpack.c.bf16 %v3482_v56, %v3481_v48  ;;  %v3269_v28 = vmul.f32 0.017507004, %v3053_v3  ;;  %v2840_v12 = vand.u32 255, %v2624_v21  ;;  %v3055_v7 = vcvt.s32.f32 %v2839_v34 }
 0x19c   : > { %v3484_v54 = vadd.f32 -2.117904, %v3268_v46  ;;  %v2626_v62 = vunpack.c.0.s8 %v6227_v16  ;;  %v2841_v27 = vand.u32 255, %v2625_v24  ;;  %v3270_v6 = vmul.f32 0.017507004, %v3054_v38 }
 0x19d   : > { %4337 = vst [vmem:[%s6200_s17 + $0x40] sm:$0xff] %v4946_v20  ;;  %v3485_v44 = vadd.f32 -2.0357144, %v3269_v28  ;;  %v3056_v17 = vcvt.s32.f32 %v2840_v12  ;;  %v2627_v0 = vunpack.c.0.s8 %v6232_v52  ;;  %v3271_v29 = vmul.f32 0.017429193, %v3055_v7 }
 0x19e   : > { %v4947_v18 = vpack.c.bf16 %v3484_v54, %v3483_v32  ;;  %v2842_v31 = vand.u32 255, %v2626_v62  ;;  %v3057_v23 = vcvt.s32.f32 %v2841_v27  ;;  %v3486_v1 = vadd.f32 -2.0357144, %v3270_v6 }
 0x19f   : > { %v3272_v40 = vmul.f32 0.017429193, %v3056_v17  ;;  %v2628_v15 = vunpack.c.0.s8 %v6236_v25  ;;  %v2843_v55 = vand.u32 255, %v2627_v0  ;;  %v3487_v51 = vadd.f32 -1.8044444, %v3271_v29 }
 0x1a0   : > { %4338 = vst [vmem:[%s6200_s17 + $0x48] sm:$0xff] %v4947_v18  ;;  %v3058_v9 = vcvt.s32.f32 %v2842_v31  ;;  %v3273_v39 = vmul.f32 0.017124753, %v3057_v23  ;;  %v2629_v53 = vunpack.c.0.s8 %v6241_v22  ;;  %v4948_v11 = vpack.c.bf16 %v3486_v1, %v3485_v44 }
 0x1a1   : > { %v3488_v61 = vadd.f32 -1.8044444, %v3272_v40  ;;  %v2844_v43 = vand.u32 255, %v2628_v15  ;;  %v3059_v63 = vcvt.s32.f32 %v2843_v55  ;;  %v2630_v42 = vunpack.c.0.s8 %v6245_v13 }
 0x1a2   : > { %v3274_v47 = vmul.f32 0.017124753, %v3058_v9  ;;  %v3489_v49 = vadd.f32 -2.117904, %v3273_v39  ;;  %v2845_v10 = vand.u32 255, %v2629_v53  ;;  %4339 = vst [vmem:[%s6200_s17 + $0x50] sm:$0xff] %v4948_v11  ;;  %v2631_v2 = vunpack.c.1.s8 %v6221_v41 }
 0x1a3   : > { %v4949_v14 = vpack.c.bf16 %v3488_v61, %v3487_v51  ;;  %v3060_v5 = vcvt.s32.f32 %v2844_v43  ;;  %v3275_v35 = vmul.f32 0.017507004, %v3059_v63  ;;  %v2846_v45 = vand.u32 255, %v2630_v42 }
 0x1a4   : > { %v3490_v59 = vadd.f32 -2.117904, %v3274_v47  ;;  %v3061_v8 = vcvt.s32.f32 %v2845_v10  ;;  %v2632_v30 = vunpack.c.1.s8 %v6227_v16  ;;  %v2847_v36 = vand.u32 255, %v2631_v2 }
 0x1a5   : > { %4340 = vst [vmem:[%s6200_s17 + $0x58] sm:$0xff] %v4949_v14  ;;  %v3276_v60 = vmul.f32 0.017507004, %v3060_v5  ;;  %v3491_v58 = vadd.f32 -2.0357144, %v3275_v35  ;;  %v2633_v48 = vunpack.c.1.s8 %v6232_v52  ;;  %v3062_v57 = vcvt.s32.f32 %v2846_v45 }
 0x1a6   : > { %v4950_v26 = vpack.c.bf16 %v3490_v59, %v3489_v49  ;;  %v3277_v19 = vmul.f32 0.017429193, %v3061_v8  ;;  %v2848_v33 = vand.u32 255, %v2632_v30  ;;  %v3063_v37 = vcvt.s32.f32 %v2847_v36 }
 0x1a7   : > { %v3492_v50 = vadd.f32 -2.0357144, %v3276_v60  ;;  %v2634_v56 = vunpack.c.1.s8 %v6236_v25  ;;  %v2849_v4 = vand.u32 255, %v2633_v48  ;;  %v3278_v3 = vmul.f32 0.017429193, %v3062_v57 }
 0x1a8   : > { %4341 = vst [vmem:[%s6200_s17 + $0x60] sm:$0xff] %v4950_v26  ;;  %v3493_v21 = vadd.f32 -1.8044444, %v3277_v19  ;;  %v3064_v46 = vcvt.s32.f32 %v2848_v33  ;;  %v2635_v32 = vunpack.c.1.s8 %v6241_v22  ;;  %v3279_v24 = vmul.f32 0.017124753, %v3063_v37 }
 0x1a9   : > { %v4951_v34 = vpack.c.bf16 %v3492_v50, %v3491_v58  ;;  %v2850_v20 = vand.u32 255, %v2634_v56  ;;  %v3065_v38 = vcvt.s32.f32 %v2849_v4  ;;  %v3494_v28 = vadd.f32 -1.8044444, %v3278_v3 }
 0x1aa   : > { %v3280_v12 = vmul.f32 0.017124753, %v3064_v46  ;;  %v2636_v54 = vunpack.c.1.s8 %v6245_v13  ;;  %v2851_v7 = vand.u32 255, %v2635_v32  ;;  %v3495_v62 = vadd.f32 -2.117904, %v3279_v24 }
 0x1ab   : > { %4342 = vst [vmem:[%s6200_s17 + $0x68] sm:$0xff] %v4951_v34  ;;  %v3066_v27 = vcvt.s32.f32 %v2850_v20  ;;  %v3281_v6 = vmul.f32 0.017507004, %v3065_v38  ;;  %v2637_v44 = vunpack.c.2.s8 %v6221_v41  ;;  %v4952_v17 = vpack.c.bf16 %v3494_v28, %v3493_v21 }
 0x1ac   : > { %v3496_v0 = vadd.f32 -2.117904, %v3280_v12  ;;  %v2852_v18 = vand.u32 255, %v2636_v54  ;;  %v3067_v29 = vcvt.s32.f32 %v2851_v7  ;;  %v2638_v1 = vunpack.c.2.s8 %v6227_v16 }
 0x1ad   : > { %v3282_v31 = vmul.f32 0.017507004, %v3066_v27  ;;  %v3497_v23 = vadd.f32 -2.0357144, %v3281_v6  ;;  %v2853_v40 = vand.u32 255, %v2637_v44  ;;  %4343 = vst [vmem:[%s6200_s17 + $0x70] sm:$0xff] %v4952_v17  ;;  %v2639_v9 = vunpack.c.2.s8 %v6232_v52 }
 0x1ae   : > { %v4953_v15 = vpack.c.bf16 %v3496_v0, %v3495_v62  ;;  %v3068_v55 = vcvt.s32.f32 %v2852_v18  ;;  %v3283_v51 = vmul.f32 0.017429193, %v3067_v29  ;;  %v2854_v53 = vand.u32 255, %v2638_v1  ;;  %v6281_v17 = vld [vmem:[%s5507_s4 + $0x68] sm:$0xff] }
 0x1af   : > { %v3498_v39 = vadd.f32 -2.0357144, %v3282_v31  ;;  %v3069_v11 = vcvt.s32.f32 %v2853_v40  ;;  %v2640_v61 = vunpack.c.2.s8 %v6236_v25  ;;  %v2855_v47 = vand.u32 255, %v2639_v9  ;;  %v6286_v31 = vld [vmem:[%s5507_s4 + $0x70] sm:$0xff]  ;;  %v6290_v9 = vld [vmem:[%s5507_s4 + $0x78] sm:$0xff] }
 0x1b0   : > { %4344 = vst [vmem:[%s6200_s17 + $0x78] sm:$0xff] %v4953_v15  ;;  %v3284_v43 = vmul.f32 0.017429193, %v3068_v55  ;;  %v3499_v63 = vadd.f32 -1.8044444, %v3283_v51  ;;  %v2641_v49 = vunpack.c.2.s8 %v6241_v22  ;;  %v3070_v10 = vcvt.s32.f32 %v2854_v53 }
 0x1b1   : > { %v4954_v42 = vpack.c.bf16 %v3498_v39, %v3497_v23  ;;  %v3285_v14 = vmul.f32 0.017124753, %v3069_v11  ;;  %v2856_v5 = vand.u32 255, %v2640_v61  ;;  %v3071_v2 = vcvt.s32.f32 %v2855_v47 }
 0x1b2   : > { %v3500_v35 = vadd.f32 -1.8044444, %v3284_v43  ;;  %v2642_v59 = vunpack.c.2.s8 %v6245_v13  ;;  %v2857_v45 = vand.u32 255, %v2641_v49  ;;  %v3286_v8 = vmul.f32 0.017124753, %v3070_v10  ;;  %v6295_v43 = vld [vmem:[%s5507_s4 + $0x80] sm:$0xff] }
 0x1b3   : > { %4345 = vst [vmem:[%s6200_s17 + $0x80] sm:$0xff] %v4954_v42  ;;  %v3501_v30 = vadd.f32 -2.117904, %v3285_v14  ;;  %v3072_v60 = vcvt.s32.f32 %v2856_v5  ;;  %v2643_v58 = vunpack.c.3.s8 %v6221_v41  ;;  %v3287_v48 = vmul.f32 0.017507004, %v3071_v2  ;;  %v6299_v2 = vld [vmem:[%s5507_s4 + $0x88] sm:$0xff] }
 0x1b4   : > { %v4955_v36 = vpack.c.bf16 %v3500_v35, %v3499_v63  ;;  %v2858_v26 = vand.u32 255, %v2642_v59  ;;  %v3073_v57 = vcvt.s32.f32 %v2857_v45  ;;  %v3502_v19 = vadd.f32 -2.117904, %v3286_v8 }
 0x1b5   : > { %v3288_v33 = vmul.f32 0.017507004, %v3072_v60  ;;  %v2644_v50 = vunpack.c.3.s8 %v6227_v16  ;;  %v2859_v37 = vand.u32 255, %v2643_v58  ;;  %v3503_v56 = vadd.f32 -2.0357144, %v3287_v48  ;;  %v6275_v16 = vld [vmem:[%s5507_s4 + $0x60] sm:$0xff] }
 0x1b6   : > { %4346 = vst [vmem:[%s6200_s17 + $0x88] sm:$0xff] %v4955_v36  ;;  %v3074_v4 = vcvt.s32.f32 %v2858_v26  ;;  %v3289_v3 = vmul.f32 0.017429193, %v3073_v57  ;;  %v2645_v21 = vunpack.c.3.s8 %v6232_v52  ;;  %v4956_v46 = vpack.c.bf16 %v3502_v19, %v3501_v30 }
 0x1b7   : > { %v3504_v32 = vadd.f32 -2.0357144, %v3288_v33  ;;  %v2860_v41 = vand.u32 255, %v2644_v50  ;;  %v3075_v34 = vcvt.s32.f32 %v2859_v37  ;;  %v2646_v38 = vunpack.c.3.s8 %v6236_v25 }
 0x1b8   : > { %v3290_v24 = vmul.f32 0.017429193, %v3074_v4  ;;  %v3505_v20 = vadd.f32 -1.8044444, %v3289_v3  ;;  %v2861_v28 = vand.u32 255, %v2645_v21  ;;  %4347 = vst [vmem:[%s6200_s17 + $0x90] sm:$0xff] %v4956_v46  ;;  %v2647_v52 = vunpack.c.3.s8 %v6241_v22 }
 0x1b9   : > { %v4957_v12 = vpack.c.bf16 %v3504_v32, %v3503_v56  ;;  %v3076_v54 = vcvt.s32.f32 %v2860_v41  ;;  %v3291_v7 = vmul.f32 0.017124753, %v3075_v34  ;;  %v2862_v27 = vand.u32 255, %v2646_v38 }
 0x1ba   : > { %v3506_v62 = vadd.f32 -1.8044444, %v3290_v24  ;;  %v3077_v6 = vcvt.s32.f32 %v2861_v28  ;;  %v2648_v44 = vunpack.c.3.s8 %v6245_v13  ;;  %v2863_v18 = vand.u32 255, %v2647_v52 }
 0x1bb   : > { %4348 = vst [vmem:[%s6200_s17 + $0x98] sm:$0xff] %v4957_v12  ;;  %v3292_v25 = vmul.f32 0.017124753, %v3076_v54  ;;  %v3507_v0 = vadd.f32 -2.117904, %v3291_v7  ;;  %v2649_v29 = vunpack.c.0.s8 %v6275_v16  ;;  %v3078_v22 = vcvt.s32.f32 %v2862_v27 }
 0x1bc   : > { %v4958_v23 = vpack.c.bf16 %v3506_v62, %v3505_v20  ;;  %v3293_v1 = vmul.f32 0.017507004, %v3077_v6  ;;  %v2864_v40 = vand.u32 255, %v2648_v44  ;;  %v3079_v55 = vcvt.s32.f32 %v2863_v18 }
 0x1bd   : > { %v3508_v15 = vadd.f32 -2.117904, %v3292_v25  ;;  %v2650_v13 = vunpack.c.0.s8 %v6281_v17  ;;  %v2865_v51 = vand.u32 255, %v2649_v29  ;;  %v3294_v39 = vmul.f32 0.017507004, %v3078_v22 }
 0x1be   : > { %4349 = vst [vmem:[%s6200_s17 + $0xa0] sm:$0xff] %v4958_v23  ;;  %v3509_v53 = vadd.f32 -2.0357144, %v3293_v1  ;;  %v3080_v11 = vcvt.s32.f32 %v2864_v40  ;;  %v2651_v61 = vunpack.c.0.s8 %v6286_v31  ;;  %v3295_v47 = vmul.f32 0.017429193, %v3079_v55 }
 0x1bf   : > { %v4959_v63 = vpack.c.bf16 %v3508_v15, %v3507_v0  ;;  %v2866_v49 = vand.u32 255, %v2650_v13  ;;  %v3081_v42 = vcvt.s32.f32 %v2865_v51  ;;  %v3510_v10 = vadd.f32 -2.0357144, %v3294_v39 }
 0x1c0   : > { %v3296_v14 = vmul.f32 0.017429193, %v3080_v11  ;;  %v2652_v5 = vunpack.c.0.s8 %v6290_v9  ;;  %v2867_v35 = vand.u32 255, %v2651_v61  ;;  %v3511_v59 = vadd.f32 -1.8044444, %v3295_v47 }
 0x1c1   : > { %4350 = vst [vmem:[%s6200_s17 + $0xa8] sm:$0xff] %v4959_v63  ;;  %v3082_v45 = vcvt.s32.f32 %v2866_v49  ;;  %v3297_v8 = vmul.f32 0.017124753, %v3081_v42  ;;  %v2653_v30 = vunpack.c.0.s8 %v6295_v43  ;;  %v4960_v60 = vpack.c.bf16 %v3510_v10, %v3509_v53 }
 0x1c2   : > { %v3512_v58 = vadd.f32 -1.8044444, %v3296_v14  ;;  %v2868_v36 = vand.u32 255, %v2652_v5  ;;  %v3083_v48 = vcvt.s32.f32 %v2867_v35  ;;  %v2654_v19 = vunpack.c.0.s8 %v6299_v2 }
 0x1c3   : > { %v3298_v26 = vmul.f32 0.017124753, %v3082_v45  ;;  %v3513_v57 = vadd.f32 -2.117904, %v3297_v8  ;;  %v2869_v33 = vand.u32 255, %v2653_v30  ;;  %4351 = vst [vmem:[%s6200_s17 + $0xb0] sm:$0xff] %v4960_v60  ;;  %v2655_v4 = vunpack.c.1.s8 %v6275_v16 }
 0x1c4   : > { %v4961_v50 = vpack.c.bf16 %v3512_v58, %v3511_v59  ;;  %v3084_v37 = vcvt.s32.f32 %v2868_v36  ;;  %v3299_v56 = vmul.f32 0.017507004, %v3083_v48  ;;  %v2870_v21 = vand.u32 255, %v2654_v19 }
 0x1c5   : > { %v3514_v3 = vadd.f32 -2.117904, %v3298_v26  ;;  %v3085_v46 = vcvt.s32.f32 %v2869_v33  ;;  %v2656_v32 = vunpack.c.1.s8 %v6281_v17  ;;  %v2871_v24 = vand.u32 255, %v2655_v4 }
 0x1c6   : > { %4352 = vst [vmem:[%s6200_s17 + $0xb8] sm:$0xff] %v4961_v50  ;;  %v3300_v41 = vmul.f32 0.017507004, %v3084_v37  ;;  %v3515_v34 = vadd.f32 -2.0357144, %v3299_v56  ;;  %v2657_v20 = vunpack.c.1.s8 %v6286_v31  ;;  %v3086_v28 = vcvt.s32.f32 %v2870_v21 }
 0x1c7   : > { %v4962_v38 = vpack.c.bf16 %v3514_v3, %v3513_v57  ;;  %v3301_v12 = vmul.f32 0.017429193, %v3085_v46  ;;  %v2872_v54 = vand.u32 255, %v2656_v32  ;;  %v3087_v52 = vcvt.s32.f32 %v2871_v24 }
 0x1c8   : > { %v3516_v7 = vadd.f32 -2.0357144, %v3300_v41  ;;  %v2658_v62 = vunpack.c.1.s8 %v6290_v9  ;;  %v2873_v27 = vand.u32 255, %v2657_v20  ;;  %v3302_v6 = vmul.f32 0.017429193, %v3086_v28 }
 0x1c9   : > { %4353 = vst [vmem:[%s6200_s17 + $0xc0] sm:$0xff] %v4962_v38  ;;  %v3517_v44 = vadd.f32 -1.8044444, %v3301_v12  ;;  %v3088_v25 = vcvt.s32.f32 %v2872_v54  ;;  %v2659_v0 = vunpack.c.1.s8 %v6295_v43  ;;  %v3303_v29 = vmul.f32 0.017124753, %v3087_v52 }
 0x1ca   : > { %v4963_v18 = vpack.c.bf16 %v3516_v7, %v3515_v34  ;;  %v2874_v23 = vand.u32 255, %v2658_v62  ;;  %v3089_v22 = vcvt.s32.f32 %v2873_v27  ;;  %v3518_v1 = vadd.f32 -1.8044444, %v3302_v6 }
 0x1cb   : > { %v3304_v40 = vmul.f32 0.017124753, %v3088_v25  ;;  %v2660_v15 = vunpack.c.1.s8 %v6299_v2  ;;  %v2875_v55 = vand.u32 255, %v2659_v0  ;;  %v3519_v13 = vadd.f32 -2.117904, %v3303_v29 }
 0x1cc   : > { %4354 = vst [vmem:[%s6200_s17 + $0xc8] sm:$0xff] %v4963_v18  ;;  %v3090_v51 = vcvt.s32.f32 %v2874_v23  ;;  %v3305_v39 = vmul.f32 0.017507004, %v3089_v22  ;;  %v2661_v53 = vunpack.c.2.s8 %v6275_v16  ;;  %v4964_v11 = vpack.c.bf16 %v3518_v1, %v3517_v44 }
 0x1cd   : > { %v3520_v61 = vadd.f32 -2.117904, %v3304_v40  ;;  %v2876_v63 = vand.u32 255, %v2660_v15  ;;  %v3091_v47 = vcvt.s32.f32 %v2875_v55  ;;  %v2662_v10 = vunpack.c.2.s8 %v6281_v17 }
 0x1ce   : > { %v3306_v49 = vmul.f32 0.017507004, %v3090_v51  ;;  %v3521_v42 = vadd.f32 -2.0357144, %v3305_v39  ;;  %v2877_v14 = vand.u32 255, %v2661_v53  ;;  %4355 = vst [vmem:[%s6200_s17 + $0xd0] sm:$0xff] %v4964_v11  ;;  %v2663_v45 = vunpack.c.2.s8 %v6286_v31 }
 0x1cf   : > { %v4965_v5 = vpack.c.bf16 %v3520_v61, %v3519_v13  ;;  %v3092_v35 = vcvt.s32.f32 %v2876_v63  ;;  %v3307_v59 = vmul.f32 0.017429193, %v3091_v47  ;;  %v2878_v30 = vand.u32 255, %v2662_v10  ;;  %v6335_v11 = vld [vmem:[%s5507_s4 + $0x98] sm:$0xff] }
 0x1d0   : > { %v3522_v8 = vadd.f32 -2.0357144, %v3306_v49  ;;  %v3093_v60 = vcvt.s32.f32 %v2877_v14  ;;  %v2664_v58 = vunpack.c.2.s8 %v6290_v9  ;;  %v2879_v26 = vand.u32 255, %v2663_v45  ;;  %v6340_v49 = vld [vmem:[%s5507_s4 + $0xa0] sm:$0xff]  ;;  %v6344_v45 = vld [vmem:[%s5507_s4 + $0xa8] sm:$0xff] }
 0x1d1   : > { %4356 = vst [vmem:[%s6200_s17 + $0xd8] sm:$0xff] %v4965_v5  ;;  %v3308_v36 = vmul.f32 0.017429193, %v3092_v35  ;;  %v3523_v48 = vadd.f32 -1.8044444, %v3307_v59  ;;  %v2665_v57 = vunpack.c.2.s8 %v6295_v43  ;;  %v3094_v33 = vcvt.s32.f32 %v2878_v30 }
 0x1d2   : > { %v4966_v19 = vpack.c.bf16 %v3522_v8, %v3521_v42  ;;  %v3309_v50 = vmul.f32 0.017124753, %v3093_v60  ;;  %v2880_v37 = vand.u32 255, %v2664_v58  ;;  %v3095_v4 = vcvt.s32.f32 %v2879_v26 }
 0x1d3   : > { %v3524_v56 = vadd.f32 -1.8044444, %v3308_v36  ;;  %v2666_v3 = vunpack.c.2.s8 %v6299_v2  ;;  %v2881_v21 = vand.u32 255, %v2665_v57  ;;  %v3310_v46 = vmul.f32 0.017124753, %v3094_v33  ;;  %v6349_v36 = vld [vmem:[%s5507_s4 + $0xb0] sm:$0xff] }
 0x1d4   : > { %4357 = vst [vmem:[%s6200_s17 + $0xe0] sm:$0xff] %v4966_v19  ;;  %v3525_v32 = vadd.f32 -2.117904, %v3309_v50  ;;  %v3096_v41 = vcvt.s32.f32 %v2880_v37  ;;  %v2667_v34 = vunpack.c.3.s8 %v6275_v16  ;;  %v3311_v20 = vmul.f32 0.017507004, %v3095_v4  ;;  %v6353_v4 = vld [vmem:[%s5507_s4 + $0xb8] sm:$0xff] }
 0x1d5   : > { %v4967_v24 = vpack.c.bf16 %v3524_v56, %v3523_v48  ;;  %v2882_v38 = vand.u32 255, %v2666_v3  ;;  %v3097_v28 = vcvt.s32.f32 %v2881_v21  ;;  %v3526_v12 = vadd.f32 -2.117904, %v3310_v46 }
 0x1d6   : > { %v3312_v54 = vmul.f32 0.017507004, %v3096_v41  ;;  %v2668_v7 = vunpack.c.3.s8 %v6281_v17  ;;  %v2883_v52 = vand.u32 255, %v2667_v34  ;;  %v3527_v62 = vadd.f32 -2.0357144, %v3311_v20  ;;  %v6329_v17 = vld [vmem:[%s5507_s4 + $0x90] sm:$0xff] }
 0x1d7   : > { %4358 = vst [vmem:[%s6200_s17 + $0xe8] sm:$0xff] %v4967_v24  ;;  %v3098_v27 = vcvt.s32.f32 %v2882_v38  ;;  %v3313_v6 = vmul.f32 0.017429193, %v3097_v28  ;;  %v2669_v44 = vunpack.c.3.s8 %v6286_v31  ;;  %v4968_v25 = vpack.c.bf16 %v3526_v12, %v3525_v32 }
 0x1d8   : > { %v3528_v0 = vadd.f32 -2.0357144, %v3312_v54  ;;  %v2884_v16 = vand.u32 255, %v2668_v7  ;;  %v3099_v18 = vcvt.s32.f32 %v2883_v52  ;;  %v2670_v22 = vunpack.c.3.s8 %v6290_v9 }
 0x1d9   : > { %v3314_v29 = vmul.f32 0.017429193, %v3098_v27  ;;  %v3529_v23 = vadd.f32 -1.8044444, %v3313_v6  ;;  %v2885_v1 = vand.u32 255, %v2669_v44  ;;  %4359 = vst [vmem:[%s6200_s17 + $0xf0] sm:$0xff] %v4968_v25  ;;  %v2671_v31 = vunpack.c.3.s8 %v6295_v43 }
 0x1da   : > { %v4969_v40 = vpack.c.bf16 %v3528_v0, %v3527_v62  ;;  %v3100_v15 = vcvt.s32.f32 %v2884_v16  ;;  %v3315_v55 = vmul.f32 0.017124753, %v3099_v18  ;;  %v2886_v51 = vand.u32 255, %v2670_v22 }
 0x1db   : > { %v3530_v13 = vadd.f32 -1.8044444, %v3314_v29  ;;  %v3101_v39 = vcvt.s32.f32 %v2885_v1  ;;  %v2672_v53 = vunpack.c.3.s8 %v6299_v2  ;;  %v2887_v63 = vand.u32 255, %v2671_v31 }
 0x1dc   : > { %4360 = vst [vmem:[%s6200_s17 + $0xf8] sm:$0xff] %v4969_v40  ;;  %v3316_v9 = vmul.f32 0.017124753, %v3100_v15  ;;  %v3531_v61 = vadd.f32 -2.117904, %v3315_v55  ;;  %v2673_v47 = vunpack.c.0.s8 %v6329_v17  ;;  %v3102_v43 = vcvt.s32.f32 %v2886_v51 }
 0x1dd   : > { %v4970_v42 = vpack.c.bf16 %v3530_v13, %v3529_v23  ;;  %v3317_v10 = vmul.f32 0.017507004, %v3101_v39  ;;  %v2888_v14 = vand.u32 255, %v2672_v53  ;;  %v3103_v35 = vcvt.s32.f32 %v2887_v63 }
 0x1de   : > { %v3532_v5 = vadd.f32 -2.117904, %v3316_v9  ;;  %v2674_v2 = vunpack.c.0.s8 %v6335_v11  ;;  %v2889_v59 = vand.u32 255, %v2673_v47  ;;  %v3318_v8 = vmul.f32 0.017507004, %v3102_v43 }
 0x1df   : > { %4361 = vst [vmem:[%s6200_s17 + $0x100] sm:$0xff] %v4970_v42  ;;  %v3533_v30 = vadd.f32 -2.0357144, %v3317_v10  ;;  %v3104_v60 = vcvt.s32.f32 %v2888_v14  ;;  %v2675_v58 = vunpack.c.0.s8 %v6340_v49  ;;  %v3319_v26 = vmul.f32 0.017429193, %v3103_v35 }
 0x1e0   : > { %v4971_v48 = vpack.c.bf16 %v3532_v5, %v3531_v61  ;;  %v2890_v57 = vand.u32 255, %v2674_v2  ;;  %v3105_v19 = vcvt.s32.f32 %v2889_v59  ;;  %v3534_v33 = vadd.f32 -2.0357144, %v3318_v8 }
 0x1e1   : > { %v3320_v50 = vmul.f32 0.017429193, %v3104_v60  ;;  %v2676_v37 = vunpack.c.0.s8 %v6344_v45  ;;  %v2891_v56 = vand.u32 255, %v2675_v58  ;;  %v3535_v3 = vadd.f32 -1.8044444, %v3319_v26 }
 0x1e2   : > { %4362 = vst [vmem:[%s6200_s17 + $0x108] sm:$0xff] %v4971_v48  ;;  %v3106_v21 = vcvt.s32.f32 %v2890_v57  ;;  %v3321_v46 = vmul.f32 0.017124753, %v3105_v19  ;;  %v2677_v32 = vunpack.c.0.s8 %v6349_v36  ;;  %v4972_v41 = vpack.c.bf16 %v3534_v33, %v3533_v30 }
 0x1e3   : > { %v3536_v34 = vadd.f32 -1.8044444, %v3320_v50  ;;  %v2892_v24 = vand.u32 255, %v2676_v37  ;;  %v3107_v20 = vcvt.s32.f32 %v2891_v56  ;;  %v2678_v12 = vunpack.c.0.s8 %v6353_v4 }
 0x1e4   : > { %v3322_v38 = vmul.f32 0.017124753, %v3106_v21  ;;  %v3537_v28 = vadd.f32 -2.117904, %v3321_v46  ;;  %v2893_v54 = vand.u32 255, %v2677_v32  ;;  %4363 = vst [vmem:[%s6200_s17 + $0x110] sm:$0xff] %v4972_v41  ;;  %v2679_v27 = vunpack.c.1.s8 %v6329_v17 }
 0x1e5   : > { %v4973_v7 = vpack.c.bf16 %v3536_v34, %v3535_v3  ;;  %v3108_v52 = vcvt.s32.f32 %v2892_v24  ;;  %v3323_v62 = vmul.f32 0.017507004, %v3107_v20  ;;  %v2894_v44 = vand.u32 255, %v2678_v12 }
 0x1e6   : > { %v3538_v6 = vadd.f32 -2.117904, %v3322_v38  ;;  %v3109_v25 = vcvt.s32.f32 %v2893_v54  ;;  %v2680_v0 = vunpack.c.1.s8 %v6335_v11  ;;  %v2895_v29 = vand.u32 255, %v2679_v27 }
 0x1e7   : > { %4364 = vst [vmem:[%s6200_s17 + $0x118] sm:$0xff] %v4973_v7  ;;  %v3324_v16 = vmul.f32 0.017507004, %v3108_v52  ;;  %v3539_v18 = vadd.f32 -2.0357144, %v3323_v62  ;;  %v2681_v23 = vunpack.c.1.s8 %v6340_v49  ;;  %v3110_v1 = vcvt.s32.f32 %v2894_v44 }
 0x1e8   : > { %v4974_v22 = vpack.c.bf16 %v3538_v6, %v3537_v28  ;;  %v3325_v40 = vmul.f32 0.017429193, %v3109_v25  ;;  %v2896_v15 = vand.u32 255, %v2680_v0  ;;  %v3111_v31 = vcvt.s32.f32 %v2895_v29 }
 0x1e9   : > { %v3540_v55 = vadd.f32 -2.0357144, %v3324_v16  ;;  %v2682_v13 = vunpack.c.1.s8 %v6344_v45  ;;  %v2897_v51 = vand.u32 255, %v2681_v23  ;;  %v3326_v39 = vmul.f32 0.017429193, %v3110_v1 }
 0x1ea   : > { %4365 = vst [vmem:[%s6200_s17 + $0x120] sm:$0xff] %v4974_v22  ;;  %v3541_v53 = vadd.f32 -1.8044444, %v3325_v40  ;;  %v3112_v9 = vcvt.s32.f32 %v2896_v15  ;;  %v2683_v61 = vunpack.c.1.s8 %v6349_v36  ;;  %v3327_v47 = vmul.f32 0.017124753, %v3111_v31 }
 0x1eb   : > { %v4975_v63 = vpack.c.bf16 %v3540_v55, %v3539_v18  ;;  %v2898_v42 = vand.u32 255, %v2682_v13  ;;  %v3113_v43 = vcvt.s32.f32 %v2897_v51  ;;  %v3542_v10 = vadd.f32 -1.8044444, %v3326_v39 }
 0x1ec   : > { %v3328_v14 = vmul.f32 0.017124753, %v3112_v9  ;;  %v2684_v5 = vunpack.c.1.s8 %v6353_v4  ;;  %v2899_v35 = vand.u32 255, %v2683_v61  ;;  %v3543_v2 = vadd.f32 -2.117904, %v3327_v47 }
 0x1ed   : > { %4366 = vst [vmem:[%s6200_s17 + $0x128] sm:$0xff] %v4975_v63  ;;  %v3114_v59 = vcvt.s32.f32 %v2898_v42  ;;  %v3329_v8 = vmul.f32 0.017507004, %v3113_v43  ;;  %v2685_v30 = vunpack.c.2.s8 %v6329_v17  ;;  %v4976_v60 = vpack.c.bf16 %v3542_v10, %v3541_v53 }
 0x1ee   : > { %v3544_v58 = vadd.f32 -2.117904, %v3328_v14  ;;  %v2900_v48 = vand.u32 255, %v2684_v5  ;;  %v3115_v26 = vcvt.s32.f32 %v2899_v35  ;;  %v2686_v33 = vunpack.c.2.s8 %v6335_v11 }
 0x1ef   : > { %v3330_v57 = vmul.f32 0.017507004, %v3114_v59  ;;  %v3545_v19 = vadd.f32 -2.0357144, %v3329_v8  ;;  %v2901_v50 = vand.u32 255, %v2685_v30  ;;  %4367 = vst [vmem:[%s6200_s17 + $0x130] sm:$0xff] %v4976_v60  ;;  %v2687_v21 = vunpack.c.2.s8 %v6340_v49 }
 0x1f0   : > { %v4977_v37 = vpack.c.bf16 %v3544_v58, %v3543_v2  ;;  %v3116_v56 = vcvt.s32.f32 %v2900_v48  ;;  %v3331_v3 = vmul.f32 0.017429193, %v3115_v26  ;;  %v2902_v32 = vand.u32 255, %v2686_v33  ;;  %v6389_v60 = vld [vmem:[%s5507_s4 + $0xc8] sm:$0xff] }
 0x1f1   : > { %v3546_v46 = vadd.f32 -2.0357144, %v3330_v57  ;;  %v3117_v41 = vcvt.s32.f32 %v2901_v50  ;;  %v2688_v34 = vunpack.c.2.s8 %v6344_v45  ;;  %v2903_v38 = vand.u32 255, %v2687_v21  ;;  %v6394_v57 = vld [vmem:[%s5507_s4 + $0xd0] sm:$0xff]  ;;  %v6398_v21 = vld [vmem:[%s5507_s4 + $0xd8] sm:$0xff] }
 0x1f2   : > { %4368 = vst [vmem:[%s6200_s17 + $0x138] sm:$0xff] %v4977_v37  ;;  %v3332_v24 = vmul.f32 0.017429193, %v3116_v56  ;;  %v3547_v20 = vadd.f32 -1.8044444, %v3331_v3  ;;  %v2689_v28 = vunpack.c.2.s8 %v6349_v36  ;;  %v3118_v54 = vcvt.s32.f32 %v2902_v32 }
 0x1f3   : > { %v4978_v12 = vpack.c.bf16 %v3546_v46, %v3545_v19  ;;  %v3333_v7 = vmul.f32 0.017124753, %v3117_v41  ;;  %v2904_v52 = vand.u32 255, %v2688_v34  ;;  %v3119_v27 = vcvt.s32.f32 %v2903_v38 }
 0x1f4   : > { %v3548_v62 = vadd.f32 -1.8044444, %v3332_v24  ;;  %v2690_v6 = vunpack.c.2.s8 %v6353_v4  ;;  %v2905_v44 = vand.u32 255, %v2689_v28  ;;  %v3334_v25 = vmul.f32 0.017124753, %v3118_v54  ;;  %v6403_v24 = vld [vmem:[%s5507_s4 + $0xe0] sm:$0xff] }
 0x1f5   : > { %4369 = vst [vmem:[%s6200_s17 + $0x140] sm:$0xff] %v4978_v12  ;;  %v3549_v0 = vadd.f32 -2.117904, %v3333_v7  ;;  %v3120_v16 = vcvt.s32.f32 %v2904_v52  ;;  %v2691_v18 = vunpack.c.3.s8 %v6329_v17  ;;  %v3335_v23 = vmul.f32 0.017507004, %v3119_v27  ;;  %v6407_v27 = vld [vmem:[%s5507_s4 + $0xe8] sm:$0xff] }
 0x1f6   : > { %v4979_v29 = vpack.c.bf16 %v3548_v62, %v3547_v20  ;;  %v2906_v22 = vand.u32 255, %v2690_v6  ;;  %v3121_v1 = vcvt.s32.f32 %v2905_v44  ;;  %v3550_v40 = vadd.f32 -2.117904, %v3334_v25 }
 0x1f7   : > { %v3336_v15 = vmul.f32 0.017507004, %v3120_v16  ;;  %v2692_v55 = vunpack.c.3.s8 %v6335_v11  ;;  %v2907_v31 = vand.u32 255, %v2691_v18  ;;  %v3551_v13 = vadd.f32 -2.0357144, %v3335_v23  ;;  %v6383_v11 = vld [vmem:[%s5507_s4 + $0xc0] sm:$0xff] }
 0x1f8   : > { %4370 = vst [vmem:[%s6200_s17 + $0x148] sm:$0xff] %v4979_v29  ;;  %v3122_v51 = vcvt.s32.f32 %v2906_v22  ;;  %v3337_v39 = vmul.f32 0.017429193, %v3121_v1  ;;  %v2693_v53 = vunpack.c.3.s8 %v6340_v49  ;;  %v4980_v9 = vpack.c.bf16 %v3550_v40, %v3549_v0 }
 0x1f9   : > { %v3552_v61 = vadd.f32 -2.0357144, %v3336_v15  ;;  %v2908_v17 = vand.u32 255, %v2692_v55  ;;  %v3123_v63 = vcvt.s32.f32 %v2907_v31  ;;  %v2694_v43 = vunpack.c.3.s8 %v6344_v45 }
 0x1fa   : > { %v3338_v47 = vmul.f32 0.017429193, %v3122_v51  ;;  %v3553_v42 = vadd.f32 -1.8044444, %v3337_v39  ;;  %v2909_v10 = vand.u32 255, %v2693_v53  ;;  %4371 = vst [vmem:[%s6200_s17 + $0x150] sm:$0xff] %v4980_v9  ;;  %v2695_v49 = vunpack.c.3.s8 %v6349_v36 }
 0x1fb   : > { %v4981_v14 = vpack.c.bf16 %v3552_v61, %v3551_v13  ;;  %v3124_v5 = vcvt.s32.f32 %v2908_v17  ;;  %v3339_v35 = vmul.f32 0.017124753, %v3123_v63  ;;  %v2910_v59 = vand.u32 255, %v2694_v43 }
 0x1fc   : > { %v3554_v2 = vadd.f32 -1.8044444, %v3338_v47  ;;  %v3125_v8 = vcvt.s32.f32 %v2909_v10  ;;  %v2696_v30 = vunpack.c.3.s8 %v6353_v4  ;;  %v2911_v48 = vand.u32 255, %v2695_v49 }
 0x1fd   : > { %4372 = vst [vmem:[%s6200_s17 + $0x158] sm:$0xff] %v4981_v14  ;;  %v3340_v45 = vmul.f32 0.017124753, %v3124_v5  ;;  %v3555_v58 = vadd.f32 -2.117904, %v3339_v35  ;;  %v2697_v26 = vunpack.c.0.s8 %v6383_v11  ;;  %v3126_v36 = vcvt.s32.f32 %v2910_v59 }
 0x1fe   : > { %v4982_v19 = vpack.c.bf16 %v3554_v2, %v3553_v42  ;;  %v3341_v33 = vmul.f32 0.017507004, %v3125_v8  ;;  %v2912_v50 = vand.u32 255, %v2696_v30  ;;  %v3127_v56 = vcvt.s32.f32 %v2911_v48 }
 0x1ff   : > { %v3556_v37 = vadd.f32 -2.117904, %v3340_v45  ;;  %v2698_v4 = vunpack.c.0.s8 %v6389_v60  ;;  %v2913_v3 = vand.u32 255, %v2697_v26  ;;  %v3342_v46 = vmul.f32 0.017507004, %v3126_v36 }
 0x200   : > { %4373 = vst [vmem:[%s6200_s17 + $0x160] sm:$0xff] %v4982_v19  ;;  %v3557_v32 = vadd.f32 -2.0357144, %v3341_v33  ;;  %v3128_v41 = vcvt.s32.f32 %v2912_v50  ;;  %v2699_v34 = vunpack.c.0.s8 %v6394_v57  ;;  %v3343_v38 = vmul.f32 0.017429193, %v3127_v56 }
 0x201   : > { %v4983_v20 = vpack.c.bf16 %v3556_v37, %v3555_v58  ;;  %v2914_v28 = vand.u32 255, %v2698_v4  ;;  %v3129_v12 = vcvt.s32.f32 %v2913_v3  ;;  %v3558_v54 = vadd.f32 -2.0357144, %v3342_v46 }
 0x202   : > { %v3344_v7 = vmul.f32 0.017429193, %v3128_v41  ;;  %v2700_v52 = vunpack.c.0.s8 %v6398_v21  ;;  %v2915_v62 = vand.u32 255, %v2699_v34  ;;  %v3559_v6 = vadd.f32 -1.8044444, %v3343_v38 }
 0x203   : > { %4374 = vst [vmem:[%s6200_s17 + $0x168] sm:$0xff] %v4983_v20  ;;  %v3130_v44 = vcvt.s32.f32 %v2914_v28  ;;  %v3345_v25 = vmul.f32 0.017124753, %v3129_v12  ;;  %v2701_v0 = vunpack.c.0.s8 %v6403_v24  ;;  %v4984_v16 = vpack.c.bf16 %v3558_v54, %v3557_v32 }
 0x204   : > { %v3560_v18 = vadd.f32 -1.8044444, %v3344_v7  ;;  %v2916_v29 = vand.u32 255, %v2700_v52  ;;  %v3131_v23 = vcvt.s32.f32 %v2915_v62  ;;  %v2702_v40 = vunpack.c.0.s8 %v6407_v27 }
 0x205   : > { %v3346_v22 = vmul.f32 0.017124753, %v3130_v44  ;;  %v3561_v1 = vadd.f32 -2.117904, %v3345_v25  ;;  %v2917_v15 = vand.u32 255, %v2701_v0  ;;  %4375 = vst [vmem:[%s6200_s17 + $0x170] sm:$0xff] %v4984_v16  ;;  %v2703_v51 = vunpack.c.1.s8 %v6383_v11 }
 0x206   : > { %v4985_v55 = vpack.c.bf16 %v3560_v18, %v3559_v6  ;;  %v3132_v31 = vcvt.s32.f32 %v2916_v29  ;;  %v3347_v13 = vmul.f32 0.017507004, %v3131_v23  ;;  %v2918_v53 = vand.u32 255, %v2702_v40 }
 0x207   : > { %v3562_v39 = vadd.f32 -2.117904, %v3346_v22  ;;  %v3133_v9 = vcvt.s32.f32 %v2917_v15  ;;  %v2704_v61 = vunpack.c.1.s8 %v6389_v60  ;;  %v2919_v47 = vand.u32 255, %v2703_v51 }
 0x208   : > { %4376 = vst [vmem:[%s6200_s17 + $0x178] sm:$0xff] %v4985_v55  ;;  %v3348_v17 = vmul.f32 0.017507004, %v3132_v31  ;;  %v3563_v63 = vadd.f32 -2.0357144, %v3347_v13  ;;  %v2705_v42 = vunpack.c.1.s8 %v6394_v57  ;;  %v3134_v10 = vcvt.s32.f32 %v2918_v53 }
 0x209   : > { %v4986_v43 = vpack.c.bf16 %v3562_v39, %v3561_v1  ;;  %v3349_v14 = vmul.f32 0.017429193, %v3133_v9  ;;  %v2920_v5 = vand.u32 255, %v2704_v61  ;;  %v3135_v49 = vcvt.s32.f32 %v2919_v47 }
 0x20a   : > { %v3564_v35 = vadd.f32 -2.0357144, %v3348_v17  ;;  %v2706_v2 = vunpack.c.1.s8 %v6398_v21  ;;  %v2921_v59 = vand.u32 255, %v2705_v42  ;;  %v3350_v8 = vmul.f32 0.017429193, %v3134_v10 }
 0x20b   : > { %4377 = vst [vmem:[%s6200_s17 + $0x180] sm:$0xff] %v4986_v43  ;;  %v3565_v30 = vadd.f32 -1.8044444, %v3349_v14  ;;  %v3136_v45 = vcvt.s32.f32 %v2920_v5  ;;  %v2707_v58 = vunpack.c.1.s8 %v6403_v24  ;;  %v3351_v26 = vmul.f32 0.017124753, %v3135_v49 }
 0x20c   : > { %v4987_v48 = vpack.c.bf16 %v3564_v35, %v3563_v63  ;;  %v2922_v19 = vand.u32 255, %v2706_v2  ;;  %v3137_v36 = vcvt.s32.f32 %v2921_v59  ;;  %v3566_v33 = vadd.f32 -1.8044444, %v3350_v8 }
 0x20d   : > { %v3352_v50 = vmul.f32 0.017124753, %v3136_v45  ;;  %v2708_v37 = vunpack.c.1.s8 %v6407_v27  ;;  %v2923_v56 = vand.u32 255, %v2707_v58  ;;  %v3567_v4 = vadd.f32 -2.117904, %v3351_v26 }
 0x20e   : > { %4378 = vst [vmem:[%s6200_s17 + $0x188] sm:$0xff] %v4987_v48  ;;  %v3138_v3 = vcvt.s32.f32 %v2922_v19  ;;  %v3353_v46 = vmul.f32 0.017507004, %v3137_v36  ;;  %v2709_v32 = vunpack.c.2.s8 %v6383_v11  ;;  %v4988_v41 = vpack.c.bf16 %v3566_v33, %v3565_v30 }
 0x20f   : > { %v3568_v34 = vadd.f32 -2.117904, %v3352_v50  ;;  %v2924_v20 = vand.u32 255, %v2708_v37  ;;  %v3139_v38 = vcvt.s32.f32 %v2923_v56  ;;  %v2710_v54 = vunpack.c.2.s8 %v6389_v60 }
 0x210   : > { %v3354_v28 = vmul.f32 0.017507004, %v3138_v3  ;;  %v3569_v12 = vadd.f32 -2.0357144, %v3353_v46  ;;  %v2925_v7 = vand.u32 255, %v2709_v32  ;;  %4379 = vst [vmem:[%s6200_s17 + $0x190] sm:$0xff] %v4988_v41  ;;  %v2711_v44 = vunpack.c.2.s8 %v6394_v57 }
 0x211   : > { %v4989_v52 = vpack.c.bf16 %v3568_v34, %v3567_v4  ;;  %v3140_v62 = vcvt.s32.f32 %v2924_v20  ;;  %v3355_v6 = vmul.f32 0.017429193, %v3139_v38  ;;  %v2926_v0 = vand.u32 255, %v2710_v54  ;;  %v6443_v41 = vld [vmem:[%s5507_s4 + $0xf8] sm:$0xff] }
 0x212   : > { %v3570_v25 = vadd.f32 -2.0357144, %v3354_v28  ;;  %v3141_v16 = vcvt.s32.f32 %v2925_v7  ;;  %v2712_v18 = vunpack.c.2.s8 %v6398_v21  ;;  %v2927_v22 = vand.u32 255, %v2711_v44  ;;  %v6448_v28 = vld [vmem:[%s5507_s4 + $0x100] sm:$0xff]  ;;  %v6452_v44 = vld [vmem:[%s5507_s4 + $0x108] sm:$0xff] }
 0x213   : > { %4380 = vst [vmem:[%s6200_s17 + $0x198] sm:$0xff] %v4989_v52  ;;  %v3356_v29 = vmul.f32 0.017429193, %v3140_v62  ;;  %v3571_v23 = vadd.f32 -1.8044444, %v3355_v6  ;;  %v2713_v1 = vunpack.c.2.s8 %v6403_v24  ;;  %v3142_v15 = vcvt.s32.f32 %v2926_v0 }
 0x214   : > { %v4990_v40 = vpack.c.bf16 %v3570_v25, %v3569_v12  ;;  %v3357_v55 = vmul.f32 0.017124753, %v3141_v16  ;;  %v2928_v31 = vand.u32 255, %v2712_v18  ;;  %v3143_v51 = vcvt.s32.f32 %v2927_v22 }
 0x215   : > { %v3572_v13 = vadd.f32 -1.8044444, %v3356_v29  ;;  %v2714_v39 = vunpack.c.2.s8 %v6407_v27  ;;  %v2929_v53 = vand.u32 255, %v2713_v1  ;;  %v3358_v9 = vmul.f32 0.017124753, %v3142_v15  ;;  %v6457_v29 = vld [vmem:[%s5507_s4 + $0x110] sm:$0xff] }
 0x216   : > { %4381 = vst [vmem:[%s6200_s17 + $0x1a0] sm:$0xff] %v4990_v40  ;;  %v3573_v61 = vadd.f32 -2.117904, %v3357_v55  ;;  %v3144_v17 = vcvt.s32.f32 %v2928_v31  ;;  %v2715_v63 = vunpack.c.3.s8 %v6383_v11  ;;  %v3359_v42 = vmul.f32 0.017507004, %v3143_v51  ;;  %v6461_v51 = vld [vmem:[%s5507_s4 + $0x118] sm:$0xff] }
 0x217   : > { %v4991_v47 = vpack.c.bf16 %v3572_v13, %v3571_v23  ;;  %v2930_v43 = vand.u32 255, %v2714_v39  ;;  %v3145_v10 = vcvt.s32.f32 %v2929_v53  ;;  %v3574_v14 = vadd.f32 -2.117904, %v3358_v9 }
 0x218   : > { %v3360_v5 = vmul.f32 0.017507004, %v3144_v17  ;;  %v2716_v35 = vunpack.c.3.s8 %v6389_v60  ;;  %v2931_v49 = vand.u32 255, %v2715_v63  ;;  %v3575_v2 = vadd.f32 -2.0357144, %v3359_v42  ;;  %v6437_v60 = vld [vmem:[%s5507_s4 + $0xf0] sm:$0xff] }
 0x219   : > { %4382 = vst [vmem:[%s6200_s17 + $0x1a8] sm:$0xff] %v4991_v47  ;;  %v3146_v59 = vcvt.s32.f32 %v2930_v43  ;;  %v3361_v8 = vmul.f32 0.017429193, %v3145_v10  ;;  %v2717_v30 = vunpack.c.3.s8 %v6394_v57  ;;  %v4992_v45 = vpack.c.bf16 %v3574_v14, %v3573_v61 }
 0x21a   : > { %v3576_v58 = vadd.f32 -2.0357144, %v3360_v5  ;;  %v2932_v11 = vand.u32 255, %v2716_v35  ;;  %v3147_v48 = vcvt.s32.f32 %v2931_v49  ;;  %v2718_v36 = vunpack.c.3.s8 %v6398_v21 }
 0x21b   : > { %v3362_v26 = vmul.f32 0.017429193, %v3146_v59  ;;  %v3577_v19 = vadd.f32 -1.8044444, %v3361_v8  ;;  %v2933_v33 = vand.u32 255, %v2717_v30  ;;  %4383 = vst [vmem:[%s6200_s17 + $0x1b0] sm:$0xff] %v4992_v45  ;;  %v2719_v57 = vunpack.c.3.s8 %v6403_v24 }
 0x21c   : > { %v4993_v50 = vpack.c.bf16 %v3576_v58, %v3575_v2  ;;  %v3148_v37 = vcvt.s32.f32 %v2932_v11  ;;  %v3363_v56 = vmul.f32 0.017124753, %v3147_v48  ;;  %v2934_v3 = vand.u32 255, %v2718_v36 }
 0x21d   : > { %v3578_v4 = vadd.f32 -1.8044444, %v3362_v26  ;;  %v3149_v46 = vcvt.s32.f32 %v2933_v33  ;;  %v2720_v32 = vunpack.c.3.s8 %v6407_v27  ;;  %v2935_v20 = vand.u32 255, %v2719_v57 }
 0x21e   : > { %4384 = vst [vmem:[%s6200_s17 + $0x1b8] sm:$0xff] %v4993_v50  ;;  %v3364_v21 = vmul.f32 0.017124753, %v3148_v37  ;;  %v3579_v34 = vadd.f32 -2.117904, %v3363_v56  ;;  %v2721_v38 = vunpack.c.0.s8 %v6437_v60  ;;  %v3150_v24 = vcvt.s32.f32 %v2934_v3 }
 0x21f   : > { %v4994_v12 = vpack.c.bf16 %v3578_v4, %v3577_v19  ;;  %v3365_v54 = vmul.f32 0.017507004, %v3149_v46  ;;  %v2936_v7 = vand.u32 255, %v2720_v32  ;;  %v3151_v62 = vcvt.s32.f32 %v2935_v20 }
 0x220   : > { %v3580_v52 = vadd.f32 -2.117904, %v3364_v21  ;;  %v2722_v27 = vunpack.c.0.s8 %v6443_v41  ;;  %v2937_v6 = vand.u32 255, %v2721_v38  ;;  %v3366_v25 = vmul.f32 0.017507004, %v3150_v24 }
 0x221   : > { %4385 = vst [vmem:[%s6200_s17 + $0x1c0] sm:$0xff] %v4994_v12  ;;  %v3581_v0 = vadd.f32 -2.0357144, %v3365_v54  ;;  %v3152_v16 = vcvt.s32.f32 %v2936_v7  ;;  %v2723_v18 = vunpack.c.0.s8 %v6448_v28  ;;  %v3367_v22 = vmul.f32 0.017429193, %v3151_v62 }
 0x222   : > { %v4995_v23 = vpack.c.bf16 %v3580_v52, %v3579_v34  ;;  %v2938_v1 = vand.u32 255, %v2722_v27  ;;  %v3153_v40 = vcvt.s32.f32 %v2937_v6  ;;  %v3582_v15 = vadd.f32 -2.0357144, %v3366_v25 }
 0x223   : > { %v3368_v55 = vmul.f32 0.017429193, %v3152_v16  ;;  %v2724_v31 = vunpack.c.0.s8 %v6452_v44  ;;  %v2939_v13 = vand.u32 255, %v2723_v18  ;;  %v3583_v39 = vadd.f32 -1.8044444, %v3367_v22 }
 0x224   : > { %4386 = vst [vmem:[%s6200_s17 + $0x1c8] sm:$0xff] %v4995_v23  ;;  %v3154_v53 = vcvt.s32.f32 %v2938_v1  ;;  %v3369_v9 = vmul.f32 0.017124753, %v3153_v40  ;;  %v2725_v61 = vunpack.c.0.s8 %v6457_v29  ;;  %v4996_v17 = vpack.c.bf16 %v3582_v15, %v3581_v0 }
 0x225   : > { %v3584_v63 = vadd.f32 -1.8044444, %v3368_v55  ;;  %v2940_v47 = vand.u32 255, %v2724_v31  ;;  %v3155_v42 = vcvt.s32.f32 %v2939_v13  ;;  %v2726_v14 = vunpack.c.0.s8 %v6461_v51 }
 0x226   : > { %v3370_v43 = vmul.f32 0.017124753, %v3154_v53  ;;  %v3585_v10 = vadd.f32 -2.117904, %v3369_v9  ;;  %v2941_v5 = vand.u32 255, %v2725_v61  ;;  %4387 = vst [vmem:[%s6200_s17 + $0x1d0] sm:$0xff] %v4996_v17  ;;  %v2727_v59 = vunpack.c.1.s8 %v6437_v60 }
 0x227   : > { %v4997_v35 = vpack.c.bf16 %v3584_v63, %v3583_v39  ;;  %v3156_v49 = vcvt.s32.f32 %v2940_v47  ;;  %v3371_v2 = vmul.f32 0.017507004, %v3155_v42  ;;  %v2942_v30 = vand.u32 255, %v2726_v14 }
 0x228   : > { %v3586_v8 = vadd.f32 -2.117904, %v3370_v43  ;;  %v3157_v45 = vcvt.s32.f32 %v2941_v5  ;;  %v2728_v58 = vunpack.c.1.s8 %v6443_v41  ;;  %v2943_v26 = vand.u32 255, %v2727_v59 }
 0x229   : > { %4388 = vst [vmem:[%s6200_s17 + $0x1d8] sm:$0xff] %v4997_v35  ;;  %v3372_v11 = vmul.f32 0.017507004, %v3156_v49  ;;  %v3587_v48 = vadd.f32 -2.0357144, %v3371_v2  ;;  %v2729_v19 = vunpack.c.1.s8 %v6448_v28  ;;  %v3158_v33 = vcvt.s32.f32 %v2942_v30 }
 0x22a   : > { %v4998_v36 = vpack.c.bf16 %v3586_v8, %v3585_v10  ;;  %v3373_v50 = vmul.f32 0.017429193, %v3157_v45  ;;  %v2944_v37 = vand.u32 255, %v2728_v58  ;;  %v3159_v57 = vcvt.s32.f32 %v2943_v26 }
 0x22b   : > { %v3588_v56 = vadd.f32 -2.0357144, %v3372_v11  ;;  %v2730_v4 = vunpack.c.1.s8 %v6452_v44  ;;  %v2945_v3 = vand.u32 255, %v2729_v19  ;;  %v3374_v46 = vmul.f32 0.017429193, %v3158_v33 }
 0x22c   : > { %4389 = vst [vmem:[%s6200_s17 + $0x1e0] sm:$0xff] %v4998_v36  ;;  %v3589_v32 = vadd.f32 -1.8044444, %v3373_v50  ;;  %v3160_v21 = vcvt.s32.f32 %v2944_v37  ;;  %v2731_v34 = vunpack.c.1.s8 %v6457_v29  ;;  %v3375_v38 = vmul.f32 0.017124753, %v3159_v57 }
 0x22d   : > { %v4999_v20 = vpack.c.bf16 %v3588_v56, %v3587_v48  ;;  %v2946_v12 = vand.u32 255, %v2730_v4  ;;  %v3161_v24 = vcvt.s32.f32 %v2945_v3  ;;  %v3590_v54 = vadd.f32 -1.8044444, %v3374_v46 }
 0x22e   : > { %v3376_v7 = vmul.f32 0.017124753, %v3160_v21  ;;  %v2732_v52 = vunpack.c.1.s8 %v6461_v51  ;;  %v2947_v62 = vand.u32 255, %v2731_v34  ;;  %v3591_v27 = vadd.f32 -2.117904, %v3375_v38 }
 0x22f   : > { %4390 = vst [vmem:[%s6200_s17 + $0x1e8] sm:$0xff] %v4999_v20  ;;  %v3162_v6 = vcvt.s32.f32 %v2946_v12  ;;  %v3377_v25 = vmul.f32 0.017507004, %v3161_v24  ;;  %v2733_v0 = vunpack.c.2.s8 %v6437_v60  ;;  %v5000_v16 = vpack.c.bf16 %v3590_v54, %v3589_v32 }
 0x230   : > { %v3592_v18 = vadd.f32 -2.117904, %v3376_v7  ;;  %v2948_v23 = vand.u32 255, %v2732_v52  ;;  %v3163_v22 = vcvt.s32.f32 %v2947_v62 }
 0x231   : > { %5241 = shalt.err (!%p5238_p2)
}
 0x232   : > { %s5242_s27 = scalar_lea.hbm %s6481_s5, 13824  ;;  %s5246_s22 = scalar_lea.hbm %s6747_s2, 27648 }
 0x233   : > { %p5243_p6 = scmp.ne.s32.totalorder %s6481_s5, %s5242_s27  ;;  %p5247_p3 = scmp.lt.s32.totalorder %s6481_s5, %s6747_s2 }
 0x234   : > { %p5248_p5 = scmp.lt.s32.totalorder %s5246_s22, %s5242_s27 }
 0x235   : > { %p5244_p9 = pnand %p5243_p6, %p6846_p11 }
 0x236   : > { %p5249_p1 = por %p5248_p5, %p5247_p3 }
 0x237   : > { %p5245_p12 = pneg %p5244_p9 }
 0x239   : > { %p5250_p13 = pnand %p5249_p1, %p5245_p12 }
 0x23b   : > { %5253 = shalt.err (!%p5250_p13)
}
 0x23c   : > { %s5333_s29 = smov 3456   ;;  %s5334_s9 = smov 216   ;;  %v3378_v1 = vmul.f32 0.017507004, %v3162_v6  ;;  %v3593_v40 = vadd.f32 -2.0357144, %v3377_v25  ;;  %v2734_v15 = vunpack.c.2.s8 %v6443_v41  ;;  %v5001_v31 = vpack.c.bf16 %v3592_v18, %v3591_v27 }
 0x23d   : > { %5058 = dma.vmem_to_hbm [thread:$0]  (%p6846_p11), %s6484_s30, 13824, %s6481_s5, %s4438_s8, %s5333_s29, %s5333_s29, %s5334_s9   ;;  %v2949_v55 = vand.u32 255, %v2733_v0  ;;  %v3164_v13 = vcvt.s32.f32 %v2948_v23  ;;  %v3379_v39 = vmul.f32 0.017429193, %v3163_v22  ;;  %v2735_v53 = vunpack.c.2.s8 %v6448_v28 }
 0x23e   : > { %4391 = vst [vmem:[%s6200_s17 + $0x1f0] sm:$0xff] %v5000_v16  ;;  %v3594_v9 = vadd.f32 -2.0357144, %v3378_v1  ;;  %v2950_v61 = vand.u32 255, %v2734_v15  ;;  %v2736_v63 = vunpack.c.2.s8 %v6452_v44  ;;  %4392 = vst [vmem:[%s6200_s17 + $0x1f8] sm:$0xff] %v5001_v31  ;;  %v2737_v10 = vunpack.c.2.s8 %v6457_v29  ;;  %v6531_v16 = vld [vmem:[%s5507_s4 + $0x128] sm:$0xff]  ;;  %s6698_s8 = scalar_lea.hbm %s6748_s3, %s5052_s19 }
 0x23f   : > { %v3165_v17 = vcvt.s32.f32 %v2949_v55  ;;  %v3380_v47 = vmul.f32 0.017429193, %v3164_v13  ;;  %v3595_v42 = vadd.f32 -1.8044444, %v3379_v39  ;;  %v2951_v43 = vand.u32 255, %v2735_v53  ;;  %v6536_v1 = vld [vmem:[%s5507_s4 + $0x130] sm:$0xff] }
 0x240   : > { %v5002_v14 = vpack.c.bf16 %v3594_v9, %v3593_v40  ;;  %v3166_v5 = vcvt.s32.f32 %v2950_v61  ;;  %v2952_v49 = vand.u32 255, %v2736_v63  ;;  %v2738_v8 = vunpack.c.2.s8 %v6461_v51  ;;  %v6540_v53 = vld [vmem:[%s5507_s4 + $0x138] sm:$0xff]  ;;  %s4443_s11 = scalar_lea.sflag [#allocation9], %s5496_s26  ;;  %s5335_s16 = smov [#allocation8]  }
 0x241   : > { %v3381_v35 = vmul.f32 0.017124753, %v3165_v17  ;;  %v3596_v2 = vadd.f32 -1.8044444, %v3380_v47  ;;  %v3167_v59 = vcvt.s32.f32 %v2951_v43  ;;  %v2953_v30 = vand.u32 255, %v2737_v10  ;;  %v6545_v47 = vld [vmem:[%s5507_s4 + $0x140] sm:$0xff] }
 0x242   : > { %4393 = vst [vmem:[%s6200_s17 + $0x200] sm:$0xff] %v5002_v14  ;;  %v3382_v45 = vmul.f32 0.017124753, %v3166_v5  ;;  %v3168_v11 = vcvt.s32.f32 %v2952_v49  ;;  %v2739_v48 = vunpack.c.3.s8 %v6437_v60  ;;  %v2954_v36 = vand.u32 255, %v2738_v8  ;;  %s5258_s7 = sshll.u32 %s5335_s16, 4  ;;  %s5259_s7 = int_to_ptr.vmem [resolvable:$false] %s5258_s7 }
 0x243   : > { %v3597_v58 = vadd.f32 -2.117904, %v3381_v35  ;;  %v5003_v26 = vpack.c.bf16 %v3596_v2, %v3595_v42  ;;  %v3383_v19 = vmul.f32 0.017507004, %v3167_v59  ;;  %v3169_v33 = vcvt.s32.f32 %v2953_v30  ;;  %v6549_v59 = vld [vmem:[%s5507_s4 + $0x148] sm:$0xff]  ;;  %s5260_s27 = scalar_lea.vmem %s5259_s7, 27648 }
 0x244   : > { %v3598_v50 = vadd.f32 -2.117904, %v3382_v45  ;;  %v3384_v37 = vmul.f32 0.017507004, %v3168_v11  ;;  %v2740_v56 = vunpack.c.3.s8 %v6443_v41  ;;  %v2955_v57 = vand.u32 255, %v2739_v48  ;;  %v6525_v41 = vld [vmem:[%s5507_s4 + $0x120] sm:$0xff] }
 0x245   : > { %4394 = vst [vmem:[%s6200_s17 + $0x208] sm:$0xff] %v5003_v26  ;;  %v3599_v4 = vadd.f32 -2.0357144, %v3383_v19  ;;  %v3170_v3 = vcvt.s32.f32 %v2954_v36  ;;  %v3385_v46 = vmul.f32 0.017429193, %v3169_v33  ;;  %v2741_v32 = vunpack.c.3.s8 %v6448_v28 }
 0x246   : > { %v5004_v21 = vpack.c.bf16 %v3598_v50, %v3597_v58  ;;  %v3600_v34 = vadd.f32 -2.0357144, %v3384_v37  ;;  %v2956_v60 = vand.u32 255, %v2740_v56  ;;  %v3171_v20 = vcvt.s32.f32 %v2955_v57 }
 0x247   : > { %v3386_v38 = vmul.f32 0.017429193, %v3170_v3  ;;  %v3601_v12 = vadd.f32 -1.8044444, %v3385_v46  ;;  %v2742_v24 = vunpack.c.3.s8 %v6452_v44  ;;  %v2957_v54 = vand.u32 255, %v2741_v32 }
 0x248   : > { %4395 = vst [vmem:[%s6200_s17 + $0x210] sm:$0xff] %v5004_v21  ;;  %v5005_v7 = vpack.c.bf16 %v3600_v34, %v3599_v4  ;;  %v3172_v52 = vcvt.s32.f32 %v2956_v60  ;;  %v3387_v62 = vmul.f32 0.017124753, %v3171_v20  ;;  %v2743_v28 = vunpack.c.3.s8 %v6457_v29 }
 0x249   : > { %v3602_v27 = vadd.f32 -1.8044444, %v3386_v38  ;;  %v2958_v6 = vand.u32 255, %v2742_v24  ;;  %v3173_v25 = vcvt.s32.f32 %v2957_v54  ;;  %v2744_v0 = vunpack.c.3.s8 %v6461_v51 }
 0x24a   : > { %4396 = vst [vmem:[%s6200_s17 + $0x218] sm:$0xff] %v5005_v7  ;;  %v3388_v44 = vmul.f32 0.017124753, %v3172_v52  ;;  %v3603_v18 = vadd.f32 -2.117904, %v3387_v62  ;;  %v2959_v23 = vand.u32 255, %v2743_v28  ;;  %v2745_v22 = vunpack.c.0.s8 %v6525_v41 }
 0x24b   : > { %v5006_v40 = vpack.c.bf16 %v3602_v27, %v3601_v12  ;;  %v3174_v29 = vcvt.s32.f32 %v2958_v6  ;;  %v3389_v15 = vmul.f32 0.017507004, %v3173_v25  ;;  %v2960_v55 = vand.u32 255, %v2744_v0 }
 0x24c   : > { %v3604_v31 = vadd.f32 -2.117904, %v3388_v44  ;;  %v3175_v13 = vcvt.s32.f32 %v2959_v23  ;;  %v2746_v51 = vunpack.c.0.s8 %v6531_v16  ;;  %v2961_v39 = vand.u32 255, %v2745_v22 }
 0x24d   : > { %4397 = vst [vmem:[%s6200_s17 + $0x220] sm:$0xff] %v5006_v40  ;;  %v3390_v9 = vmul.f32 0.017507004, %v3174_v29  ;;  %v3605_v61 = vadd.f32 -2.0357144, %v3389_v15  ;;  %v3176_v17 = vcvt.s32.f32 %v2960_v55  ;;  %v2747_v63 = vunpack.c.0.s8 %v6536_v1 }
 0x24e   : > { %v5007_v42 = vpack.c.bf16 %v3604_v31, %v3603_v18  ;;  %v3391_v43 = vmul.f32 0.017429193, %v3175_v13  ;;  %v2962_v10 = vand.u32 255, %v2746_v51  ;;  %v3177_v14 = vcvt.s32.f32 %v2961_v39 }
 0x24f   : > { %v3606_v5 = vadd.f32 -2.0357144, %v3390_v9  ;;  %v3392_v35 = vmul.f32 0.017429193, %v3176_v17  ;;  %v2748_v49 = vunpack.c.0.s8 %v6540_v53  ;;  %v2963_v2 = vand.u32 255, %v2747_v63 }
 0x250   : > { %4398 = vst [vmem:[%s6200_s17 + $0x228] sm:$0xff] %v5007_v42  ;;  %v3607_v8 = vadd.f32 -1.8044444, %v3391_v43  ;;  %v3178_v30 = vcvt.s32.f32 %v2962_v10  ;;  %v3393_v45 = vmul.f32 0.017124753, %v3177_v14  ;;  %v2749_v58 = vunpack.c.0.s8 %v6545_v47 }
 0x251   : > { %v5008_v11 = vpack.c.bf16 %v3606_v5, %v3605_v61  ;;  %v3608_v48 = vadd.f32 -1.8044444, %v3392_v35  ;;  %v2964_v26 = vand.u32 255, %v2748_v49  ;;  %v3179_v19 = vcvt.s32.f32 %v2963_v2 }
 0x252   : > { %v3394_v36 = vmul.f32 0.017124753, %v3178_v30  ;;  %v3609_v33 = vadd.f32 -2.117904, %v3393_v45  ;;  %v2750_v50 = vunpack.c.0.s8 %v6549_v59  ;;  %v2965_v37 = vand.u32 255, %v2749_v58 }
 0x253   : > { %4399 = vst [vmem:[%s6200_s17 + $0x230] sm:$0xff] %v5008_v11  ;;  %v5009_v56 = vpack.c.bf16 %v3608_v48, %v3607_v8  ;;  %v3180_v57 = vcvt.s32.f32 %v2964_v26  ;;  %v3395_v4 = vmul.f32 0.017507004, %v3179_v19  ;;  %v2751_v3 = vunpack.c.1.s8 %v6525_v41 }
 0x254   : > { %v3610_v46 = vadd.f32 -2.117904, %v3394_v36  ;;  %v2966_v32 = vand.u32 255, %v2750_v50  ;;  %v3181_v21 = vcvt.s32.f32 %v2965_v37  ;;  %v2752_v34 = vunpack.c.1.s8 %v6531_v16 }
 0x255   : > { %4400 = vst [vmem:[%s6200_s17 + $0x238] sm:$0xff] %v5009_v56  ;;  %v3396_v60 = vmul.f32 0.017507004, %v3180_v57  ;;  %v3611_v20 = vadd.f32 -2.0357144, %v3395_v4  ;;  %v2967_v38 = vand.u32 255, %v2751_v3  ;;  %v2753_v12 = vunpack.c.1.s8 %v6536_v1 }
 0x256   : > { %v5010_v24 = vpack.c.bf16 %v3610_v46, %v3609_v33  ;;  %v3182_v54 = vcvt.s32.f32 %v2966_v32  ;;  %v3397_v7 = vmul.f32 0.017429193, %v3181_v21  ;;  %v2968_v52 = vand.u32 255, %v2752_v34 }
 0x257   : > { %v3612_v62 = vadd.f32 -2.0357144, %v3396_v60  ;;  %v3183_v28 = vcvt.s32.f32 %v2967_v38  ;;  %v2754_v27 = vunpack.c.1.s8 %v6540_v53  ;;  %v2969_v6 = vand.u32 255, %v2753_v12 }
 0x258   : > { %4401 = vst [vmem:[%s6200_s17 + $0x240] sm:$0xff] %v5010_v24  ;;  %v3398_v25 = vmul.f32 0.017429193, %v3182_v54  ;;  %v3613_v0 = vadd.f32 -1.8044444, %v3397_v7  ;;  %v3184_v44 = vcvt.s32.f32 %v2968_v52  ;;  %v2755_v18 = vunpack.c.1.s8 %v6545_v47 }
 0x259   : > { %v5011_v23 = vpack.c.bf16 %v3612_v62, %v3611_v20  ;;  %v3399_v22 = vmul.f32 0.017124753, %v3183_v28  ;;  %v2970_v40 = vand.u32 255, %v2754_v27  ;;  %v3185_v29 = vcvt.s32.f32 %v2969_v6 }
 0x25a   : > { %v3614_v15 = vadd.f32 -1.8044444, %v3398_v25  ;;  %v3400_v55 = vmul.f32 0.017124753, %v3184_v44  ;;  %v2756_v31 = vunpack.c.1.s8 %v6549_v59  ;;  %v2971_v13 = vand.u32 255, %v2755_v18 }
 0x25b   : > { %4402 = vst [vmem:[%s6200_s17 + $0x248] sm:$0xff] %v5011_v23  ;;  %v3615_v51 = vadd.f32 -2.117904, %v3399_v22  ;;  %v3186_v39 = vcvt.s32.f32 %v2970_v40  ;;  %v3401_v9 = vmul.f32 0.017507004, %v3185_v29  ;;  %v2757_v61 = vunpack.c.2.s8 %v6525_v41 }
 0x25c   : > { %v5012_v17 = vpack.c.bf16 %v3614_v15, %v3613_v0  ;;  %v3616_v63 = vadd.f32 -2.117904, %v3400_v55  ;;  %v2972_v42 = vand.u32 255, %v2756_v31  ;;  %v3187_v43 = vcvt.s32.f32 %v2971_v13 }
 0x25d   : > { %v3402_v10 = vmul.f32 0.017507004, %v3186_v39  ;;  %v3617_v14 = vadd.f32 -2.0357144, %v3401_v9  ;;  %v2758_v5 = vunpack.c.2.s8 %v6531_v16  ;;  %v2973_v35 = vand.u32 255, %v2757_v61 }
 0x25e   : > { %4403 = vst [vmem:[%s6200_s17 + $0x250] sm:$0xff] %v5012_v17  ;;  %v5013_v49 = vpack.c.bf16 %v3616_v63, %v3615_v51  ;;  %v3188_v2 = vcvt.s32.f32 %v2972_v42  ;;  %v3403_v8 = vmul.f32 0.017429193, %v3187_v43  ;;  %v2759_v30 = vunpack.c.2.s8 %v6536_v1  ;;  %v6585_v17 = vld [vmem:[%s5507_s4 + $0x158] sm:$0xff] }
 0x25f   : > { %v3618_v45 = vadd.f32 -2.0357144, %v3402_v10  ;;  %v2974_v58 = vand.u32 255, %v2758_v5  ;;  %v3189_v11 = vcvt.s32.f32 %v2973_v35  ;;  %v2760_v48 = vunpack.c.2.s8 %v6540_v53  ;;  %v6590_v10 = vld [vmem:[%s5507_s4 + $0x160] sm:$0xff] }
 0x260   : > { %4404 = vst [vmem:[%s6200_s17 + $0x258] sm:$0xff] %v5013_v49  ;;  %v3404_v26 = vmul.f32 0.017429193, %v3188_v2  ;;  %v3619_v19 = vadd.f32 -1.8044444, %v3403_v8  ;;  %v2975_v36 = vand.u32 255, %v2759_v30  ;;  %v2761_v33 = vunpack.c.2.s8 %v6545_v47 }
 0x261   : > { %v5014_v50 = vpack.c.bf16 %v3618_v45, %v3617_v14  ;;  %v3190_v37 = vcvt.s32.f32 %v2974_v58  ;;  %v3405_v56 = vmul.f32 0.017124753, %v3189_v11  ;;  %v2976_v57 = vand.u32 255, %v2760_v48  ;;  %v6594_v30 = vld [vmem:[%s5507_s4 + $0x168] sm:$0xff] }
 0x262   : > { %v3620_v4 = vadd.f32 -1.8044444, %v3404_v26  ;;  %v3191_v3 = vcvt.s32.f32 %v2975_v36  ;;  %v2762_v46 = vunpack.c.2.s8 %v6549_v59  ;;  %v2977_v32 = vand.u32 255, %v2761_v33  ;;  %v6599_v26 = vld [vmem:[%s5507_s4 + $0x170] sm:$0xff] }
 0x263   : > { %4405 = vst [vmem:[%s6200_s17 + $0x260] sm:$0xff] %v5014_v50  ;;  %v3406_v21 = vmul.f32 0.017124753, %v3190_v37  ;;  %v3621_v34 = vadd.f32 -2.117904, %v3405_v56  ;;  %v3192_v60 = vcvt.s32.f32 %v2976_v57  ;;  %v2763_v20 = vunpack.c.3.s8 %v6525_v41 }
 0x264   : > { %v5015_v38 = vpack.c.bf16 %v3620_v4, %v3619_v19  ;;  %v3407_v12 = vmul.f32 0.017507004, %v3191_v3  ;;  %v2978_v24 = vand.u32 255, %v2762_v46  ;;  %v3193_v54 = vcvt.s32.f32 %v2977_v32  ;;  %v6603_v3 = vld [vmem:[%s5507_s4 + $0x178] sm:$0xff] }
 0x265   : > { %v3622_v7 = vadd.f32 -2.117904, %v3406_v21  ;;  %v3408_v52 = vmul.f32 0.017507004, %v3192_v60  ;;  %v2764_v62 = vunpack.c.3.s8 %v6531_v16  ;;  %v2979_v28 = vand.u32 255, %v2763_v20  ;;  %v6579_v16 = vld [vmem:[%s5507_s4 + $0x150] sm:$0xff] }
 0x266   : > { %4406 = vst [vmem:[%s6200_s17 + $0x268] sm:$0xff] %v5015_v38  ;;  %v3623_v27 = vadd.f32 -2.0357144, %v3407_v12  ;;  %v3194_v6 = vcvt.s32.f32 %v2978_v24  ;;  %v3409_v25 = vmul.f32 0.017429193, %v3193_v54  ;;  %v2765_v0 = vunpack.c.3.s8 %v6536_v1 }
 0x267   : > { %v5016_v44 = vpack.c.bf16 %v3622_v7, %v3621_v34  ;;  %v3624_v18 = vadd.f32 -2.0357144, %v3408_v52  ;;  %v2980_v41 = vand.u32 255, %v2764_v62  ;;  %v3195_v23 = vcvt.s32.f32 %v2979_v28 }
 0x268   : > { %v3410_v22 = vmul.f32 0.017429193, %v3194_v6  ;;  %v3625_v40 = vadd.f32 -1.8044444, %v3409_v25  ;;  %v2766_v29 = vunpack.c.3.s8 %v6540_v53  ;;  %v2981_v15 = vand.u32 255, %v2765_v0 }
 0x269   : > { %4407 = vst [vmem:[%s6200_s17 + $0x270] sm:$0xff] %v5016_v44  ;;  %v5017_v55 = vpack.c.bf16 %v3624_v18, %v3623_v27  ;;  %v3196_v31 = vcvt.s32.f32 %v2980_v41  ;;  %v3411_v13 = vmul.f32 0.017124753, %v3195_v23  ;;  %v2767_v1 = vunpack.c.3.s8 %v6545_v47 }
 0x26a   : > { %v3626_v51 = vadd.f32 -1.8044444, %v3410_v22  ;;  %v2982_v39 = vand.u32 255, %v2766_v29  ;;  %v3197_v9 = vcvt.s32.f32 %v2981_v15  ;;  %v2768_v61 = vunpack.c.3.s8 %v6549_v59 }
 0x26b   : > { %4408 = vst [vmem:[%s6200_s17 + $0x278] sm:$0xff] %v5017_v55  ;;  %v3412_v53 = vmul.f32 0.017124753, %v3196_v31  ;;  %v3627_v63 = vadd.f32 -2.117904, %v3411_v13  ;;  %v2983_v42 = vand.u32 255, %v2767_v1  ;;  %v2769_v43 = vunpack.c.0.s8 %v6579_v16 }
 0x26c   : > { %v5018_v14 = vpack.c.bf16 %v3626_v51, %v3625_v40  ;;  %v3198_v47 = vcvt.s32.f32 %v2982_v39  ;;  %v3413_v5 = vmul.f32 0.017507004, %v3197_v9  ;;  %v2984_v35 = vand.u32 255, %v2768_v61 }
 0x26d   : > { %v3628_v49 = vadd.f32 -2.117904, %v3412_v53  ;;  %v3199_v2 = vcvt.s32.f32 %v2983_v42  ;;  %v2770_v59 = vunpack.c.0.s8 %v6585_v17  ;;  %v2985_v8 = vand.u32 255, %v2769_v43 }
 0x26e   : > { %4409 = vst [vmem:[%s6200_s17 + $0x280] sm:$0xff] %v5018_v14  ;;  %v3414_v45 = vmul.f32 0.017507004, %v3198_v47  ;;  %v3629_v58 = vadd.f32 -2.0357144, %v3413_v5  ;;  %v3200_v11 = vcvt.s32.f32 %v2984_v35  ;;  %v2771_v48 = vunpack.c.0.s8 %v6590_v10 }
 0x26f   : > { %v5019_v19 = vpack.c.bf16 %v3628_v49, %v3627_v63  ;;  %v3415_v36 = vmul.f32 0.017429193, %v3199_v2  ;;  %v2986_v33 = vand.u32 255, %v2770_v59  ;;  %v3201_v50 = vcvt.s32.f32 %v2985_v8 }
 0x270   : > { %v3630_v37 = vadd.f32 -2.0357144, %v3414_v45  ;;  %v3416_v56 = vmul.f32 0.017429193, %v3200_v11  ;;  %v2772_v57 = vunpack.c.0.s8 %v6594_v30  ;;  %v2987_v4 = vand.u32 255, %v2771_v48 }
 0x271   : > { %4410 = vst [vmem:[%s6200_s17 + $0x288] sm:$0xff] %v5019_v19  ;;  %v3631_v46 = vadd.f32 -1.8044444, %v3415_v36  ;;  %v3202_v32 = vcvt.s32.f32 %v2986_v33  ;;  %v3417_v21 = vmul.f32 0.017124753, %v3201_v50  ;;  %v2773_v34 = vunpack.c.0.s8 %v6599_v26 }
 0x272   : > { %v5020_v60 = vpack.c.bf16 %v3630_v37, %v3629_v58  ;;  %v3632_v20 = vadd.f32 -1.8044444, %v3416_v56  ;;  %v2988_v38 = vand.u32 255, %v2772_v57  ;;  %v3203_v12 = vcvt.s32.f32 %v2987_v4 }
 0x273   : > { %v3418_v24 = vmul.f32 0.017124753, %v3202_v32  ;;  %v3633_v54 = vadd.f32 -2.117904, %v3417_v21  ;;  %v2774_v7 = vunpack.c.0.s8 %v6603_v3  ;;  %v2989_v52 = vand.u32 255, %v2773_v34 }
 0x274   : > { %4411 = vst [vmem:[%s6200_s17 + $0x290] sm:$0xff] %v5020_v60  ;;  %v5021_v62 = vpack.c.bf16 %v3632_v20, %v3631_v46  ;;  %v3204_v28 = vcvt.s32.f32 %v2988_v38  ;;  %v3419_v27 = vmul.f32 0.017507004, %v3203_v12  ;;  %v2775_v6 = vunpack.c.1.s8 %v6579_v16 }
 0x275   : > { %v3634_v25 = vadd.f32 -2.117904, %v3418_v24  ;;  %v2990_v0 = vand.u32 255, %v2774_v7  ;;  %v3205_v44 = vcvt.s32.f32 %v2989_v52  ;;  %v2776_v18 = vunpack.c.1.s8 %v6585_v17 }
 0x276   : > { %4412 = vst [vmem:[%s6200_s17 + $0x298] sm:$0xff] %v5021_v62  ;;  %v3420_v41 = vmul.f32 0.017507004, %v3204_v28  ;;  %v3635_v23 = vadd.f32 -2.0357144, %v3419_v27  ;;  %v2991_v22 = vand.u32 255, %v2775_v6  ;;  %v2777_v40 = vunpack.c.1.s8 %v6590_v10 }
 0x277   : > { %v5022_v29 = vpack.c.bf16 %v3634_v25, %v3633_v54  ;;  %v3206_v15 = vcvt.s32.f32 %v2990_v0  ;;  %v3421_v55 = vmul.f32 0.017429193, %v3205_v44  ;;  %v2992_v31 = vand.u32 255, %v2776_v18 }
 0x278   : > { %v3636_v13 = vadd.f32 -2.0357144, %v3420_v41  ;;  %v3207_v1 = vcvt.s32.f32 %v2991_v22  ;;  %v2778_v51 = vunpack.c.1.s8 %v6594_v30  ;;  %v2993_v39 = vand.u32 255, %v2777_v40 }
 0x279   : > { %4413 = vst [vmem:[%s6200_s17 + $0x2a0] sm:$0xff] %v5022_v29  ;;  %v3422_v9 = vmul.f32 0.017429193, %v3206_v15  ;;  %v3637_v61 = vadd.f32 -1.8044444, %v3421_v55  ;;  %v3208_v53 = vcvt.s32.f32 %v2992_v31  ;;  %v2779_v63 = vunpack.c.1.s8 %v6599_v26 }
 0x27a   : > { %v5023_v42 = vpack.c.bf16 %v3636_v13, %v3635_v23  ;;  %v3423_v43 = vmul.f32 0.017124753, %v3207_v1  ;;  %v2994_v14 = vand.u32 255, %v2778_v51  ;;  %v3209_v47 = vcvt.s32.f32 %v2993_v39 }
 0x27b   : > { %v3638_v5 = vadd.f32 -1.8044444, %v3422_v9  ;;  %v3424_v35 = vmul.f32 0.017124753, %v3208_v53  ;;  %v2780_v49 = vunpack.c.1.s8 %v6603_v3  ;;  %v2995_v2 = vand.u32 255, %v2779_v63 }
 0x27c   : > { %4414 = vst [vmem:[%s6200_s17 + $0x2a8] sm:$0xff] %v5023_v42  ;;  %v3639_v59 = vadd.f32 -2.117904, %v3423_v43  ;;  %v3210_v8 = vcvt.s32.f32 %v2994_v14  ;;  %v3425_v45 = vmul.f32 0.017507004, %v3209_v47  ;;  %v2781_v58 = vunpack.c.2.s8 %v6579_v16 }
 0x27d   : > { %v5024_v11 = vpack.c.bf16 %v3638_v5, %v3637_v61  ;;  %v3640_v48 = vadd.f32 -2.117904, %v3424_v35  ;;  %v2996_v19 = vand.u32 255, %v2780_v49  ;;  %v3211_v36 = vcvt.s32.f32 %v2995_v2 }
 0x27e   : > { %v3426_v33 = vmul.f32 0.017507004, %v3210_v8  ;;  %v3641_v50 = vadd.f32 -2.0357144, %v3425_v45  ;;  %v2782_v37 = vunpack.c.2.s8 %v6585_v17  ;;  %v2997_v56 = vand.u32 255, %v2781_v58 }
 0x27f   : > { %4415 = vst [vmem:[%s6200_s17 + $0x2b0] sm:$0xff] %v5024_v11  ;;  %v5025_v57 = vpack.c.bf16 %v3640_v48, %v3639_v59  ;;  %v3212_v4 = vcvt.s32.f32 %v2996_v19  ;;  %v3427_v46 = vmul.f32 0.017429193, %v3211_v36  ;;  %v2783_v32 = vunpack.c.2.s8 %v6590_v10  ;;  %v6639_v11 = vld [vmem:[%s5507_s4 + $0x188] sm:$0xff] }
 0x280   : > { %v3642_v21 = vadd.f32 -2.0357144, %v3426_v33  ;;  %v2998_v34 = vand.u32 255, %v2782_v37  ;;  %v3213_v60 = vcvt.s32.f32 %v2997_v56  ;;  %v2784_v20 = vunpack.c.2.s8 %v6594_v30  ;;  %v6644_v33 = vld [vmem:[%s5507_s4 + $0x190] sm:$0xff] }
 0x281   : > { %4416 = vst [vmem:[%s6200_s17 + $0x2b8] sm:$0xff] %v5025_v57  ;;  %v3428_v38 = vmul.f32 0.017429193, %v3212_v4  ;;  %v3643_v12 = vadd.f32 -1.8044444, %v3427_v46  ;;  %v2999_v24 = vand.u32 255, %v2783_v32  ;;  %v2785_v54 = vunpack.c.2.s8 %v6599_v26 }
 0x282   : > { %v5026_v7 = vpack.c.bf16 %v3642_v21, %v3641_v50  ;;  %v3214_v52 = vcvt.s32.f32 %v2998_v34  ;;  %v3429_v62 = vmul.f32 0.017124753, %v3213_v60  ;;  %v3000_v28 = vand.u32 255, %v2784_v20  ;;  %v6648_v32 = vld [vmem:[%s5507_s4 + $0x198] sm:$0xff] }
 0x283   : > { %v3644_v27 = vadd.f32 -1.8044444, %v3428_v38  ;;  %v3215_v6 = vcvt.s32.f32 %v2999_v24  ;;  %v2786_v25 = vunpack.c.2.s8 %v6603_v3  ;;  %v3001_v0 = vand.u32 255, %v2785_v54  ;;  %v6653_v38 = vld [vmem:[%s5507_s4 + $0x1a0] sm:$0xff] }
 0x284   : > { %4417 = vst [vmem:[%s6200_s17 + $0x2c0] sm:$0xff] %v5026_v7  ;;  %v3430_v44 = vmul.f32 0.017124753, %v3214_v52  ;;  %v3645_v18 = vadd.f32 -2.117904, %v3429_v62  ;;  %v3216_v41 = vcvt.s32.f32 %v3000_v28  ;;  %v2787_v23 = vunpack.c.3.s8 %v6579_v16 }
 0x285   : > { %v5027_v22 = vpack.c.bf16 %v3644_v27, %v3643_v12  ;;  %v3431_v40 = vmul.f32 0.017507004, %v3215_v6  ;;  %v3002_v29 = vand.u32 255, %v2786_v25  ;;  %v3217_v15 = vcvt.s32.f32 %v3001_v0  ;;  %v6657_v6 = vld [vmem:[%s5507_s4 + $0x1a8] sm:$0xff] }
 0x286   : > { %v3646_v55 = vadd.f32 -2.117904, %v3430_v44  ;;  %v3432_v31 = vmul.f32 0.017507004, %v3216_v41  ;;  %v2788_v13 = vunpack.c.3.s8 %v6585_v17  ;;  %v3003_v1 = vand.u32 255, %v2787_v23  ;;  %v6633_v17 = vld [vmem:[%s5507_s4 + $0x180] sm:$0xff] }
 0x287   : > { %4418 = vst [vmem:[%s6200_s17 + $0x2c8] sm:$0xff] %v5027_v22  ;;  %v3647_v51 = vadd.f32 -2.0357144, %v3431_v40  ;;  %v3218_v39 = vcvt.s32.f32 %v3002_v29  ;;  %v3433_v9 = vmul.f32 0.017429193, %v3217_v15  ;;  %v2789_v61 = vunpack.c.3.s8 %v6590_v10  ;;  %s4474_s4 = sshll.u32 %s6200_s17, 4  ;;  %s6700_s4 = int_to_ptr.vmem [resolvable:$true] %s4474_s4 }
 0x288   : > { %v5028_v53 = vpack.c.bf16 %v3646_v55, %v3645_v18  ;;  %v3648_v63 = vadd.f32 -2.0357144, %v3432_v31  ;;  %v3004_v16 = vand.u32 255, %v2788_v13  ;;  %v3219_v42 = vcvt.s32.f32 %v3003_v1  ;;  %s5254_s6 = scalar_lea.vmem %s6700_s4, 13824  ;;  %p5261_p10 = scmp.lt.s32.totalorder %s6700_s4, %s5259_s7 }
 0x289   : > { %v3434_v43 = vmul.f32 0.017429193, %v3218_v39  ;;  %v3649_v14 = vadd.f32 -1.8044444, %v3433_v9  ;;  %v2790_v47 = vunpack.c.3.s8 %v6594_v30  ;;  %v3005_v5 = vand.u32 255, %v2789_v61  ;;  %p5255_p4 = scmp.ne.s32.totalorder %s6700_s4, %s5254_s6  ;;  %p5262_p0 = scmp.lt.s32.totalorder %s5260_s27, %s5254_s6 }
 0x28a   : > { %4419 = vst [vmem:[%s6200_s17 + $0x2d0] sm:$0xff] %v5028_v53  ;;  %v5029_v35 = vpack.c.bf16 %v3648_v63, %v3647_v51  ;;  %v3220_v49 = vcvt.s32.f32 %v3004_v16  ;;  %v3435_v2 = vmul.f32 0.017124753, %v3219_v42  ;;  %v2791_v10 = vunpack.c.3.s8 %v6599_v26 }
 0x28b   : > { %v3650_v59 = vadd.f32 -1.8044444, %v3434_v43  ;;  %v3006_v8 = vand.u32 255, %v2790_v47  ;;  %v3221_v45 = vcvt.s32.f32 %v3005_v5  ;;  %v2792_v58 = vunpack.c.3.s8 %v6603_v3  ;;  %p5256_p7 = pnand %p5255_p4, %p6846_p11  ;;  %p5263_p2 = por %p5262_p0, %p5261_p10 }
 0x28c   : > { %4420 = vst [vmem:[%s6200_s17 + $0x2d8] sm:$0xff] %v5029_v35  ;;  %v3436_v30 = vmul.f32 0.017124753, %v3220_v49  ;;  %v3651_v48 = vadd.f32 -2.117904, %v3435_v2  ;;  %v3007_v19 = vand.u32 255, %v2791_v10  ;;  %v2793_v36 = vunpack.c.0.s8 %v6633_v17 }
 0x28d   : > { %v5030_v50 = vpack.c.bf16 %v3650_v59, %v3649_v14  ;;  %v3222_v26 = vcvt.s32.f32 %v3006_v8  ;;  %v3437_v37 = vmul.f32 0.017507004, %v3221_v45  ;;  %v3008_v56 = vand.u32 255, %v2792_v58  ;;  %p5257_p8 = pneg %p5256_p7 }
 0x28e   : > { %v3652_v57 = vadd.f32 -2.117904, %v3436_v30  ;;  %v3223_v4 = vcvt.s32.f32 %v3007_v19  ;;  %v2794_v3 = vunpack.c.0.s8 %v6639_v11  ;;  %v3009_v46 = vand.u32 255, %v2793_v36 }
 0x28f   : > { %4421 = vst [vmem:[%s6200_s17 + $0x2e0] sm:$0xff] %v5030_v50  ;;  %v3438_v21 = vmul.f32 0.017507004, %v3222_v26  ;;  %v3653_v34 = vadd.f32 -2.0357144, %v3437_v37  ;;  %v3224_v60 = vcvt.s32.f32 %v3008_v56  ;;  %v2795_v20 = vunpack.c.0.s8 %v6644_v33  ;;  %p5264_p6 = pnand %p5263_p2, %p5257_p8 }
 0x290   : > { %v5031_v12 = vpack.c.bf16 %v3652_v57, %v3651_v48  ;;  %v3439_v24 = vmul.f32 0.017429193, %v3223_v4  ;;  %v3010_v54 = vand.u32 255, %v2794_v3  ;;  %v3225_v7 = vcvt.s32.f32 %v3009_v46 }
 0x291   : > { %v3654_v52 = vadd.f32 -2.0357144, %v3438_v21  ;;  %v3440_v62 = vmul.f32 0.017429193, %v3224_v60  ;;  %v2796_v28 = vunpack.c.0.s8 %v6648_v32  ;;  %v3011_v27 = vand.u32 255, %v2795_v20 }
 0x292   : > { %4422 = vst [vmem:[%s6200_s17 + $0x2e8] sm:$0xff] %v5031_v12  ;;  %v3655_v25 = vadd.f32 -1.8044444, %v3439_v24  ;;  %v3226_v0 = vcvt.s32.f32 %v3010_v54  ;;  %v3441_v44 = vmul.f32 0.017124753, %v3225_v7  ;;  %v2797_v18 = vunpack.c.0.s8 %v6653_v38 }
 0x293   : > { %v5032_v41 = vpack.c.bf16 %v3654_v52, %v3653_v34  ;;  %v3656_v23 = vadd.f32 -1.8044444, %v3440_v62  ;;  %v3012_v22 = vand.u32 255, %v2796_v28  ;;  %v3227_v40 = vcvt.s32.f32 %v3011_v27 }
 0x294   : > { %v3442_v29 = vmul.f32 0.017124753, %v3226_v0  ;;  %v3657_v15 = vadd.f32 -2.117904, %v3441_v44  ;;  %v2798_v55 = vunpack.c.0.s8 %v6657_v6  ;;  %v3013_v31 = vand.u32 255, %v2797_v18 }
 0x295   : > { %4423 = vst [vmem:[%s6200_s17 + $0x2f0] sm:$0xff] %v5032_v41  ;;  %v5033_v13 = vpack.c.bf16 %v3656_v23, %v3655_v25  ;;  %v3228_v1 = vcvt.s32.f32 %v3012_v22  ;;  %v3443_v51 = vmul.f32 0.017507004, %v3227_v40  ;;  %v2799_v39 = vunpack.c.1.s8 %v6633_v17 }
 0x296   : > { %v3658_v9 = vadd.f32 -2.117904, %v3442_v29  ;;  %v3014_v61 = vand.u32 255, %v2798_v55  ;;  %v3229_v53 = vcvt.s32.f32 %v3013_v31  ;;  %v2800_v63 = vunpack.c.1.s8 %v6639_v11 }
 0x297   : > { %4424 = vst [vmem:[%s6200_s17 + $0x2f8] sm:$0xff] %v5033_v13  ;;  %v3444_v16 = vmul.f32 0.017507004, %v3228_v1  ;;  %v3659_v42 = vadd.f32 -2.0357144, %v3443_v51  ;;  %v3015_v43 = vand.u32 255, %v2799_v39  ;;  %v2801_v14 = vunpack.c.1.s8 %v6644_v33 }
 0x298   : > { %v5034_v47 = vpack.c.bf16 %v3658_v9, %v3657_v15  ;;  %v3230_v5 = vcvt.s32.f32 %v3014_v61  ;;  %v3445_v35 = vmul.f32 0.017429193, %v3229_v53  ;;  %v3016_v49 = vand.u32 255, %v2800_v63 }
 0x299   : > { %v3660_v2 = vadd.f32 -2.0357144, %v3444_v16  ;;  %v3231_v10 = vcvt.s32.f32 %v3015_v43  ;;  %v2802_v59 = vunpack.c.1.s8 %v6648_v32  ;;  %v3017_v8 = vand.u32 255, %v2801_v14 }
 0x29a   : > { %4425 = vst [vmem:[%s6200_s17 + $0x300] sm:$0xff] %v5034_v47  ;;  %v3446_v45 = vmul.f32 0.017429193, %v3230_v5  ;;  %v3661_v58 = vadd.f32 -1.8044444, %v3445_v35  ;;  %v3232_v30 = vcvt.s32.f32 %v3016_v49  ;;  %v2803_v48 = vunpack.c.1.s8 %v6653_v38 }
 0x29b   : > { %v5035_v19 = vpack.c.bf16 %v3660_v2, %v3659_v42  ;;  %v3447_v36 = vmul.f32 0.017124753, %v3231_v10  ;;  %v3018_v50 = vand.u32 255, %v2802_v59  ;;  %v3233_v26 = vcvt.s32.f32 %v3017_v8 }
 0x29c   : > { %v3662_v37 = vadd.f32 -1.8044444, %v3446_v45  ;;  %v3448_v56 = vmul.f32 0.017124753, %v3232_v30  ;;  %v2804_v57 = vunpack.c.1.s8 %v6657_v6  ;;  %v3019_v4 = vand.u32 255, %v2803_v48 }
 0x29d   : > { %4426 = vst [vmem:[%s6200_s17 + $0x308] sm:$0xff] %v5035_v19  ;;  %v3663_v3 = vadd.f32 -2.117904, %v3447_v36  ;;  %v3234_v46 = vcvt.s32.f32 %v3018_v50  ;;  %v3449_v21 = vmul.f32 0.017507004, %v3233_v26  ;;  %v2805_v34 = vunpack.c.2.s8 %v6633_v17 }
 0x29e   : > { %v5036_v60 = vpack.c.bf16 %v3662_v37, %v3661_v58  ;;  %v3664_v20 = vadd.f32 -2.117904, %v3448_v56  ;;  %v3020_v12 = vand.u32 255, %v2804_v57  ;;  %v3235_v24 = vcvt.s32.f32 %v3019_v4 }
 0x29f   : > { %v3450_v54 = vmul.f32 0.017507004, %v3234_v46  ;;  %v3665_v7 = vadd.f32 -2.0357144, %v3449_v21  ;;  %v2806_v52 = vunpack.c.2.s8 %v6639_v11  ;;  %v3021_v62 = vand.u32 255, %v2805_v34 }
 0x2a0   : > { %4427 = vst [vmem:[%s6200_s17 + $0x310] sm:$0xff] %v5036_v60  ;;  %v5037_v28 = vpack.c.bf16 %v3664_v20, %v3663_v3  ;;  %v3236_v27 = vcvt.s32.f32 %v3020_v12  ;;  %v3451_v25 = vmul.f32 0.017429193, %v3235_v24  ;;  %v2807_v0 = vunpack.c.2.s8 %v6644_v33 }
 0x2a1   : > { %v3666_v44 = vadd.f32 -2.0357144, %v3450_v54  ;;  %v3022_v18 = vand.u32 255, %v2806_v52  ;;  %v3237_v41 = vcvt.s32.f32 %v3021_v62  ;;  %v2808_v23 = vunpack.c.2.s8 %v6648_v32 }
 0x2a2   : > { %4428 = vst [vmem:[%s6200_s17 + $0x318] sm:$0xff] %v5037_v28  ;;  %v3452_v22 = vmul.f32 0.017429193, %v3236_v27  ;;  %v3667_v40 = vadd.f32 -1.8044444, %v3451_v25  ;;  %v3023_v29 = vand.u32 255, %v2807_v0  ;;  %v2809_v15 = vunpack.c.2.s8 %v6653_v38 }
 0x2a3   : > { %v5038_v55 = vpack.c.bf16 %v3666_v44, %v3665_v7  ;;  %v3238_v31 = vcvt.s32.f32 %v3022_v18  ;;  %v3453_v13 = vmul.f32 0.017124753, %v3237_v41  ;;  %v3024_v1 = vand.u32 255, %v2808_v23 }
 0x2a4   : > { %v3668_v51 = vadd.f32 -1.8044444, %v3452_v22  ;;  %v3239_v39 = vcvt.s32.f32 %v3023_v29  ;;  %v2810_v9 = vunpack.c.2.s8 %v6657_v6  ;;  %v3025_v61 = vand.u32 255, %v2809_v15 }
 0x2a5   : > { %4429 = vst [vmem:[%s6200_s17 + $0x320] sm:$0xff] %v5038_v55  ;;  %v3454_v53 = vmul.f32 0.017124753, %v3238_v31  ;;  %v3669_v63 = vadd.f32 -2.117904, %v3453_v13  ;;  %v3240_v16 = vcvt.s32.f32 %v3024_v1  ;;  %v2811_v42 = vunpack.c.3.s8 %v6633_v17 }
 0x2a6   : > { %v5039_v43 = vpack.c.bf16 %v3668_v51, %v3667_v40  ;;  %v3455_v14 = vmul.f32 0.017507004, %v3239_v39  ;;  %v3026_v47 = vand.u32 255, %v2810_v9  ;;  %v3241_v5 = vcvt.s32.f32 %v3025_v61 }
 0x2a7   : > { %v3670_v35 = vadd.f32 -2.117904, %v3454_v53  ;;  %v3456_v49 = vmul.f32 0.017507004, %v3240_v16  ;;  %v2812_v2 = vunpack.c.3.s8 %v6639_v11  ;;  %v3027_v10 = vand.u32 255, %v2811_v42 }
 0x2a8   : > { %4430 = vst [vmem:[%s6200_s17 + $0x328] sm:$0xff] %v5039_v43  ;;  %v3671_v59 = vadd.f32 -2.0357144, %v3455_v14  ;;  %v3242_v8 = vcvt.s32.f32 %v3026_v47  ;;  %v3457_v45 = vmul.f32 0.017429193, %v3241_v5  ;;  %v2813_v58 = vunpack.c.3.s8 %v6644_v33 }
 0x2a9   : > { %v5040_v30 = vpack.c.bf16 %v3670_v35, %v3669_v63  ;;  %v3672_v48 = vadd.f32 -2.0357144, %v3456_v49  ;;  %v3028_v17 = vand.u32 255, %v2812_v2  ;;  %v3243_v19 = vcvt.s32.f32 %v3027_v10 }
 0x2aa   : > { %v3458_v36 = vmul.f32 0.017429193, %v3242_v8  ;;  %v3673_v50 = vadd.f32 -1.8044444, %v3457_v45  ;;  %v2814_v26 = vunpack.c.3.s8 %v6648_v32  ;;  %v3029_v37 = vand.u32 255, %v2813_v58 }
 0x2ab   : > { %4431 = vst [vmem:[%s6200_s17 + $0x330] sm:$0xff] %v5040_v30  ;;  %v5041_v56 = vpack.c.bf16 %v3672_v48, %v3671_v59  ;;  %v3244_v11 = vcvt.s32.f32 %v3028_v17  ;;  %v3459_v57 = vmul.f32 0.017124753, %v3243_v19  ;;  %v2815_v4 = vunpack.c.3.s8 %v6653_v38 }
 0x2ac   : > { %v3674_v3 = vadd.f32 -1.8044444, %v3458_v36  ;;  %v3030_v46 = vand.u32 255, %v2814_v26  ;;  %v3245_v33 = vcvt.s32.f32 %v3029_v37  ;;  %v2816_v21 = vunpack.c.3.s8 %v6657_v6 }
 0x2ad   : > { %4432 = vst [vmem:[%s6200_s17 + $0x338] sm:$0xff] %v5041_v56  ;;  %v3460_v34 = vmul.f32 0.017124753, %v3244_v11  ;;  %v3675_v60 = vadd.f32 -2.117904, %v3459_v57  ;;  %v3031_v20 = vand.u32 255, %v2815_v4 }
 0x2ae   : > { %v5042_v32 = vpack.c.bf16 %v3674_v3, %v3673_v50  ;;  %v3246_v12 = vcvt.s32.f32 %v3030_v46  ;;  %v3461_v24 = vmul.f32 0.017507004, %v3245_v33  ;;  %v3032_v54 = vand.u32 255, %v2816_v21 }
 0x2af   : > { %v3676_v7 = vadd.f32 -2.117904, %v3460_v34  ;;  %v3247_v52 = vcvt.s32.f32 %v3031_v20 }
 0x2b0   : > { %4433 = vst [vmem:[%s6200_s17 + $0x340] sm:$0xff] %v5042_v32  ;;  %v3462_v38 = vmul.f32 0.017507004, %v3246_v12  ;;  %v3677_v62 = vadd.f32 -2.0357144, %v3461_v24  ;;  %v3248_v6 = vcvt.s32.f32 %v3032_v54 }
 0x2b1   : > { %v5043_v28 = vpack.c.bf16 %v3676_v7, %v3675_v60  ;;  %v3463_v27 = vmul.f32 0.017429193, %v3247_v52 }
 0x2b2   : > { %v3678_v25 = vadd.f32 -2.0357144, %v3462_v38  ;;  %v3464_v0 = vmul.f32 0.017429193, %v3248_v6 }
 0x2b3   : > { %4434 = vst [vmem:[%s6200_s17 + $0x348] sm:$0xff] %v5043_v28  ;;  %v3679_v44 = vadd.f32 -1.8044444, %v3463_v27 }
 0x2b4   : > { %v5044_v18 = vpack.c.bf16 %v3678_v25, %v3677_v62  ;;  %v3680_v41 = vadd.f32 -1.8044444, %v3464_v0 }
 0x2b6   : > { %4435 = vst [vmem:[%s6200_s17 + $0x350] sm:$0xff] %v5044_v18  ;;  %v5045_v23 = vpack.c.bf16 %v3680_v41, %v3679_v44 }
 0x2b8   : > { %4436 = vst [vmem:[%s6200_s17 + $0x358] sm:$0xff] %v5045_v23 }
 0x2b9   : > { %5267 = shalt.err (!%p5264_p6)
}
 0x2ba   : > { %s5268_s17 = scalar_lea.hbm %s6698_s8, 13824  ;;  %s5272_s25 = scalar_lea.hbm %s6748_s3, 27648 }
 0x2bb   : > { %p5269_p9 = scmp.ne.s32.totalorder %s6698_s8, %s5268_s17  ;;  %p5273_p5 = scmp.lt.s32.totalorder %s6698_s8, %s6748_s3 }
 0x2bc   : > { %p5274_p1 = scmp.lt.s32.totalorder %s5272_s25, %s5268_s17 }
 0x2bd   : > { %p5270_p12 = pnand %p5269_p9, %p6846_p11 }
 0x2be   : > { %p5275_p13 = por %p5274_p1, %p5273_p5 }
 0x2bf   : > { %p5271_p3 = pneg %p5270_p12 }
 0x2c1   : > { %p5276_p4 = pnand %p5275_p13, %p5271_p3 }
 0x2c3   : > { %5279 = shalt.err (!%p5276_p4)
}
 0x2c4   : > { %s5336_s28 = smov 384   ;;  %s5337_s29 = smov 24  }
 0x2c5   : > { %5059 = dma.vmem_to_hbm [thread:$0]  (%p6846_p11), %s6700_s4, 13824, %s6698_s8, %s4443_s11, %s5336_s28, %s5336_s28, %s5337_s29  }
 0x2c6 PF: > { %s4489_s9 = sand.u32 1, %s5314_s12   ;;  %p6847_p7 = scmp.ne.s32.totalorder %s6782_s24, 0 }
 0x2c7   : > { %p6848_p8 = scmp.ge.s32.totalorder %s5326_s15, 2  ;;  %s4490_s30 = scalar_lea.sflag [#allocation4], %s4489_s9 }
 0x2c9   : > { %p5070_p10 = pnand %p6848_p8, %p6847_p7 }
 0x2cb   : > { %p5071_p0 = pneg %p5070_p10 }
 0x2cd   : > { %5305 = dma.done.wait (%p5071_p0), %s4490_s30, 13824  }
 0x2ce   : > { %5307 = vsyncadd (%p5071_p0), %s4490_s30, 4294953472  ;;  %s4499_s5 = scalar_lea.sflag [#allocation9], %s4489_s9 }
 0x2cf   : > { %5309 = dma.done.wait (%p5071_p0), %s4499_s5, 13824  }
 0x2d0   : > { %5311 = vsyncadd (%p5071_p0), %s4499_s5, 4294953472  ;;  %p23_p11 = scmp.ge.s32.totalorder %s5383_s18, 4   ;;  %s6849_s12 = smov %s5318_s13 }
 0x2d1   : > { %s6850_s13 = smov %s5322_s14  ;;  %s6851_s14 = smov %s5395_s21 }
 0x2d2   : > { %s6852_s15 = smov %s5383_s18  ;;  %25 = sbr.rel (!%p23_p11) target bundleno = 9 (0x9), region = 103 }
 0x2d7   :  { %4504 = vsyncpa [#allocation3], 1 }
 0x2d8   :  { %4506 = vsyncpa [#allocation3 + $0x1], 1 }
 0x2d9   :  { %4507 = vsyncpa [#allocation6], 1 }
 0x2da   :  { %4509 = vsyncpa [#allocation6 + $0x1], 1 }
 0x2db   :  { %4510 = vsyncpa [#allocation4], 1 }
 0x2dc   :  { %4512 = vsyncpa [#allocation4 + $0x1], 1 }
 0x2dd   :  { %4513 = vsyncpa [#allocation9], 1 }
 0x2de   :  { %4515 = vsyncpa [#allocation9 + $0x1], 1 }

</bundles_post_ra>
